<compile_context>
chip_gen: v6e
topology: v6e:2x2x1
jax: 0.10.0
libtpu: 0.0.40
codegen_flags: <defaults>
</compile_context>

<pallas_src>
import functools

import jax
import jax.numpy as jnp
from jax.experimental import pallas as pl
from jax.experimental.pallas import tpu as pltpu


# --------------------------------------------------------------------------- #
# Fused kernel: qkv projection + multi-head attention + output projection
# --------------------------------------------------------------------------- #
def fused_lora_mha_kernel(x_ref, wqkv_ref, bqkv_ref, wproj_ref, bproj_ref,
                          out_ref, *, num_heads, head_dim):
    """One grid step == one batch element.

    x_ref    : (1, HW, dim)      wqkv_ref : (dim, 3*dim)   bqkv_ref : (1, 3*dim)
    wproj_ref: (dim, dim)        bproj_ref: (1, dim)
    out_ref  : (1, HW, dim)

    LoRA deltas + the attention scale are already folded into wqkv/bqkv.
    """
    dim = num_heads * head_dim
    x = x_ref[0]                                                  # (HW, dim)

    # Single dense qkv projection (LoRA + scale folded into the weight).
    qkv = (jnp.dot(x, wqkv_ref[...], preferred_element_type=jnp.float32)
           + bqkv_ref[...])                                       # (HW, 3*dim) f32

    q = qkv[:, :dim]
    k = qkv[:, dim:2 * dim]
    v = qkv[:, 2 * dim:]

    # All heads of this batch element handled here.  Heads are head_dim-wide
    # lane slices of q/k/v (matches the reference's
    # reshape(B, HW, 3, nH, hd).permute(...) layout).
    head_outs = []
    for h in range(num_heads):
        sl = slice(h * head_dim, (h + 1) * head_dim)
        qh, kh, vh = q[:, sl], k[:, sl], v[:, sl]

        # scores: contract the trailing head_dim axes of q and k (no .T).
        s = jax.lax.dot_general(qh, kh, (((1,), (1,)), ((), ())),
                                preferred_element_type=jnp.float32)  # (HW, HW)
        m = jnp.max(s, axis=-1, keepdims=True)                       # XLU reduce
        p = jnp.exp(s - m)                                           # EUP
        p = p * pl.reciprocal(jnp.sum(p, axis=-1, keepdims=True), approx=True)

        head_outs.append(jnp.dot(p, vh, preferred_element_type=jnp.float32))

    o = jnp.concatenate(head_outs, axis=-1)                       # (HW, dim)

    # Output projection.
    y = (jnp.dot(o, wproj_ref[...], preferred_element_type=jnp.float32)
         + bproj_ref[...])
    out_ref[0] = y.astype(out_ref.dtype)


# --------------------------------------------------------------------------- #
# Wrapper
# --------------------------------------------------------------------------- #
def lora_mha_forward(x, params, num_heads):
    B, H, W, dim = x.shape
    HW = H * W
    hd = dim // num_heads
    scale = hd ** (-0.5)

    # ---- one-time parameter prep (glue, plain JAX) ------------------------ #
    # SVD-LoRA effective delta applied as x @ dW:
    #   dW = (A * E).T @ B.T * scaling
    aq = (params["lora_A_q"] * params["lora_E_q"]).T * params["scaling"]  # (dim, r)
    av = (params["lora_A_v"] * params["lora_E_v"]).T * params["scaling"]  # (dim, r)
    dWq = aq @ params["lora_B_q"].T                                       # (dim, dim)
    dWv = av @ params["lora_B_v"].T                                       # (dim, dim)

    w = params["w_qkv"].T                       # (dim, 3*dim), cols = [q | k | v]
    b = params["b_qkv"]                         # (3*dim,)
    w_q = (w[:, :dim] + dWq) * scale            # fold LoRA-q and attention scale
    w_k = w[:, dim:2 * dim]                     # k has no LoRA (enable_lora[1]=False)
    w_v = w[:, 2 * dim:] + dWv                  # fold LoRA-v
    w_qkv = jnp.concatenate([w_q, w_k, w_v], axis=1)                      # (dim, 3*dim)
    b_qkv = jnp.concatenate([b[:dim] * scale, b[dim:]]).reshape(1, 3 * dim)

    w_proj = params["w_proj"].T                 # (dim, dim)
    b_proj = params["b_proj"].reshape(1, dim)

    xf = x.reshape(B, HW, dim)                  # free reshape, no transpose

    kernel = functools.partial(fused_lora_mha_kernel,
                               num_heads=num_heads, head_dim=hd)

    y = pl.pallas_call(
        kernel,
        grid=(B,),
        in_specs=[
            pl.BlockSpec((1, HW, dim), lambda i: (i, 0, 0)),      # x: pipelined per batch
            pl.BlockSpec((dim, 3 * dim), lambda i: (0, 0)),       # weights stay resident
            pl.BlockSpec((1, 3 * dim), lambda i: (0, 0)),
            pl.BlockSpec((dim, dim), lambda i: (0, 0)),
            pl.BlockSpec((1, dim), lambda i: (0, 0)),
        ],
        out_specs=pl.BlockSpec((1, HW, dim), lambda i: (i, 0, 0)),
        out_shape=jax.ShapeDtypeStruct((B, HW, dim), x.dtype),
        compiler_params=pltpu.CompilerParams(
            dimension_semantics=("parallel",)),                   # v7x: shard batch over TCs
    )(xf, w_qkv, b_qkv, w_proj, b_proj)

    return y.reshape(B, H, W, dim)


# --------------------------------------------------------------------------- #
# Pure-JAX reference (mirrors the PyTorch module, unfolded LoRA path)
# --------------------------------------------------------------------------- #
def reference_forward(x, params, num_heads):
    B, H, W, dim = x.shape
    hd = dim // num_heads
    scale = hd ** (-0.5)
    xf = x.reshape(B, H * W, dim)

    base = xf @ params["w_qkv"].T + params["b_qkv"]
    dq = (xf @ (params["lora_A_q"] * params["lora_E_q"]).T) @ params["lora_B_q"].T * params["scaling"]
    dv = (xf @ (params["lora_A_v"] * params["lora_E_v"]).T) @ params["lora_B_v"].T * params["scaling"]
    qkv = base + jnp.concatenate([dq, jnp.zeros_like(dq), dv], axis=-1)

    qkv = qkv.reshape(B, H * W, 3, num_heads, hd).transpose(2, 0, 3, 1, 4)
    qkv = qkv.reshape(3, B * num_heads, H * W, hd)
    q, k, v = qkv[0], qkv[1], qkv[2]

    attn = jax.nn.softmax((q * scale) @ jnp.swapaxes(k, -2, -1), axis=-1)
    o = (attn @ v).reshape(B, num_heads, H, W, hd).transpose(0, 2, 3, 1, 4).reshape(B, H, W, dim)
    return o @ params["w_proj"].T + params["b_proj"]


# --------------------------------------------------------------------------- #
# Main
# --------------------------------------------------------------------------- #
if __name__ == "__main__":
    B, H, W = 2, 8, 8
    dim, num_heads, r = 128, 8, 4          # head_dim = 16; lane-dense output (128)

    key = jax.random.PRNGKey(0)
    keys = jax.random.split(key, 12)

    # Deterministic synthetic parameters (shapes from the module's __init__).
    # NOTE: real LoRA B-factors are zero-initialized; small random values are
    # used so the low-rank path is actually exercised numerically.
    params = {
        "w_qkv":    jax.random.normal(keys[0], (3 * dim, dim), jnp.float32) * 0.05,
        "b_qkv":    jax.random.normal(keys[1], (3 * dim,), jnp.float32) * 0.01,
        "lora_A_q": jax.random.normal(keys[2], (r, dim), jnp.float32) * 0.05,
        "lora_E_q": jax.random.normal(keys[3], (r, 1), jnp.float32) * 0.1,
        "lora_B_q": jax.random.normal(keys[4], (dim, r), jnp.float32) * 0.05,
        "lora_A_v": jax.random.normal(keys[5], (r, dim), jnp.float32) * 0.05,
        "lora_E_v": jax.random.normal(keys[6], (r, 1), jnp.float32) * 0.1,
        "lora_B_v": jax.random.normal(keys[7], (dim, r), jnp.float32) * 0.05,
        "w_proj":   jax.random.normal(keys[8], (dim, dim), jnp.float32) * 0.05,
        "b_proj":   jax.random.normal(keys[9], (dim,), jnp.float32) * 0.01,
        "scaling":  jnp.float32(1.0),  # lora_alpha / r with lora_alpha == r
    }

    x = jax.random.normal(keys[10], (B, H, W, dim), jnp.float32)

    out = lora_mha_forward(x, params, num_heads)
    out = jax.block_until_ready(out)

    ref = reference_forward(x, params, num_heads)
    assert out.shape == (B, H, W, dim)
    # Tolerance accounts for the approximate (EUP) softmax reciprocal and the
    # inference-time fold of the LoRA factors into the dense qkv weight.
    assert jnp.allclose(out, ref, atol=5e-3, rtol=5e-3), (
        f"max abs diff = {jnp.max(jnp.abs(out - ref))}"
    )

    print("KERNEL_OK")
</pallas_src>

<mosaic_0001>
module attributes {stable_mosaic.version = 11 : i64} {
  func.func @fused_lora_mha_kernel(%arg0: i32, %arg1: memref<1x64x128xf32, #tpu.memory_space<vmem>>, %arg2: memref<128x384xf32, #tpu.memory_space<vmem>>, %arg3: memref<1x384xf32, #tpu.memory_space<vmem>>, %arg4: memref<128x128xf32, #tpu.memory_space<vmem>>, %arg5: memref<1x128xf32, #tpu.memory_space<vmem>>, %arg6: memref<1x64x128xf32, #tpu.memory_space<vmem>>) attributes {dimension_semantics = [#tpu.dimension_semantics<parallel>], iteration_bounds = array<i64: 2>, scalar_prefetch = 0 : i64, scratch_operands = 0 : i64, tpu.core_type = #tpu.core_type<tc>, window_params = [{transform_indices = @transform_0, window_bounds = array<i64: 1, 64, 128>}, {pipeline_mode = #tpu.pipeline_mode<synchronous>, transform_indices = @transform_1, window_bounds = array<i64: 128, 384>}, {pipeline_mode = #tpu.pipeline_mode<synchronous>, transform_indices = @transform_2, window_bounds = array<i64: 1, 384>}, {pipeline_mode = #tpu.pipeline_mode<synchronous>, transform_indices = @transform_3, window_bounds = array<i64: 128, 128>}, {pipeline_mode = #tpu.pipeline_mode<synchronous>, transform_indices = @transform_4, window_bounds = array<i64: 1, 128>}, {transform_indices = @transform_5, window_bounds = array<i64: 1, 64, 128>}]} {
    %c0 = arith.constant 0 : index
    %c0_0 = arith.constant 0 : index
    %c0_1 = arith.constant 0 : index
    %0 = vector.load %arg1[%c0, %c0_0, %c0_1] : memref<1x64x128xf32, #tpu.memory_space<vmem>>, vector<1x64x128xf32>
    %1 = vector.shape_cast %0 : vector<1x64x128xf32> to vector<64x128xf32>
    %c0_2 = arith.constant 0 : index
    %c0_3 = arith.constant 0 : index
    %2 = vector.load %arg2[%c0_2, %c0_3] : memref<128x384xf32, #tpu.memory_space<vmem>>, vector<128x384xf32>
    %cst = arith.constant dense<0.000000e+00> : vector<64x384xf32>
    %3 = tpu.matmul %1, %2, %cst {dimension_numbers = #tpu.dot_dimension_numbers<[1], [0], [0], [1], [0, 0, 1, 1], [], []>} : vector<64x128xf32>, vector<128x384xf32>, vector<64x384xf32> -> vector<64x384xf32>
    %c0_4 = arith.constant 0 : index
    %c0_5 = arith.constant 0 : index
    %4 = vector.load %arg3[%c0_4, %c0_5] : memref<1x384xf32, #tpu.memory_space<vmem>>, vector<1x384xf32>
    %5 = vector.broadcast %4 : vector<1x384xf32> to vector<64x384xf32>
    %6 = arith.addf %3, %5 : vector<64x384xf32>
    %7 = vector.extract_strided_slice %6 {offsets = [0, 0], sizes = [64, 128], strides = [1, 1]} : vector<64x384xf32> to vector<64x128xf32>
    %8 = vector.extract_strided_slice %6 {offsets = [0, 128], sizes = [64, 128], strides = [1, 1]} : vector<64x384xf32> to vector<64x128xf32>
    %9 = vector.extract_strided_slice %6 {offsets = [0, 256], sizes = [64, 128], strides = [1, 1]} : vector<64x384xf32> to vector<64x128xf32>
    %10 = vector.extract_strided_slice %7 {offsets = [0, 0], sizes = [64, 16], strides = [1, 1]} : vector<64x128xf32> to vector<64x16xf32>
    %11 = vector.extract_strided_slice %8 {offsets = [0, 0], sizes = [64, 16], strides = [1, 1]} : vector<64x128xf32> to vector<64x16xf32>
    %12 = vector.extract_strided_slice %9 {offsets = [0, 0], sizes = [64, 16], strides = [1, 1]} : vector<64x128xf32> to vector<64x16xf32>
    %cst_6 = arith.constant dense<0.000000e+00> : vector<64x64xf32>
    %13 = tpu.matmul %10, %11, %cst_6 {dimension_numbers = #tpu.dot_dimension_numbers<[1], [1], [0], [0], [0, 0, 1, 0], [], []>} : vector<64x16xf32>, vector<64x16xf32>, vector<64x64xf32> -> vector<64x64xf32>
    %cst_7 = arith.constant dense<0xFF800000> : vector<64xf32>
    %14 = vector.multi_reduction <maximumf>, %13, %cst_7 [1] : vector<64x64xf32> to vector<64xf32>
    %15 = vector.shape_cast %14 : vector<64xf32> to vector<64x1xf32>
    %16 = vector.broadcast %15 : vector<64x1xf32> to vector<64x64xf32>
    %17 = arith.subf %13, %16 : vector<64x64xf32>
    %18 = math.exp %17 : vector<64x64xf32>
    %cst_8 = arith.constant dense<0.000000e+00> : vector<64xf32>
    %19 = vector.multi_reduction <add>, %18, %cst_8 [1] : vector<64x64xf32> to vector<64xf32>
    %20 = vector.shape_cast %19 : vector<64xf32> to vector<64x1xf32>
    %21 = tpu.reciprocal %20 {approx = true} : vector<64x1xf32> -> vector<64x1xf32>
    %22 = vector.broadcast %21 : vector<64x1xf32> to vector<64x64xf32>
    %23 = arith.mulf %18, %22 : vector<64x64xf32>
    %cst_9 = arith.constant dense<0.000000e+00> : vector<64x16xf32>
    %24 = tpu.matmul %23, %12, %cst_9 {dimension_numbers = #tpu.dot_dimension_numbers<[1], [0], [0], [1], [0, 0, 1, 1], [], []>} : vector<64x64xf32>, vector<64x16xf32>, vector<64x16xf32> -> vector<64x16xf32>
    %25 = vector.extract_strided_slice %7 {offsets = [0, 16], sizes = [64, 16], strides = [1, 1]} : vector<64x128xf32> to vector<64x16xf32>
    %26 = vector.extract_strided_slice %8 {offsets = [0, 16], sizes = [64, 16], strides = [1, 1]} : vector<64x128xf32> to vector<64x16xf32>
    %27 = vector.extract_strided_slice %9 {offsets = [0, 16], sizes = [64, 16], strides = [1, 1]} : vector<64x128xf32> to vector<64x16xf32>
    %cst_10 = arith.constant dense<0.000000e+00> : vector<64x64xf32>
    %28 = tpu.matmul %25, %26, %cst_10 {dimension_numbers = #tpu.dot_dimension_numbers<[1], [1], [0], [0], [0, 0, 1, 0], [], []>} : vector<64x16xf32>, vector<64x16xf32>, vector<64x64xf32> -> vector<64x64xf32>
    %cst_11 = arith.constant dense<0xFF800000> : vector<64xf32>
    %29 = vector.multi_reduction <maximumf>, %28, %cst_11 [1] : vector<64x64xf32> to vector<64xf32>
    %30 = vector.shape_cast %29 : vector<64xf32> to vector<64x1xf32>
    %31 = vector.broadcast %30 : vector<64x1xf32> to vector<64x64xf32>
    %32 = arith.subf %28, %31 : vector<64x64xf32>
    %33 = math.exp %32 : vector<64x64xf32>
    %cst_12 = arith.constant dense<0.000000e+00> : vector<64xf32>
    %34 = vector.multi_reduction <add>, %33, %cst_12 [1] : vector<64x64xf32> to vector<64xf32>
    %35 = vector.shape_cast %34 : vector<64xf32> to vector<64x1xf32>
    %36 = tpu.reciprocal %35 {approx = true} : vector<64x1xf32> -> vector<64x1xf32>
    %37 = vector.broadcast %36 : vector<64x1xf32> to vector<64x64xf32>
    %38 = arith.mulf %33, %37 : vector<64x64xf32>
    %cst_13 = arith.constant dense<0.000000e+00> : vector<64x16xf32>
    %39 = tpu.matmul %38, %27, %cst_13 {dimension_numbers = #tpu.dot_dimension_numbers<[1], [0], [0], [1], [0, 0, 1, 1], [], []>} : vector<64x64xf32>, vector<64x16xf32>, vector<64x16xf32> -> vector<64x16xf32>
    %40 = vector.extract_strided_slice %7 {offsets = [0, 32], sizes = [64, 16], strides = [1, 1]} : vector<64x128xf32> to vector<64x16xf32>
    %41 = vector.extract_strided_slice %8 {offsets = [0, 32], sizes = [64, 16], strides = [1, 1]} : vector<64x128xf32> to vector<64x16xf32>
    %42 = vector.extract_strided_slice %9 {offsets = [0, 32], sizes = [64, 16], strides = [1, 1]} : vector<64x128xf32> to vector<64x16xf32>
    %cst_14 = arith.constant dense<0.000000e+00> : vector<64x64xf32>
    %43 = tpu.matmul %40, %41, %cst_14 {dimension_numbers = #tpu.dot_dimension_numbers<[1], [1], [0], [0], [0, 0, 1, 0], [], []>} : vector<64x16xf32>, vector<64x16xf32>, vector<64x64xf32> -> vector<64x64xf32>
    %cst_15 = arith.constant dense<0xFF800000> : vector<64xf32>
    %44 = vector.multi_reduction <maximumf>, %43, %cst_15 [1] : vector<64x64xf32> to vector<64xf32>
    %45 = vector.shape_cast %44 : vector<64xf32> to vector<64x1xf32>
    %46 = vector.broadcast %45 : vector<64x1xf32> to vector<64x64xf32>
    %47 = arith.subf %43, %46 : vector<64x64xf32>
    %48 = math.exp %47 : vector<64x64xf32>
    %cst_16 = arith.constant dense<0.000000e+00> : vector<64xf32>
    %49 = vector.multi_reduction <add>, %48, %cst_16 [1] : vector<64x64xf32> to vector<64xf32>
    %50 = vector.shape_cast %49 : vector<64xf32> to vector<64x1xf32>
    %51 = tpu.reciprocal %50 {approx = true} : vector<64x1xf32> -> vector<64x1xf32>
    %52 = vector.broadcast %51 : vector<64x1xf32> to vector<64x64xf32>
    %53 = arith.mulf %48, %52 : vector<64x64xf32>
    %cst_17 = arith.constant dense<0.000000e+00> : vector<64x16xf32>
    %54 = tpu.matmul %53, %42, %cst_17 {dimension_numbers = #tpu.dot_dimension_numbers<[1], [0], [0], [1], [0, 0, 1, 1], [], []>} : vector<64x64xf32>, vector<64x16xf32>, vector<64x16xf32> -> vector<64x16xf32>
    %55 = vector.extract_strided_slice %7 {offsets = [0, 48], sizes = [64, 16], strides = [1, 1]} : vector<64x128xf32> to vector<64x16xf32>
    %56 = vector.extract_strided_slice %8 {offsets = [0, 48], sizes = [64, 16], strides = [1, 1]} : vector<64x128xf32> to vector<64x16xf32>
    %57 = vector.extract_strided_slice %9 {offsets = [0, 48], sizes = [64, 16], strides = [1, 1]} : vector<64x128xf32> to vector<64x16xf32>
    %cst_18 = arith.constant dense<0.000000e+00> : vector<64x64xf32>
    %58 = tpu.matmul %55, %56, %cst_18 {dimension_numbers = #tpu.dot_dimension_numbers<[1], [1], [0], [0], [0, 0, 1, 0], [], []>} : vector<64x16xf32>, vector<64x16xf32>, vector<64x64xf32> -> vector<64x64xf32>
    %cst_19 = arith.constant dense<0xFF800000> : vector<64xf32>
    %59 = vector.multi_reduction <maximumf>, %58, %cst_19 [1] : vector<64x64xf32> to vector<64xf32>
    %60 = vector.shape_cast %59 : vector<64xf32> to vector<64x1xf32>
    %61 = vector.broadcast %60 : vector<64x1xf32> to vector<64x64xf32>
    %62 = arith.subf %58, %61 : vector<64x64xf32>
    %63 = math.exp %62 : vector<64x64xf32>
    %cst_20 = arith.constant dense<0.000000e+00> : vector<64xf32>
    %64 = vector.multi_reduction <add>, %63, %cst_20 [1] : vector<64x64xf32> to vector<64xf32>
    %65 = vector.shape_cast %64 : vector<64xf32> to vector<64x1xf32>
    %66 = tpu.reciprocal %65 {approx = true} : vector<64x1xf32> -> vector<64x1xf32>
    %67 = vector.broadcast %66 : vector<64x1xf32> to vector<64x64xf32>
    %68 = arith.mulf %63, %67 : vector<64x64xf32>
    %cst_21 = arith.constant dense<0.000000e+00> : vector<64x16xf32>
    %69 = tpu.matmul %68, %57, %cst_21 {dimension_numbers = #tpu.dot_dimension_numbers<[1], [0], [0], [1], [0, 0, 1, 1], [], []>} : vector<64x64xf32>, vector<64x16xf32>, vector<64x16xf32> -> vector<64x16xf32>
    %70 = vector.extract_strided_slice %7 {offsets = [0, 64], sizes = [64, 16], strides = [1, 1]} : vector<64x128xf32> to vector<64x16xf32>
    %71 = vector.extract_strided_slice %8 {offsets = [0, 64], sizes = [64, 16], strides = [1, 1]} : vector<64x128xf32> to vector<64x16xf32>
    %72 = vector.extract_strided_slice %9 {offsets = [0, 64], sizes = [64, 16], strides = [1, 1]} : vector<64x128xf32> to vector<64x16xf32>
    %cst_22 = arith.constant dense<0.000000e+00> : vector<64x64xf32>
    %73 = tpu.matmul %70, %71, %cst_22 {dimension_numbers = #tpu.dot_dimension_numbers<[1], [1], [0], [0], [0, 0, 1, 0], [], []>} : vector<64x16xf32>, vector<64x16xf32>, vector<64x64xf32> -> vector<64x64xf32>
    %cst_23 = arith.constant dense<0xFF800000> : vector<64xf32>
    %74 = vector.multi_reduction <maximumf>, %73, %cst_23 [1] : vector<64x64xf32> to vector<64xf32>
    %75 = vector.shape_cast %74 : vector<64xf32> to vector<64x1xf32>
    %76 = vector.broadcast %75 : vector<64x1xf32> to vector<64x64xf32>
    %77 = arith.subf %73, %76 : vector<64x64xf32>
    %78 = math.exp %77 : vector<64x64xf32>
    %cst_24 = arith.constant dense<0.000000e+00> : vector<64xf32>
    %79 = vector.multi_reduction <add>, %78, %cst_24 [1] : vector<64x64xf32> to vector<64xf32>
    %80 = vector.shape_cast %79 : vector<64xf32> to vector<64x1xf32>
    %81 = tpu.reciprocal %80 {approx = true} : vector<64x1xf32> -> vector<64x1xf32>
    %82 = vector.broadcast %81 : vector<64x1xf32> to vector<64x64xf32>
    %83 = arith.mulf %78, %82 : vector<64x64xf32>
    %cst_25 = arith.constant dense<0.000000e+00> : vector<64x16xf32>
    %84 = tpu.matmul %83, %72, %cst_25 {dimension_numbers = #tpu.dot_dimension_numbers<[1], [0], [0], [1], [0, 0, 1, 1], [], []>} : vector<64x64xf32>, vector<64x16xf32>, vector<64x16xf32> -> vector<64x16xf32>
    %85 = vector.extract_strided_slice %7 {offsets = [0, 80], sizes = [64, 16], strides = [1, 1]} : vector<64x128xf32> to vector<64x16xf32>
    %86 = vector.extract_strided_slice %8 {offsets = [0, 80], sizes = [64, 16], strides = [1, 1]} : vector<64x128xf32> to vector<64x16xf32>
    %87 = vector.extract_strided_slice %9 {offsets = [0, 80], sizes = [64, 16], strides = [1, 1]} : vector<64x128xf32> to vector<64x16xf32>
    %cst_26 = arith.constant dense<0.000000e+00> : vector<64x64xf32>
    %88 = tpu.matmul %85, %86, %cst_26 {dimension_numbers = #tpu.dot_dimension_numbers<[1], [1], [0], [0], [0, 0, 1, 0], [], []>} : vector<64x16xf32>, vector<64x16xf32>, vector<64x64xf32> -> vector<64x64xf32>
    %cst_27 = arith.constant dense<0xFF800000> : vector<64xf32>
    %89 = vector.multi_reduction <maximumf>, %88, %cst_27 [1] : vector<64x64xf32> to vector<64xf32>
    %90 = vector.shape_cast %89 : vector<64xf32> to vector<64x1xf32>
    %91 = vector.broadcast %90 : vector<64x1xf32> to vector<64x64xf32>
    %92 = arith.subf %88, %91 : vector<64x64xf32>
    %93 = math.exp %92 : vector<64x64xf32>
    %cst_28 = arith.constant dense<0.000000e+00> : vector<64xf32>
    %94 = vector.multi_reduction <add>, %93, %cst_28 [1] : vector<64x64xf32> to vector<64xf32>
    %95 = vector.shape_cast %94 : vector<64xf32> to vector<64x1xf32>
    %96 = tpu.reciprocal %95 {approx = true} : vector<64x1xf32> -> vector<64x1xf32>
    %97 = vector.broadcast %96 : vector<64x1xf32> to vector<64x64xf32>
    %98 = arith.mulf %93, %97 : vector<64x64xf32>
    %cst_29 = arith.constant dense<0.000000e+00> : vector<64x16xf32>
    %99 = tpu.matmul %98, %87, %cst_29 {dimension_numbers = #tpu.dot_dimension_numbers<[1], [0], [0], [1], [0, 0, 1, 1], [], []>} : vector<64x64xf32>, vector<64x16xf32>, vector<64x16xf32> -> vector<64x16xf32>
    %100 = vector.extract_strided_slice %7 {offsets = [0, 96], sizes = [64, 16], strides = [1, 1]} : vector<64x128xf32> to vector<64x16xf32>
    %101 = vector.extract_strided_slice %8 {offsets = [0, 96], sizes = [64, 16], strides = [1, 1]} : vector<64x128xf32> to vector<64x16xf32>
    %102 = vector.extract_strided_slice %9 {offsets = [0, 96], sizes = [64, 16], strides = [1, 1]} : vector<64x128xf32> to vector<64x16xf32>
    %cst_30 = arith.constant dense<0.000000e+00> : vector<64x64xf32>
    %103 = tpu.matmul %100, %101, %cst_30 {dimension_numbers = #tpu.dot_dimension_numbers<[1], [1], [0], [0], [0, 0, 1, 0], [], []>} : vector<64x16xf32>, vector<64x16xf32>, vector<64x64xf32> -> vector<64x64xf32>
    %cst_31 = arith.constant dense<0xFF800000> : vector<64xf32>
    %104 = vector.multi_reduction <maximumf>, %103, %cst_31 [1] : vector<64x64xf32> to vector<64xf32>
    %105 = vector.shape_cast %104 : vector<64xf32> to vector<64x1xf32>
    %106 = vector.broadcast %105 : vector<64x1xf32> to vector<64x64xf32>
    %107 = arith.subf %103, %106 : vector<64x64xf32>
    %108 = math.exp %107 : vector<64x64xf32>
    %cst_32 = arith.constant dense<0.000000e+00> : vector<64xf32>
    %109 = vector.multi_reduction <add>, %108, %cst_32 [1] : vector<64x64xf32> to vector<64xf32>
    %110 = vector.shape_cast %109 : vector<64xf32> to vector<64x1xf32>
    %111 = tpu.reciprocal %110 {approx = true} : vector<64x1xf32> -> vector<64x1xf32>
    %112 = vector.broadcast %111 : vector<64x1xf32> to vector<64x64xf32>
    %113 = arith.mulf %108, %112 : vector<64x64xf32>
    %cst_33 = arith.constant dense<0.000000e+00> : vector<64x16xf32>
    %114 = tpu.matmul %113, %102, %cst_33 {dimension_numbers = #tpu.dot_dimension_numbers<[1], [0], [0], [1], [0, 0, 1, 1], [], []>} : vector<64x64xf32>, vector<64x16xf32>, vector<64x16xf32> -> vector<64x16xf32>
    %115 = vector.extract_strided_slice %7 {offsets = [0, 112], sizes = [64, 16], strides = [1, 1]} : vector<64x128xf32> to vector<64x16xf32>
    %116 = vector.extract_strided_slice %8 {offsets = [0, 112], sizes = [64, 16], strides = [1, 1]} : vector<64x128xf32> to vector<64x16xf32>
    %117 = vector.extract_strided_slice %9 {offsets = [0, 112], sizes = [64, 16], strides = [1, 1]} : vector<64x128xf32> to vector<64x16xf32>
    %cst_34 = arith.constant dense<0.000000e+00> : vector<64x64xf32>
    %118 = tpu.matmul %115, %116, %cst_34 {dimension_numbers = #tpu.dot_dimension_numbers<[1], [1], [0], [0], [0, 0, 1, 0], [], []>} : vector<64x16xf32>, vector<64x16xf32>, vector<64x64xf32> -> vector<64x64xf32>
    %cst_35 = arith.constant dense<0xFF800000> : vector<64xf32>
    %119 = vector.multi_reduction <maximumf>, %118, %cst_35 [1] : vector<64x64xf32> to vector<64xf32>
    %120 = vector.shape_cast %119 : vector<64xf32> to vector<64x1xf32>
    %121 = vector.broadcast %120 : vector<64x1xf32> to vector<64x64xf32>
    %122 = arith.subf %118, %121 : vector<64x64xf32>
    %123 = math.exp %122 : vector<64x64xf32>
    %cst_36 = arith.constant dense<0.000000e+00> : vector<64xf32>
    %124 = vector.multi_reduction <add>, %123, %cst_36 [1] : vector<64x64xf32> to vector<64xf32>
    %125 = vector.shape_cast %124 : vector<64xf32> to vector<64x1xf32>
    %126 = tpu.reciprocal %125 {approx = true} : vector<64x1xf32> -> vector<64x1xf32>
    %127 = vector.broadcast %126 : vector<64x1xf32> to vector<64x64xf32>
    %128 = arith.mulf %123, %127 : vector<64x64xf32>
    %cst_37 = arith.constant dense<0.000000e+00> : vector<64x16xf32>
    %129 = tpu.matmul %128, %117, %cst_37 {dimension_numbers = #tpu.dot_dimension_numbers<[1], [0], [0], [1], [0, 0, 1, 1], [], []>} : vector<64x64xf32>, vector<64x16xf32>, vector<64x16xf32> -> vector<64x16xf32>
    %130 = tpu.concatenate %24, %39, %54, %69, %84, %99, %114, %129 in 1 : vector<64x16xf32>, vector<64x16xf32>, vector<64x16xf32>, vector<64x16xf32>, vector<64x16xf32>, vector<64x16xf32>, vector<64x16xf32>, vector<64x16xf32> -> vector<64x128xf32>
    %c0_38 = arith.constant 0 : index
    %c0_39 = arith.constant 0 : index
    %131 = vector.load %arg4[%c0_38, %c0_39] : memref<128x128xf32, #tpu.memory_space<vmem>>, vector<128x128xf32>
    %cst_40 = arith.constant dense<0.000000e+00> : vector<64x128xf32>
    %132 = tpu.matmul %130, %131, %cst_40 {dimension_numbers = #tpu.dot_dimension_numbers<[1], [0], [0], [1], [0, 0, 1, 1], [], []>} : vector<64x128xf32>, vector<128x128xf32>, vector<64x128xf32> -> vector<64x128xf32>
    %c0_41 = arith.constant 0 : index
    %c0_42 = arith.constant 0 : index
    %133 = vector.load %arg5[%c0_41, %c0_42] : memref<1x128xf32, #tpu.memory_space<vmem>>, vector<1x128xf32>
    %134 = vector.broadcast %133 : vector<1x128xf32> to vector<64x128xf32>
    %135 = arith.addf %132, %134 : vector<64x128xf32>
    %c0_43 = arith.constant 0 : index
    %c0_44 = arith.constant 0 : index
    %c0_45 = arith.constant 0 : index
    %136 = vector.load %arg6[%c0_43, %c0_44, %c0_45] : memref<1x64x128xf32, #tpu.memory_space<vmem>>, vector<1x64x128xf32>
    %137 = vector.shape_cast %136 : vector<1x64x128xf32> to vector<64x128xf32>
    %138 = vector.shape_cast %135 : vector<64x128xf32> to vector<1x64x128xf32>
    tpu.vector_store %arg6[%c0_43, %c0_44, %c0_45], %138 {strides = array<i32>} : memref<1x64x128xf32, #tpu.memory_space<vmem>>, vector<1x64x128xf32>,
    return
  }
  func.func @transform_0(%arg0: i32) -> (i32, i32, i32) {
    %c0_i32 = arith.constant 0 : i32
    %c0_i32_0 = arith.constant 0 : i32
    %c0_i32_1 = arith.constant 0 : i32
    return %arg0, %c0_i32, %c0_i32_0 : i32, i32, i32
  }
  func.func @transform_1(%arg0: i32) -> (i32, i32) {
    %c0_i32 = arith.constant 0 : i32
    %c0_i32_0 = arith.constant 0 : i32
    %c0_i32_1 = arith.constant 0 : i32
    return %c0_i32, %c0_i32_0 : i32, i32
  }
  func.func @transform_2(%arg0: i32) -> (i32, i32) {
    %c0_i32 = arith.constant 0 : i32
    %c0_i32_0 = arith.constant 0 : i32
    %c0_i32_1 = arith.constant 0 : i32
    return %c0_i32, %c0_i32_0 : i32, i32
  }
  func.func @transform_3(%arg0: i32) -> (i32, i32) {
    %c0_i32 = arith.constant 0 : i32
    %c0_i32_0 = arith.constant 0 : i32
    %c0_i32_1 = arith.constant 0 : i32
    return %c0_i32, %c0_i32_0 : i32, i32
  }
  func.func @transform_4(%arg0: i32) -> (i32, i32) {
    %c0_i32 = arith.constant 0 : i32
    %c0_i32_0 = arith.constant 0 : i32
    %c0_i32_1 = arith.constant 0 : i32
    return %c0_i32, %c0_i32_0 : i32, i32
  }
  func.func @transform_5(%arg0: i32) -> (i32, i32, i32) {
    %c0_i32 = arith.constant 0 : i32
    %c0_i32_0 = arith.constant 0 : i32
    %c0_i32_1 = arith.constant 0 : i32
    return %arg0, %c0_i32, %c0_i32_0 : i32, i32, i32
  }
}

</mosaic_0001>

<bundles_post_ra>
// kernel: tpu_custom_call.1
= control target key start
LH: loop header
LB: loop body
LE: loop exit
PB: predicated region body
PF: predicated region fallthrough
CT: control target
= control target key end

     0   :  { %10 = vsyncpa [#allocation3], 0  ;;  %s7951_s0 = inlined_call_operand.hbm [shape: f32[2,64,128], index: 0, kind: input, shape index: {}]   ;;  %s7952_s1 = inlined_call_operand.hbm [shape: f32[128,384], index: 1, kind: input, shape index: {}]   ;;  %s7953_s2 = inlined_call_operand.vmem [shape: f32[1,384], index: 2, kind: input, shape index: {}]   ;;  %s7954_s3 = inlined_call_operand.hbm [shape: f32[128,128], index: 3, kind: input, shape index: {}]   ;;  %s7955_s4 = inlined_call_operand.vmem [shape: f32[1,128], index: 4, kind: input, shape index: {}]   ;;  %s7956_s5 = inlined_call_operand.hbm [shape: f32[2,64,128], index: 5, kind: output, shape index: {}]  }
   0x1   :  { %12 = vsyncpa [#allocation3 + $0x1], 0 }
   0x2   :  { %13 = vsyncpa [#allocation6], 0 }
   0x3   :  { %14 = vsyncpa [#allocation4], 0 }
   0x4   :  { %16 = vsyncpa [#allocation4 + $0x1], 0  ;;  %s6068_s18 = smov 0   ;;  %s6070_s19 = smov 0  }
   0x5   :  { %s6072_s20 = smov 0   ;;  %s6074_s21 = smov 0  }
   0x6 LB: > { %s6089_s22 = sadd.s32 4294967295, %s6018_s21   ;;  %s4340_s23 = sadd.s32 4294967294, %s6018_s21   ;;  %s6018_s21 = sphi %s6074_s21, %s8090_s21   ;;  %s6014_s20 = sphi %s6072_s20, %s8089_s20   ;;  %s6010_s19 = sphi %s6070_s19, %s8088_s19   ;;  %s6006_s18 = sphi %s6068_s18, %s8087_s18  }
   0x7   : > { %p42_p0 = scmp.ne.s32.totalorder %s6010_s19, %s6006_s18  ;;  %p7957_p1 = scmp.eq.s32.totalorder %s6089_s22, 0 }
   0x8   : > { %p156_p3 = scmp.eq.s32.totalorder %s4340_s23, 1  ;;  %p4341_p5 = scmp.ge.s32.totalorder %s6018_s21, 1 }
   0x9   : > { %p6098_p4 = por %p7957_p1, %p42_p0  ;;  %p163_p7 = scmp.lt.s32.totalorder %s6018_s21, 3 }
   0xa   : > { %p6103_p6 = por %p156_p3, %p42_p0  ;;  %s6020_s27 = smov [#allocation5]  }
   0xb   : > { %s7988_s24 = scalar_select %p6098_p4, 1, 0 }
   0xc   : > { %s7989_s25 = scalar_select %p6103_p6, 1, 0 }
   0xd   : > { %p6108_p8 = pnand %p4341_p5, %p163_p7  ;;  %s175_s28 = sshll.u32 %s6020_s27, 4  ;;  %s176_s28 = int_to_ptr.vmem [resolvable:$true] %s175_s28 }
   0xe   : > { %s6021_s30 = smov [#allocation7]   ;;  %s5881_s7 = scalar_lea.vmem %s176_s28, 6144 }
   0xf   : > { %s7990_s26 = scalar_select %p6108_p8, 1, 0 }
  0x10   : > { %p5405_p9 = pneg %p6108_p8  ;;  %s191_s6 = sshll.u32 %s6021_s30, 4  ;;  %s192_s6 = int_to_ptr.vmem [resolvable:$true] %s191_s6 }
  0x11   : > { %p5882_p13 = scmp.ne.s32.totalorder %s176_s28, %s5881_s7  ;;  %p5889_p5 = scmp.lt.s32.totalorder %s176_s28, %s176_s28 }
  0x12   : > { %p6117_p11 = pnand %p5405_p9, %p7957_p1  ;;  %p5890_p7 = scmp.lt.s32.totalorder %s5881_s7, %s5881_s7 }
  0x14   : > { %p5872_p12 = pneg %p6117_p11  ;;  %p5891_p10 = por %p5890_p7, %p5889_p5 }
  0x16   : > { %p5884_p0 = pnand %p5882_p13, %p5872_p12 }
  0x18   : > { %p5885_p3 = pneg %p5884_p0 }
  0x1a   : > { %p5892_p9 = pnand %p5891_p10, %p5885_p3 }
  0x1c   : > { %5895 = shalt.err (!%p5892_p9)
}
  0x1d   : > { %s6022_s8 = smov 384   ;;  %s6023_s9 = smov 24  }
  0x1e   : > { %5408 = dma.hbm_to_vmem [thread:$0]  (!%p6117_p11), %s7952_s1, 6144, %s176_s28, [#allocation6], %s6022_s8, %s6022_s8, %s6023_s9  }
  0x1f   : > { %s5907_s12 = scalar_lea.vmem %s192_s6, 2048  ;;  %p5915_p2 = scmp.lt.s32.totalorder %s192_s6, %s192_s6 }
  0x20   : > { %p5908_p1 = scmp.ne.s32.totalorder %s192_s6, %s5907_s12  ;;  %p5916_p6 = scmp.lt.s32.totalorder %s5907_s12, %s5907_s12 }
  0x22   : > { %p5910_p13 = pnand %p5908_p1, %p5872_p12  ;;  %p5917_p5 = por %p5916_p6, %p5915_p2 }
  0x24   : > { %p5911_p0 = pneg %p5910_p13 }
  0x26   : > { %p5918_p10 = pnand %p5917_p5, %p5911_p0 }
  0x28   : > { %5921 = shalt.err (!%p5918_p10)
}
  0x29   : > { %s7958_s13 = smov 128   ;;  %s6025_s14 = smov 8  }
  0x2a   : > { %5411 = dma.hbm_to_vmem [thread:$0]  (!%p6117_p11), %s7954_s3, 2048, %s192_s6, [#allocation6], %s7958_s13, %s7958_s13, %s6025_s14  }
  0x2b   : > { %s6143_s17 = sadd.s32 1, %s6018_s21   ;;  %s29_s27 = sadd.s32 1, %s6014_s20 }
  0x2c   : > { %s26_s23 = ssub.s32 %s6018_s21, %s6143_s17  ;;  %p36_p2 = scmp.ne.s32.totalorder %s6014_s20, %s6010_s19 }
  0x2d   : > { %p27_p1 = scmp.eq.s32.totalorder %s26_s23, 0  ;;  %p37_p6 = scmp.eq.s32.totalorder %s6018_s21, 0 }
  0x2e   : > { %p7992_p3 = scmp.eq.s32.totalorder %s6089_s22, 1  ;;  %p5422_p9 = scmp.lt.s32.totalorder %s6018_s21, 2 }
  0x2f   : > { %s6152_s28 = scalar_select %p27_p1, %s6014_s20, %s29_s27  }
  0x30   : > { %p38_p12 = por %p37_p6, %p36_p2  ;;  %p6156_p7 = por %p7992_p3, %p36_p2 }
  0x31   : > { %s208_s30 = sand.u32 1, %s6014_s20   ;;  %s4551_s6 = sshll.u32 %s6018_s21, 10 }
  0x32   : > { %s7993_s29 = scalar_select %p6156_p7, 1, 0 }
  0x33   : > { %s4345_s7 = sshll.u32 %s208_s30, 6  ;;  %s6166_s10 = scalar_lea.hbm %s7951_s0, %s4551_s6 }
  0x34   : > { %s212_s11 = scalar_lea.vmem [#allocation2], %s4345_s7  ;;  %p6170_p11 = pnand %p5422_p9, %p38_p12 }
  0x35   : > { %s219_s12 = sshll.u32 %s212_s11, 4  ;;  %s6174_s16 = scalar_lea.sflag [#allocation3], %s208_s30  ;;  %s6168_s12 = int_to_ptr.vmem [resolvable:$true] %s219_s12 }
  0x36   : > { %s5922_s23 = scalar_lea.hbm %s6166_s10, 1024  ;;  %p5924_p0 = pneg %p6170_p11 }
  0x37   : > { %p5923_p13 = scmp.ne.s32.totalorder %s6166_s10, %s5922_s23  ;;  %s5927_s7 = scalar_lea.hbm %s7951_s0, 2048 }
  0x38   : > { %p5928_p1 = scmp.lt.s32.totalorder %s6166_s10, %s7951_s0  ;;  %p5929_p2 = scmp.lt.s32.totalorder %s5927_s7, %s5922_s23 }
  0x39   : > { %p5925_p5 = pnand %p5924_p0, %p5923_p13 }
  0x3a   : > { %p5930_p6 = por %p5929_p2, %p5928_p1 }
  0x3b   : > { %p5926_p10 = pneg %p5925_p5 }
  0x3d   : > { %p5931_p12 = pnand %p5930_p6, %p5926_p10 }
  0x3f   : > { %5934 = shalt.err (!%p5931_p12)
}
  0x40   : > { %s5935_s30 = scalar_lea.vmem %s6168_s12, 1024  ;;  %s6026_s11 = smov [#allocation2]  }
  0x41   : > { %p5936_p3 = scmp.ne.s32.totalorder %s6168_s12, %s5935_s30  ;;  %s5940_s13 = sshll.u32 %s6026_s11, 4  ;;  %s5941_s13 = int_to_ptr.vmem [resolvable:$false] %s5940_s13 }
  0x42   : > { %s5942_s27 = scalar_lea.vmem %s5941_s13, 2048  ;;  %p5943_p5 = scmp.lt.s32.totalorder %s6168_s12, %s5941_s13 }
  0x43   : > { %p5938_p9 = pnand %p5936_p3, %p5924_p0  ;;  %p5944_p7 = scmp.lt.s32.totalorder %s5942_s27, %s5935_s30 }
  0x45   : > { %p5939_p13 = pneg %p5938_p9  ;;  %p5945_p4 = por %p5944_p7, %p5943_p5 }
  0x47   : > { %p5946_p8 = pnand %p5945_p4, %p5939_p13 }
  0x49   : > { %5949 = shalt.err (!%p5946_p8)
}
  0x4a   : > { %s7995_s23 = smov 128   ;;  %p7996_p0 = scmp.ne.s32.totalorder %s7990_s26, 0 }
  0x4b   : > { %5415 = dma.hbm_to_vmem [thread:$0]  (!%p6170_p11), %s6166_s10, 1024, %s6168_s12, %s6174_s16, %s7995_s23, %s7995_s23, %s6025_s14  }
  0x4c   : > { %231 = sbr.rel (%p7996_p0) target bundleno = 5035 (0x13ab), region = 40 }
  0x51   : > { %s6201_s6 = sand.u32 1, %s6010_s19   ;;  %p7997_p4 = scmp.ne.s32.totalorder %s7988_s24, 0 }
  0x52   : > { %s4349_s13 = sshll.u32 %s6201_s6, 6  ;;  %s234_s7 = scalar_lea.sflag [#allocation3], %s6201_s6 }
  0x53   : > { %s6207_s15 = scalar_lea.vmem [#allocation2], %s4349_s13 }
  0x54   : > { %5993 = dma.done.wait (%p7997_p4), %s234_s7, 1024  }
  0x55   : > { %5995 = vsyncadd (%p7997_p4), %s234_s7, 4294966272  ;;  %p7998_p8 = scmp.eq.s32.totalorder %s6089_s22, 0 }
  0x57   : > { %5997 = dma.done.wait (%p7998_p8), [#allocation6], 8192   ;;  %p7999_p7 = pmov %p7998_p8 }
  0x58   : > { %v6027_v0 = vmov 0.0   ;;  %v326_v1 = vld [vmem:[#allocation5 + $0x170] sm:$0xff]  ;;  %v325_v2 = vld [vmem:[#allocation5 + $0x168] sm:$0xff]  ;;  %v323_v3 = vld [vmem:[#allocation5 + $0x158] sm:$0xff]  ;;  %v330_v57 = vlaneseq  ;;  %vm563_vm0 = vcmask 130048   ;;  %s6028_s14 = smov 112  }
  0x59   : > { %5999 = vsyncadd (%p7999_p7), [#allocation6], 4294959104  ;;  %409 = vmatprep.mubr.f32.mxu0 %v6027_v0  ;;  %345 = vmatprep.subr.mxu0 %v326_v1  ;;  %v322_v4 = vld [vmem:[#allocation5 + $0x150] sm:$0xff]  ;;  %v320_v5 = vld [vmem:[#allocation5 + $0x140] sm:$0xff]  ;;  %s6029_s10 = smov 96   ;;  %vm717_vm1 = vcmask 523264  }
  0x5a   : > { %346 = vmatpush1.msra.mxu0 %v325_v2  ;;  %v319_v6 = vld [vmem:[#allocation5 + $0x138] sm:$0xff]  ;;  %v317_v7 = vld [vmem:[#allocation5 + $0x128] sm:$0xff]  ;;  %v316_v8 = vld [vmem:[#allocation5 + $0x120] sm:$0xff]  ;;  %v331_v58 = vshrl.u32 %v330_v57, 7  ;;  %s6030_s12 = smov 80   ;;  %s6031_s16 = smov 64  }
  0x5b   : > { %347 = vmatprep.subr.mxu0 %v323_v3  ;;  %v314_v9 = vld [vmem:[#allocation5 + $0x110] sm:$0xff]  ;;  %v313_v10 = vld [vmem:[#allocation5 + $0x108] sm:$0xff]  ;;  %v311_v11 = vld [vmem:[#allocation5 + $0xf8] sm:$0xff]  ;;  %s6032_s8 = smov 48   ;;  %s6033_s9 = smov 32   ;;  %vm4045_vm2 = vcmask 261120  }
  0x5c   : > { %348 = vmatpush1.msra.mxu0 %v322_v4  ;;  %v310_v12 = vld [vmem:[#allocation5 + $0xf0] sm:$0xff]  ;;  %v308_v13 = vld [vmem:[#allocation5 + $0xe0] sm:$0xff]  ;;  %v307_v15 = vld [vmem:[#allocation5 + $0xd8] sm:$0xff]  ;;  %v332_v59 = vsub.s32 0, %v331_v58  ;;  %v336_v1 = vsub.s32 1, %v331_v58  ;;  %s6034_s30 = smov 16  }
  0x5d   : > { %349 = vmatprep.subr.mxu0 %v320_v5  ;;  %v6219_v14 = vld [vmem:[%s6207_s15] sm:$0xff]  ;;  %v305_v16 = vld [vmem:[#allocation5 + $0xc8] sm:$0xff]  ;;  %v327_v18 = vld [vmem:[#allocation5 + $0x178] sm:$0xff]  ;;  %vm4054_vm3 = vcmask 392192   ;;  %vm4071_vm4 = vcmask 654336   ;;  %vm4080_vm5 = vcmask 785408  }
  0x5e   : > { %350 = vmatpush1.msra.mxu0 %v319_v6  ;;  %4889 = vmatprep.mubr.f32.mxu1 %v6219_v14  ;;  %v304_v17 = vld [vmem:[#allocation5 + $0xc0] sm:$0xff]  ;;  %v302_v20 = vld [vmem:[#allocation5 + $0xb0] sm:$0xff]  ;;  %v301_v21 = vld [vmem:[#allocation5 + $0xa8] sm:$0xff]  ;;  %vm4089_vm6 = vcmask 916480   ;;  %s271_s23 = scalar_lea.vmem [#allocation8], %s4349_s13  ;;  %p8084_p10 = scmp.ne.s32.totalorder %s7993_s29, 0 }
  0x5f   : > { %351 = vmatprep.subr.mxu0 %v317_v7  ;;  %v324_v19 = vld [vmem:[#allocation5 + $0x160] sm:$0xff]  ;;  %4857 = vmatprep.subr.mxu1 %v327_v18  ;;  %v321_v22 = vld [vmem:[#allocation5 + $0x148] sm:$0xff]  ;;  %v299_v23 = vld [vmem:[#allocation5 + $0x98] sm:$0xff]  ;;  %s4248_s7 = sshll.u32 %s271_s23, 4  ;;  %s7903_s7 = int_to_ptr.vmem [resolvable:$true] %s4248_s7 }
  0x60   : > { %352 = vmatpush1.msra.mxu0 %v316_v8  ;;  %4858 = vmatpush3.msra.mxu1 %v327_v18  ;;  %v298_v24 = vld [vmem:[#allocation5 + $0x90] sm:$0xff]  ;;  %v296_v26 = vld [vmem:[#allocation5 + $0x80] sm:$0xff]  ;;  %v295_v27 = vld [vmem:[#allocation5 + $0x78] sm:$0xff] }
  0x61   : > { %353 = vmatprep.subr.mxu0 %v314_v9  ;;  %4859 = vmatprep.subr.mxu1 %v324_v19  ;;  %v318_v25 = vld [vmem:[#allocation5 + $0x130] sm:$0xff]  ;;  %v315_v28 = vld [vmem:[#allocation5 + $0x118] sm:$0xff]  ;;  %v293_v29 = vld [vmem:[#allocation5 + $0x68] sm:$0xff] }
  0x62   : > { %354 = vmatpush1.msra.mxu0 %v313_v10  ;;  %4860 = vmatpush3.msra.mxu1 %v324_v19  ;;  %v292_v30 = vld [vmem:[#allocation5 + $0x60] sm:$0xff]  ;;  %v290_v32 = vld [vmem:[#allocation5 + $0x50] sm:$0xff]  ;;  %v289_v33 = vld [vmem:[#allocation5 + $0x48] sm:$0xff] }
  0x63   : > { %355 = vmatprep.subr.mxu0 %v311_v11  ;;  %4861 = vmatprep.subr.mxu1 %v321_v22  ;;  %v312_v31 = vld [vmem:[#allocation5 + $0x100] sm:$0xff]  ;;  %v309_v34 = vld [vmem:[#allocation5 + $0xe8] sm:$0xff]  ;;  %v287_v35 = vld [vmem:[#allocation5 + $0x38] sm:$0xff] }
  0x64   : > { %356 = vmatpush1.msra.mxu0 %v310_v12  ;;  %4862 = vmatpush3.msra.mxu1 %v321_v22  ;;  %v286_v36 = vld [vmem:[#allocation5 + $0x30] sm:$0xff]  ;;  %v284_v38 = vld [vmem:[#allocation5 + $0x20] sm:$0xff]  ;;  %v283_v39 = vld [vmem:[#allocation5 + $0x18] sm:$0xff] }
  0x65   : > { %357 = vmatprep.subr.mxu0 %v308_v13  ;;  %4863 = vmatprep.subr.mxu1 %v318_v25  ;;  %v306_v37 = vld [vmem:[#allocation5 + $0xd0] sm:$0xff]  ;;  %v303_v40 = vld [vmem:[#allocation5 + $0xb8] sm:$0xff]  ;;  %v281_v41 = vld [vmem:[#allocation5 + $0x8] sm:$0xff] }
  0x66   : > { %358 = vmatpush1.msra.mxu0 %v307_v15  ;;  %4864 = vmatpush3.msra.mxu1 %v318_v25  ;;  %v280_v42 = vld [vmem:[#allocation5] sm:$0xff]  ;;  %v297_v44 = vld [vmem:[#allocation5 + $0x88] sm:$0xff]  ;;  %v294_v45 = vld [vmem:[#allocation5 + $0x70] sm:$0xff] }
  0x67   : > { %359 = vmatprep.subr.mxu0 %v305_v16  ;;  %4865 = vmatprep.subr.mxu1 %v315_v28  ;;  %v300_v43 = vld [vmem:[#allocation5 + $0xa0] sm:$0xff]  ;;  %v273_v46 = vld [vmem:[%s6207_s15 + $0x8] sm:$0xff]  ;;  %v291_v47 = vld [vmem:[#allocation5 + $0x58] sm:$0xff] }
  0x68   : > { %360 = vmatpush1.msra.mxu0 %v304_v17  ;;  %4866 = vmatpush3.msra.mxu1 %v315_v28  ;;  %v288_v48 = vld [vmem:[#allocation5 + $0x40] sm:$0xff]  ;;  %v274_v49 = vld [vmem:[%s6207_s15 + $0x10] sm:$0xff]  ;;  %v285_v50 = vld [vmem:[#allocation5 + $0x28] sm:$0xff]  ;;  %v340_v17 = vsub.s32 2, %v331_v58 }
  0x69   : > { %361 = vmatprep.subr.mxu0 %v302_v20  ;;  %4867 = vmatprep.subr.mxu1 %v312_v31  ;;  %v282_v51 = vld [vmem:[#allocation5 + $0x10] sm:$0xff]  ;;  %v275_v52 = vld [vmem:[%s6207_s15 + $0x18] sm:$0xff]  ;;  %v276_v53 = vld [vmem:[%s6207_s15 + $0x20] sm:$0xff] }
  0x6a   : > { %362 = vmatpush1.msra.mxu0 %v301_v21  ;;  %4868 = vmatpush3.msra.mxu1 %v312_v31  ;;  %v277_v54 = vld [vmem:[%s6207_s15 + $0x28] sm:$0xff]  ;;  %v278_v55 = vld [vmem:[%s6207_s15 + $0x30] sm:$0xff]  ;;  %v279_v56 = vld [vmem:[%s6207_s15 + $0x38] sm:$0xff]  ;;  %s4552_s15 = sshll.u32 %s6089_s22, 10  ;;  %s6035_s22 = smov [#allocation8]  }
  0x6b   : > { %363 = vmatprep.subr.mxu0 %v299_v23  ;;  %4869 = vmatprep.subr.mxu1 %v309_v34  ;;  %v328_v60 = vld [vmem:[%s7953_s2] sm:$0x7]  ;;  %s7908_s26 = scalar_lea.hbm %s7956_s5, %s4552_s15 }
  0x6c   : > { %364 = vmatpush1.msra.mxu0 %v298_v24  ;;  %4870 = vmatpush3.msra.mxu1 %v309_v34  ;;  %v6240_v61 = vrot.slane %v328_v60, %v332_v59  ;;  %v6251_v3 = vrot.slane %v328_v60, %v336_v1  ;;  %v341_v23 = vrot.slane %v328_v60, %v340_v17 }
  0x6d   : > { %365 = vmatprep.subr.mxu0 %v296_v26  ;;  %4871 = vmatprep.subr.mxu1 %v306_v37 }
  0x6e   : > { %366 = vmatpush1.msra.mxu0 %v295_v27  ;;  %4872 = vmatpush3.msra.mxu1 %v306_v37 }
  0x6f   : > { %367 = vmatprep.subr.mxu0 %v293_v29  ;;  %4873 = vmatprep.subr.mxu1 %v303_v40 }
  0x70   : > { %368 = vmatpush1.msra.mxu0 %v292_v30  ;;  %4874 = vmatpush3.msra.mxu1 %v303_v40 }
  0x71   : > { %369 = vmatprep.subr.mxu0 %v290_v32  ;;  %4875 = vmatprep.subr.mxu1 %v300_v43 }
  0x72   : > { %370 = vmatpush1.msra.mxu0 %v289_v33  ;;  %4876 = vmatpush3.msra.mxu1 %v300_v43 }
  0x73   : > { %371 = vmatprep.subr.mxu0 %v287_v35  ;;  %4877 = vmatprep.subr.mxu1 %v297_v44 }
  0x74   : > { %372 = vmatpush1.msra.mxu0 %v286_v36  ;;  %4878 = vmatpush3.msra.mxu1 %v297_v44 }
  0x75   : > { %373 = vmatprep.subr.mxu0 %v284_v38  ;;  %4879 = vmatprep.subr.mxu1 %v294_v45 }
  0x76   : > { %374 = vmatpush1.msra.mxu0 %v283_v39  ;;  %4880 = vmatpush3.msra.mxu1 %v294_v45 }
  0x77   : > { %375 = vmatprep.subr.mxu0 %v281_v41  ;;  %4881 = vmatprep.subr.mxu1 %v291_v47 }
  0x78   : > { %376 = vmatpush1.msra.mxu0 %v280_v42  ;;  %4882 = vmatpush3.msra.mxu1 %v291_v47 }
  0x79   : > { %410 = vmatmul.mubr.f32.vlgmr.msra.gmra.mxu0 %v6219_v14  ;;  %4883 = vmatprep.subr.mxu1 %v288_v48 }
  0x7a   : > { %415 = vmatprep.mubr.f32.mxu0 %v6027_v0  ;;  %4884 = vmatpush3.msra.mxu1 %v288_v48 }
  0x7b   : > { %4885 = vmatprep.subr.mxu1 %v285_v50 }
  0x7c   : > { %4886 = vmatpush3.msra.mxu1 %v285_v50 }
  0x7d   : > { %416 = vmatmul.mubr.f32.gmra.mxu0 %v273_v46  ;;  %4887 = vmatprep.subr.mxu1 %v282_v51 }
  0x7e   : > { %421 = vmatprep.mubr.f32.mxu0 %v6027_v0  ;;  %4888 = vmatpush3.msra.mxu1 %v282_v51 }
  0x7f   : > { %4890 = vmatmul.mubr.f32.vlgmr.msra.gmra.mxu1 %v273_v46 }
  0x80   : > { %4892 = vmatprep.mubr.f32.mxu1 %v274_v49 }
  0x81   : > { %422 = vmatmul.mubr.f32.gmra.mxu0 %v274_v49 }
  0x82   : > { %427 = vmatprep.mubr.f32.mxu0 %v6027_v0 }
  0x83   : > { %4893 = vmatmul.mubr.f32.gmra.mxu1 %v275_v52 }
  0x84   : > { %4895 = vmatprep.mubr.f32.mxu1 %v276_v53 }
  0x85   : > { %428 = vmatmul.mubr.f32.gmra.mxu0 %v275_v52 }
  0x86   : > { %433 = vmatprep.mubr.f32.mxu0 %v6027_v0 }
  0x87   : > { %4896 = vmatmul.mubr.f32.gmra.mxu1 %v277_v54 }
  0x88   : > { %4898 = vmatprep.mubr.f32.mxu1 %v278_v55 }
  0x89   : > { %434 = vmatmul.mubr.f32.gmra.mxu0 %v276_v53 }
  0x8a   : > { %439 = vmatprep.mubr.f32.mxu0 %v6027_v0 }
  0x8b   : > { %4899 = vmatmul.mubr.f32.gmra.mxu1 %v279_v56 }
  0x8d   : > { %440 = vmatmul.mubr.f32.gmra.mxu0 %v277_v54 }
  0x8e   : > { %445 = vmatprep.mubr.f32.mxu0 %v6027_v0 }
  0x91   : > { %446 = vmatmul.mubr.f32.gmra.mxu0 %v278_v55 }
  0x92   : > { %451 = vmatprep.mubr.f32.mxu0 %v6027_v0 }
  0x95   : > { %452 = vmatmul.mubr.f32.gmra.mxu0 %v279_v56 }
 0x139   : > { %v411_v62 = vpop.f32.mrf.mxu0 }
 0x13a   : > { %v6243_v63 = vadd.f32 %v411_v62, %v6240_v61 }
 0x13b   : > { %v6245_v2 = vpop.f32.mrf.mxu0 }
 0x13c   : > { %4917 = vmatprep.mubr.msk.f32.mxu0 %vm563_vm0, %v6243_v63  ;;  %v6364_v42 = vadd.f32 %v6245_v2, %v6251_v3 }
 0x13d   : > { %v6249_v0 = vpop.f32.mrf.mxu0 }
 0x13e   : > { %v6374_v43 = vadd.f32 %v6249_v0, %v6240_v61 }
 0x13f   : > { %v419_v4 = vpop.f32.mrf.mxu0  ;;  %v4891_v10 = vpop.f32.mrf.mxu1 }
 0x140   : > { %v6254_v5 = vadd.f32 %v419_v4, %v6251_v3  ;;  %v6330_v40 = vadd.f32 %v4891_v10, %v341_v23 }
 0x141   : > { %v6256_v6 = vpop.f32.mrf.mxu0  ;;  %v524_v13 = vpop.f32.mrf.mxu1 }
 0x142   : > { %953 = vrot.lane.b32.xlu0 %v6254_v5, %s6028_s14  ;;  %v6336_v41 = vadd.f32 %v524_v13, %v341_v23  ;;  %v6378_v44 = vadd.f32 %v6256_v6, %v6240_v61 }
 0x143   : > { %v425_v7 = vpop.f32.mrf.mxu0  ;;  %v4894_v15 = vpop.f32.mrf.mxu1 }
 0x144   : > { %v6261_v8 = vadd.f32 %v425_v7, %v6251_v3  ;;  %v6317_v38 = vadd.f32 %v4894_v15, %v341_v23 }
 0x145   : > { %v6263_v9 = vpop.f32.mrf.mxu0  ;;  %v534_v19 = vpop.f32.mrf.mxu1 }
 0x146   : > { %955 = vrot.lane.b32.xlu0 %v6261_v8, %s6028_s14  ;;  %v6322_v39 = vadd.f32 %v534_v19, %v341_v23  ;;  %v6386_v45 = vadd.f32 %v6263_v9, %v6240_v61 }
 0x147   : > { %v431_v11 = vpop.f32.mrf.mxu0  ;;  %v4897_v21 = vpop.f32.mrf.mxu1 }
 0x148   : > { %v6268_v12 = vadd.f32 %v431_v11, %v6251_v3  ;;  %v6290_v32 = vadd.f32 %v4897_v21, %v341_v23 }
 0x149   : > { %v6270_v14 = vpop.f32.mrf.mxu0  ;;  %v544_v25 = vpop.f32.mrf.mxu1 }
 0x14a   : > { %957 = vrot.lane.b32.xlu0 %v6268_v12, %s6028_s14  ;;  %v6306_v37 = vadd.f32 %v544_v25, %v341_v23  ;;  %v6390_v46 = vadd.f32 %v6270_v14, %v6240_v61 }
 0x14b   : > { %v437_v16 = vpop.f32.mrf.mxu0  ;;  %v4900_v27 = vpop.f32.mrf.mxu1 }
 0x14c   : > { %v6275_v18 = vadd.f32 %v437_v16, %v6251_v3  ;;  %v6288_v29 = vadd.f32 %v4900_v27, %v341_v23 }
 0x14d   : > { %v6277_v20 = vpop.f32.mrf.mxu0  ;;  %v554_v30 = vpop.f32.mrf.mxu1 }
 0x14e   : > { %959 = vrot.lane.b32.xlu1 %v6275_v18, %s6028_s14  ;;  %v6292_v33 = vadd.f32 %v554_v30, %v341_v23  ;;  %4929 = vmatprep.subr.mxu1 %v6288_v29  ;;  %v6398_v47 = vadd.f32 %v6277_v20, %v6240_v61 }
 0x14f   : > { %v443_v22 = vpop.f32.mrf.mxu0  ;;  %4930 = vmatpush3.msra.mxu1 %v6288_v29 }
 0x150   : > { %v6282_v24 = vadd.f32 %v443_v22, %v6251_v3  ;;  %4931 = vmatprep.subr.mxu1 %v6292_v33 }
 0x151   : > { %v6284_v26 = vpop.f32.mrf.mxu0  ;;  %4932 = vmatpush3.msra.mxu1 %v6292_v33 }
 0x152   : > { %961 = vrot.lane.b32.xlu1 %v6282_v24, %s6028_s14  ;;  %4933 = vmatprep.subr.mxu1 %v6290_v32  ;;  %v6402_v48 = vadd.f32 %v6284_v26, %v6240_v61 }
 0x153   : > { %v449_v28 = vpop.f32.mrf.mxu0  ;;  %4934 = vmatpush3.msra.mxu1 %v6290_v32 }
 0x154   : > { %v6300_v35 = vadd.f32 %v449_v28, %v6251_v3  ;;  %4935 = vmatprep.subr.mxu1 %v6306_v37 }
 0x155   : > { %v453_v31 = vpop.f32.mrf.mxu0  ;;  %4936 = vmatpush3.msra.mxu1 %v6306_v37 }
 0x156   : > { %1379 = vrot.lane.b32.xlu1 %v6282_v24, %s6029_s10  ;;  %8000 = vst [vmem:[#allocation12_spill] sm:$0xff] %v6300_v35  ;;  %4937 = vmatprep.subr.mxu1 %v6317_v38  ;;  %v6409_v49 = vadd.f32 %v453_v31, %v6240_v61 }
 0x157   : > { %v455_v34 = vpop.f32.mrf.mxu0  ;;  %4938 = vmatpush3.msra.mxu1 %v6317_v38 }
 0x158   : > { %v6303_v36 = vadd.f32 %v455_v34, %v6251_v3  ;;  %4939 = vmatprep.subr.mxu1 %v6322_v39 }
 0x159   : > { %4940 = vmatpush3.msra.mxu1 %v6322_v39 }
 0x15a   : > { %8001 = vst [vmem:[#allocation13_spill] sm:$0xff] %v6303_v36  ;;  %4901 = vmatprep.subr.msk.mxu0 %vm563_vm0, %v6303_v36  ;;  %963 = vrot.lane.b32.xlu1 %v6300_v35, %s6028_s14 }
 0x15b   : > { %965 = vrot.lane.b32.xlu0 %v6303_v36, %s6028_s14  ;;  %4902 = vmatpush3.xpose.msk.msra.mxu0 %vm563_vm0, %v6303_v36 }
 0x15c   : > { %4903 = vmatprep.subr.msk.mxu0 %vm563_vm0, %v6300_v35  ;;  %4941 = vmatprep.subr.mxu1 %v6330_v40 }
 0x15d   : > { %4942 = vmatpush3.msra.mxu1 %v6330_v40 }
 0x15e   : > { %1381 = vrot.lane.b32.xlu1 %v6300_v35, %s6029_s10  ;;  %4943 = vmatprep.subr.mxu1 %v6336_v41 }
 0x15f   : > { %4904 = vmatpush3.xpose.msk.msra.mxu0 %vm563_vm0, %v6300_v35  ;;  %4944 = vmatpush3.msra.mxu1 %v6336_v41 }
 0x160   : > { %4905 = vmatprep.subr.msk.mxu0 %vm563_vm0, %v6282_v24 }
 0x162   : > { %1383 = vrot.lane.b32.xlu1 %v6303_v36, %s6029_s10 }
 0x163   : > { %4906 = vmatpush3.xpose.msk.msra.mxu0 %vm563_vm0, %v6282_v24 }
 0x164   : > { %4907 = vmatprep.subr.msk.mxu0 %vm563_vm0, %v6275_v18 }
 0x167   : > { %4908 = vmatpush3.xpose.msk.msra.mxu0 %vm563_vm0, %v6275_v18 }
 0x168   : > { %4909 = vmatprep.subr.msk.mxu0 %vm563_vm0, %v6268_v12 }
 0x16b   : > { %4910 = vmatpush3.xpose.msk.msra.mxu0 %vm563_vm0, %v6268_v12 }
 0x16c   : > { %4911 = vmatprep.subr.msk.mxu0 %vm563_vm0, %v6261_v8 }
 0x16f   : > { %4912 = vmatpush3.xpose.msk.msra.mxu0 %vm563_vm0, %v6261_v8 }
 0x170   : > { %4913 = vmatprep.subr.msk.mxu0 %vm563_vm0, %v6254_v5 }
 0x173   : > { %4914 = vmatpush3.xpose.msk.msra.mxu0 %vm563_vm0, %v6254_v5 }
 0x174   : > { %4915 = vmatprep.subr.msk.mxu0 %vm563_vm0, %v6364_v42 }
 0x177   : > { %4916 = vmatpush3.xpose.msk.msra.mxu0 %vm563_vm0, %v6364_v42 }
 0x17a   : > { %4918 = vmatmul.mubr.msk.f32.vlgmr.msra.gmra.mxu0 %vm563_vm0, %v6374_v43 }
 0x17b   : > { %4920 = vmatprep.mubr.msk.f32.mxu0 %vm563_vm0, %v6378_v44 }
 0x17e   : > { %4921 = vmatmul.mubr.msk.f32.gmra.mxu0 %vm563_vm0, %v6386_v45 }
 0x17f   : > { %4923 = vmatprep.mubr.msk.f32.mxu0 %vm563_vm0, %v6390_v46 }
 0x182   : > { %4924 = vmatmul.mubr.msk.f32.gmra.mxu0 %vm563_vm0, %v6398_v47 }
 0x183   : > { %4926 = vmatprep.mubr.msk.f32.mxu0 %vm563_vm0, %v6402_v48 }
 0x186   : > { %4927 = vmatmul.mubr.msk.f32.gmra.mxu0 %vm563_vm0, %v6409_v49 }
 0x1b4   : > { %v6413_v50 = vpop.permute.xlu0 %953 }
 0x1b8   : > { %v6417_v52 = vpop.permute.xlu0 %955 }
 0x1bc   : > { %v6421_v55 = vpop.permute.xlu0 %957 }
 0x1c0   : > { %v6415_v51 = vpop.permute.xlu1 %959 }
 0x1c4   : > { %v6419_v53 = vpop.permute.xlu1 %961 }
 0x1c8   : > { %v1380_v54 = vpop.permute.xlu1 %1379 }
 0x1cc   : > { %v6423_v56 = vpop.permute.xlu1 %963 }
 0x1cd   : > { %v6425_v57 = vpop.permute.xlu0 %965 }
 0x1ce   : > { %4957 = vmatprep.subr.msk.mxu1 %vm563_vm0, %v6425_v57 }
 0x1d0   : > { %v1382_v58 = vpop.permute.xlu1 %1381 }
 0x1d4   : > { %v1384_v59 = vpop.permute.xlu1 %1383 }
 0x1d5   : > { %5013 = vmatprep.subr.msk.mxu0 %vm563_vm0, %v1384_v59 }
 0x1d6   : > { %5014 = vmatpush3.xpose.msk.msra.mxu0 %vm563_vm0, %v1384_v59 }
 0x1d7   : > { %5015 = vmatprep.subr.msk.mxu0 %vm563_vm0, %v1382_v58 }
 0x1da   : > { %5016 = vmatpush3.xpose.msk.msra.mxu0 %vm563_vm0, %v1382_v58 }
 0x1db   : > { %5017 = vmatprep.subr.msk.mxu0 %vm563_vm0, %v1380_v54 }
 0x1de   : > { %5018 = vmatpush3.xpose.msk.msra.mxu0 %vm563_vm0, %v1380_v54 }
 0x23a   : > { %v4919_v60 = vpop.f32.mrf.mxu0 }
 0x23b   : > { %v721_v61 = vsel %vm717_vm1, %v4919_v60, -inf }
 0x23c   : > { %722 = vmax.xlane.f32.xlu0 %v721_v61  ;;  %v678_v62 = vpop.f32.mrf.mxu0 }
 0x23d   : > { %v718_v2 = vsel %vm717_vm1, %v678_v62, -inf }
 0x23e   : > { %v4922_v1 = vpop.f32.mrf.mxu0 }
 0x23f   : > { %v727_v0 = vsel %vm717_vm1, %v4922_v1, -inf }
 0x240   : > { %719 = vmax.xlane.f32.xlu0 %v718_v2  ;;  %728 = vmax.xlane.f32.xlu1 %v727_v0  ;;  %v688_v3 = vpop.f32.mrf.mxu0 }
 0x241   : > { %v724_v6 = vsel %vm717_vm1, %v688_v3, -inf }
 0x242   : > { %v4925_v4 = vpop.f32.mrf.mxu0 }
 0x243   : > { %v733_v11 = vsel %vm717_vm1, %v4925_v4, -inf }
 0x244   : > { %725 = vmax.xlane.f32.xlu1 %v724_v6  ;;  %v698_v7 = vpop.f32.mrf.mxu0 }
 0x245   : > { %v730_v9 = vsel %vm717_vm1, %v698_v7, -inf }
 0x246   : > { %731 = vmax.xlane.f32.xlu0 %v730_v9  ;;  %v4928_v10 = vpop.f32.mrf.mxu0 }
 0x247   : > { %v739_v15 = vsel %vm717_vm1, %v4928_v10, -inf }
 0x248   : > { %734 = vmax.xlane.f32.xlu1 %v733_v11  ;;  %v708_v13 = vpop.f32.mrf.mxu0 }
 0x249   : > { %v736_v14 = vsel %vm717_vm1, %v708_v13, -inf }
 0x24a   : > { %737 = vmax.xlane.f32.xlu0 %v736_v14 }
 0x24c   : > { %740 = vmax.xlane.f32.xlu1 %v739_v15 }
 0x25d   : > { %1377 = vrot.lane.b32.xlu1 %v6275_v18, %s6029_s10 }
 0x260   : > { %951 = vrot.lane.b32.xlu0 %v6364_v42, %s6028_s14 }
 0x2c5   : > { %v723_v16 = vpop.xlane.xlu0 %722 }
 0x2c6   : > { %v743_v17 = vsub.f32 %v4919_v60, %v723_v16 }
 0x2c8   : > { %v752_v19 = vmul.f32 1.442695, %v743_v17 }
 0x2c9   : > { %v720_v20 = vpop.xlane.xlu0 %719  ;;  %v729_v21 = vpop.xlane.xlu1 %728 }
 0x2ca   : > { %5614 = vpow2.f32 %v752_v19  ;;  %v742_v22 = vsub.f32 %v678_v62, %v720_v20  ;;  %v745_v58 = vsub.f32 %v4922_v1, %v729_v21 }
 0x2cc   : > { %v750_v23 = vmul.f32 1.442695, %v742_v22  ;;  %v756_v61 = vmul.f32 1.442695, %v745_v58 }
 0x2cd   : > { %v726_v25 = vpop.xlane.xlu1 %725 }
 0x2ce   : > { %5616 = vpow2.f32 %v750_v23  ;;  %v744_v59 = vsub.f32 %v688_v3, %v726_v25 }
 0x2cf   : > { %v732_v60 = vpop.xlane.xlu0 %731  ;;  %5618 = vpow2.f32 %v756_v61 }
 0x2d0   : > { %v754_v2 = vmul.f32 1.442695, %v744_v59  ;;  %v746_v0 = vsub.f32 %v698_v7, %v732_v60 }
 0x2d1   : > { %v735_v26 = vpop.xlane.xlu1 %734 }
 0x2d2   : > { %v747_v62 = vsub.f32 %v4925_v4, %v735_v26  ;;  %5620 = vpow2.f32 %v754_v2  ;;  %v758_v14 = vmul.f32 1.442695, %v746_v0 }
 0x2d3   : > { %v738_v11 = vpop.xlane.xlu0 %737 }
 0x2d4   : > { %v760_v6 = vmul.f32 1.442695, %v747_v62  ;;  %v748_v15 = vsub.f32 %v708_v13, %v738_v11 }
 0x2d5   : > { %v741_v27 = vpop.xlane.xlu1 %740 }
 0x2d6   : > { %v749_v9 = vsub.f32 %v4928_v10, %v741_v27  ;;  %5622 = vpow2.f32 %v760_v6  ;;  %v762_v17 = vmul.f32 1.442695, %v748_v15 }
 0x2d7   : > { %v6447_v28 = vpop.eup %5614  ;;  %5624 = vpow2.f32 %v758_v14  ;;  %v952_v26 = vpop.permute.xlu0 %951 }
 0x2d8   : > { %v769_v30 = vsel %vm717_vm1, %v6447_v28, 0.0  ;;  %v764_v16 = vmul.f32 1.442695, %v749_v9 }
 0x2d9   : > { %770 = vadd.xlane.f32.xlu1 %v769_v30  ;;  %v1378_v31 = vpop.permute.xlu1 %1377 }
 0x2da   : > { %5019 = vmatprep.subr.msk.mxu0 %vm563_vm0, %v1378_v31  ;;  %5626 = vpow2.f32 %v764_v16 }
 0x2db   : > { %v6452_v34 = vpop.eup %5616  ;;  %5020 = vmatpush3.xpose.msk.msra.mxu0 %vm563_vm0, %v1378_v31  ;;  %5628 = vpow2.f32 %v762_v17 }
 0x2dc   : > { %v766_v54 = vsel %vm717_vm1, %v6452_v34, 0.0  ;;  %v6461_v1 = vpop.eup %5618 }
 0x2dd   : > { %767 = vadd.xlane.f32.xlu0 %v766_v54  ;;  %v775_v4 = vsel %vm717_vm1, %v6461_v1, 0.0 }
 0x2df   : > { %v6463_v3 = vpop.eup %5620 }
 0x2e0   : > { %v772_v19 = vsel %vm717_vm1, %v6463_v3, 0.0 }
 0x2e3   : > { %v6467_v7 = vpop.eup %5622 }
 0x2e4   : > { %v6469_v10 = vpop.eup %5624  ;;  %v781_v13 = vsel %vm717_vm1, %v6467_v7, 0.0 }
 0x2e5   : > { %v778_v22 = vsel %vm717_vm1, %v6469_v10, 0.0 }
 0x2e7   : > { %v6475_v20 = vpop.eup %5626 }
 0x2e8   : > { %v787_v21 = vsel %vm717_vm1, %v6475_v20, 0.0  ;;  %v6481_v23 = vpop.eup %5628 }
 0x2e9   : > { %v784_v25 = vsel %vm717_vm1, %v6481_v23, 0.0 }
 0x2ea   : > { %937 = vrot.lane.b32.xlu1 %v6374_v43, %s6028_s14 }
 0x2f3   : > { %935 = vrot.lane.b32.xlu0 %v6243_v63, %s6028_s14 }
 0x30e   : > { %776 = vadd.xlane.f32.xlu1 %v775_v4 }
 0x312   : > { %782 = vadd.xlane.f32.xlu1 %v781_v13  ;;  %773 = vadd.xlane.f32.xlu0 %v772_v19 }
 0x316   : > { %788 = vadd.xlane.f32.xlu1 %v787_v21  ;;  %779 = vadd.xlane.f32.xlu0 %v778_v22 }
 0x31a   : > { %785 = vadd.xlane.f32.xlu0 %v784_v25 }
 0x327   : > { %939 = vrot.lane.b32.xlu1 %v6378_v44, %s6028_s14 }
 0x32b   : > { %1373 = vrot.lane.b32.xlu1 %v6261_v8, %s6029_s10 }
 0x32f   : > { %945 = vrot.lane.b32.xlu1 %v6398_v47, %s6028_s14 }
 0x330   : > { %1375 = vrot.lane.b32.xlu0 %v6268_v12, %s6029_s10 }
 0x333   : > { %947 = vrot.lane.b32.xlu1 %v6402_v48, %s6028_s14 }
 0x334   : > { %941 = vrot.lane.b32.xlu0 %v6386_v45, %s6028_s14 }
 0x337   : > { %1369 = vrot.lane.b32.xlu1 %v6364_v42, %s6029_s10 }
 0x338   : > { %943 = vrot.lane.b32.xlu0 %v6390_v46, %s6028_s14 }
 0x33b   : > { %1355 = vrot.lane.b32.xlu1 %v6374_v43, %s6029_s10 }
 0x33c   : > { %1371 = vrot.lane.b32.xlu0 %v6254_v5, %s6029_s10 }
 0x33f   : > { %1359 = vrot.lane.b32.xlu1 %v6386_v45, %s6029_s10 }
 0x340   : > { %949 = vrot.lane.b32.xlu0 %v6409_v49, %s6028_s14 }
 0x343   : > { %1363 = vrot.lane.b32.xlu1 %v6398_v47, %s6029_s10 }
 0x344   : > { %1353 = vrot.lane.b32.xlu0 %v6243_v63, %s6029_s10 }
 0x347   : > { %1367 = vrot.lane.b32.xlu1 %v6409_v49, %s6029_s10 }
 0x348   : > { %1357 = vrot.lane.b32.xlu0 %v6378_v44, %s6029_s10 }
 0x34c   : > { %1361 = vrot.lane.b32.xlu0 %v6390_v46, %s6029_s10 }
 0x350   : > { %1365 = vrot.lane.b32.xlu0 %v6402_v48, %s6029_s10 }
 0x362   : > { %v771_v27 = vpop.xlane.xlu1 %770 }
 0x363   : > { %5630 = vrcp.f32 %v771_v27 }
 0x366   : > { %v768_v30 = vpop.xlane.xlu0 %767 }
 0x367   : > { %5632 = vrcp.f32 %v768_v30 }
 0x370   : > { %v5631_v31 = vpop.eup %5630 }
 0x371   : > { %v799_v59 = vmul.f32 %v5631_v31, %v6447_v28 }
 0x374   : > { %v5633_v54 = vpop.eup %5632 }
 0x375   : > { %v798_v58 = vmul.f32 %v5633_v54, %v6452_v34 }
 0x377   : > { %4945 = vmatprep.mubr.msk.f32.mxu1 %vm717_vm1, %v798_v58 }
 0x378   : > { %4946 = vmatmul.mubr.msk.f32.vlgmr.msra.gmra.mxu1 %vm717_vm1, %v799_v59 }
 0x379   : > { %4958 = vmatpush3.xpose.msk.msra.mxu1 %vm563_vm0, %v6425_v57 }
 0x37a   : > { %4959 = vmatprep.subr.msk.mxu1 %vm563_vm0, %v6423_v56 }
 0x37d   : > { %4960 = vmatpush3.xpose.msk.msra.mxu1 %vm563_vm0, %v6423_v56 }
 0x37e   : > { %4961 = vmatprep.subr.msk.mxu1 %vm563_vm0, %v6419_v53 }
 0x381   : > { %4962 = vmatpush3.xpose.msk.msra.mxu1 %vm563_vm0, %v6419_v53  ;;  %v936_v53 = vpop.permute.xlu0 %935 }
 0x382   : > { %4963 = vmatprep.subr.msk.mxu1 %vm563_vm0, %v6415_v51 }
 0x385   : > { %4964 = vmatpush3.xpose.msk.msra.mxu1 %vm563_vm0, %v6415_v51  ;;  %v938_v51 = vpop.permute.xlu1 %937 }
 0x386   : > { %4965 = vmatprep.subr.msk.mxu1 %vm563_vm0, %v6421_v55 }
 0x389   : > { %4966 = vmatpush3.xpose.msk.msra.mxu1 %vm563_vm0, %v6421_v55 }
 0x38a   : > { %4967 = vmatprep.subr.msk.mxu1 %vm563_vm0, %v6417_v52 }
 0x38d   : > { %4968 = vmatpush3.xpose.msk.msra.mxu1 %vm563_vm0, %v6417_v52 }
 0x38e   : > { %4969 = vmatprep.subr.msk.mxu1 %vm563_vm0, %v6413_v50 }
 0x391   : > { %4970 = vmatpush3.xpose.msk.msra.mxu1 %vm563_vm0, %v6413_v50 }
 0x392   : > { %4971 = vmatprep.subr.msk.mxu1 %vm563_vm0, %v952_v26 }
 0x395   : > { %4972 = vmatpush3.xpose.msk.msra.mxu1 %vm563_vm0, %v952_v26 }
 0x397   : > { %v777_v56 = vpop.xlane.xlu1 %776 }
 0x398   : > { %5634 = vrcp.f32 %v777_v56 }
 0x39b   : > { %v783_v55 = vpop.xlane.xlu1 %782  ;;  %v774_v57 = vpop.xlane.xlu0 %773 }
 0x39c   : > { %5636 = vrcp.f32 %v774_v57 }
 0x39d   : > { %5638 = vrcp.f32 %v783_v55 }
 0x39f   : > { %v789_v28 = vpop.xlane.xlu1 %788  ;;  %v780_v34 = vpop.xlane.xlu0 %779 }
 0x3a0   : > { %5640 = vrcp.f32 %v780_v34 }
 0x3a1   : > { %5642 = vrcp.f32 %v789_v28 }
 0x3a3   : > { %v940_v52 = vpop.permute.xlu1 %939  ;;  %v786_v60 = vpop.xlane.xlu0 %785 }
 0x3a4   : > { %5644 = vrcp.f32 %v786_v60 }
 0x3a5   : > { %v5635_v62 = vpop.eup %5634 }
 0x3a6   : > { %v801_v11 = vmul.f32 %v5635_v62, %v6461_v1 }
 0x3a7   : > { %v1374_v50 = vpop.permute.xlu1 %1373  ;;  %v1376_v61 = vpop.permute.xlu0 %1375 }
 0x3a8   : > { %5021 = vmatprep.subr.msk.mxu0 %vm563_vm0, %v1376_v61 }
 0x3a9   : > { %5022 = vmatpush3.xpose.msk.msra.mxu0 %vm563_vm0, %v1376_v61  ;;  %v5637_v2 = vpop.eup %5636 }
 0x3aa   : > { %5023 = vmatprep.subr.msk.mxu0 %vm563_vm0, %v1374_v50  ;;  %v800_v9 = vmul.f32 %v5637_v2, %v6463_v3  ;;  %v5639_v14 = vpop.eup %5638 }
 0x3ab   : > { %v946_v0 = vpop.permute.xlu1 %945  ;;  %v942_v6 = vpop.permute.xlu0 %941  ;;  %v803_v19 = vmul.f32 %v5639_v14, %v6467_v7 }
 0x3ac   : > { %4948 = vmatprep.mubr.msk.f32.mxu1 %vm717_vm1, %v800_v9 }
 0x3ad   : > { %5024 = vmatpush3.xpose.msk.msra.mxu0 %vm563_vm0, %v1374_v50  ;;  %v5641_v15 = vpop.eup %5640  ;;  %4949 = vmatmul.mubr.msk.f32.gmra.mxu1 %vm717_vm1, %v801_v11 }
 0x3ae   : > { %v802_v4 = vmul.f32 %v5641_v15, %v6469_v10  ;;  %v5643_v13 = vpop.eup %5642 }
 0x3af   : > { %v948_v16 = vpop.permute.xlu1 %947  ;;  %v944_v17 = vpop.permute.xlu0 %943  ;;  %v805_v25 = vmul.f32 %v5643_v13, %v6475_v20 }
 0x3b0   : > { %4951 = vmatprep.mubr.msk.f32.mxu1 %vm717_vm1, %v802_v4 }
 0x3b1   : > { %v5645_v21 = vpop.eup %5644  ;;  %4952 = vmatmul.mubr.msk.f32.gmra.mxu1 %vm717_vm1, %v803_v19 }
 0x3b2   : > { %v804_v1 = vmul.f32 %v5645_v21, %v6481_v23 }
 0x3b3   : > { %v1370_v3 = vpop.permute.xlu1 %1369  ;;  %v1372_v22 = vpop.permute.xlu0 %1371 }
 0x3b4   : > { %4954 = vmatprep.mubr.msk.f32.mxu1 %vm717_vm1, %v804_v1  ;;  %5025 = vmatprep.subr.msk.mxu0 %vm563_vm0, %v1372_v22 }
 0x3b5   : > { %5026 = vmatpush3.xpose.msk.msra.mxu0 %vm563_vm0, %v1372_v22  ;;  %4955 = vmatmul.mubr.msk.f32.gmra.mxu1 %vm717_vm1, %v805_v25 }
 0x3b6   : > { %5027 = vmatprep.subr.msk.mxu0 %vm563_vm0, %v1370_v3  ;;  %4973 = vmatprep.mubr.msk.f32.mxu1 %vm563_vm0, %v936_v53 }
 0x3b7   : > { %v1356_v7 = vpop.permute.xlu1 %1355  ;;  %v950_v10 = vpop.permute.xlu0 %949 }
 0x3b9   : > { %5028 = vmatpush3.xpose.msk.msra.mxu0 %vm563_vm0, %v1370_v3  ;;  %4974 = vmatmul.mubr.msk.f32.vlgmr.msra.gmra.mxu1 %vm563_vm0, %v938_v51 }
 0x3ba   : > { %4976 = vmatprep.mubr.msk.f32.mxu1 %vm563_vm0, %v940_v52 }
 0x3bb   : > { %v1354_v23 = vpop.permute.xlu0 %1353  ;;  %v1360_v26 = vpop.permute.xlu1 %1359 }
 0x3bc   : > { %5029 = vmatprep.mubr.msk.f32.mxu0 %vm563_vm0, %v1354_v23 }
 0x3bd   : > { %5030 = vmatmul.mubr.msk.f32.vlgmr.msra.gmra.mxu0 %vm563_vm0, %v1356_v7  ;;  %4977 = vmatmul.mubr.msk.f32.gmra.mxu1 %vm563_vm0, %v942_v6 }
 0x3be   : > { %4979 = vmatprep.mubr.msk.f32.mxu1 %vm563_vm0, %v944_v17 }
 0x3bf   : > { %v1358_v20 = vpop.permute.xlu0 %1357  ;;  %v1364_v27 = vpop.permute.xlu1 %1363 }
 0x3c0   : > { %5032 = vmatprep.mubr.msk.f32.mxu0 %vm563_vm0, %v1358_v20 }
 0x3c1   : > { %5033 = vmatmul.mubr.msk.f32.gmra.mxu0 %vm563_vm0, %v1360_v26  ;;  %4980 = vmatmul.mubr.msk.f32.gmra.mxu1 %vm563_vm0, %v946_v0 }
 0x3c2   : > { %4982 = vmatprep.mubr.msk.f32.mxu1 %vm563_vm0, %v948_v16 }
 0x3c3   : > { %v1362_v30 = vpop.permute.xlu0 %1361  ;;  %v1368_v54 = vpop.permute.xlu1 %1367 }
 0x3c4   : > { %5035 = vmatprep.mubr.msk.f32.mxu0 %vm563_vm0, %v1362_v30 }
 0x3c5   : > { %5036 = vmatmul.mubr.msk.f32.gmra.mxu0 %vm563_vm0, %v1364_v27  ;;  %4983 = vmatmul.mubr.msk.f32.gmra.mxu1 %vm563_vm0, %v950_v10 }
 0x3c7   : > { %v1366_v31 = vpop.permute.xlu0 %1365 }
 0x3c8   : > { %5038 = vmatprep.mubr.msk.f32.mxu0 %vm563_vm0, %v1366_v31 }
 0x3c9   : > { %5039 = vmatmul.mubr.msk.f32.gmra.mxu0 %vm563_vm0, %v1368_v54 }
 0x438   : > { %v6633_v6 = vpop.f32.mrf.mxu1 }
 0x439   : > { %8002 = vst [vmem:[#allocation14_spill] sm:$0xff] %v6633_v6 }
 0x43a   : > { %v6635_v9 = vpop.f32.mrf.mxu1 }
 0x43b   : > { %8003 = vst [vmem:[#allocation15_spill] sm:$0xff] %v6635_v9 }
 0x46d   : > { %v6637_v11 = vpop.f32.mrf.mxu1 }
 0x46e   : > { %8004 = vst [vmem:[#allocation16_spill] sm:$0xff] %v6637_v11 }
 0x46f   : > { %v6639_v14 = vpop.f32.mrf.mxu1 }
 0x470   : > { %8005 = vst [vmem:[#allocation17_spill] sm:$0xff] %v6639_v14 }
 0x471   : > { %v6641_v15 = vpop.f32.mrf.mxu1 }
 0x472   : > { %8006 = vst [vmem:[#allocation18_spill] sm:$0xff] %v6641_v15 }
 0x473   : > { %v6643_v16 = vpop.f32.mrf.mxu1 }
 0x474   : > { %8007 = vst [vmem:[#allocation19_spill] sm:$0xff] %v6643_v16 }
 0x475   : > { %v6645_v13 = vpop.f32.mrf.mxu1 }
 0x476   : > { %8008 = vst [vmem:[#allocation20_spill] sm:$0xff] %v6645_v13 }
 0x477   : > { %v6647_v7 = vpop.f32.mrf.mxu1 }
 0x478   : > { %8009 = vst [vmem:[#allocation21_spill] sm:$0xff] %v6647_v7 }
 0x479   : > { %v6651_v30 = vpop.f32.mrf.mxu1 }
 0x47d   : > { %v5031_v58 = vpop.f32.mrf.mxu0 }
 0x47e   : > { %v1525_v59 = vsel %vm717_vm1, %v5031_v58, -inf }
 0x47f   : > { %1526 = vmax.xlane.f32.xlu1 %v1525_v59  ;;  %v1483_v51 = vpop.f32.mrf.mxu0 }
 0x480   : > { %v1522_v53 = vsel %vm717_vm1, %v1483_v51, -inf }
 0x481   : > { %1523 = vmax.xlane.f32.xlu0 %v1522_v53  ;;  %v5034_v56 = vpop.f32.mrf.mxu0 }
 0x482   : > { %v1531_v55 = vsel %vm717_vm1, %v5034_v56, -inf }
 0x483   : > { %1532 = vmax.xlane.f32.xlu1 %v1531_v55  ;;  %v1493_v57 = vpop.f32.mrf.mxu0 }
 0x484   : > { %v1528_v28 = vsel %vm717_vm1, %v1493_v57, -inf }
 0x485   : > { %1529 = vmax.xlane.f32.xlu0 %v1528_v28  ;;  %v6593_v34 = vpop.f32.mrf.mxu0 }
 0x486   : > { %v1537_v52 = vsel %vm717_vm1, %v6593_v34, -inf }
 0x487   : > { %1538 = vmax.xlane.f32.xlu1 %v1537_v52  ;;  %v6597_v60 = vpop.f32.mrf.mxu0 }
 0x488   : > { %v1534_v50 = vsel %vm717_vm1, %v6597_v60, -inf }
 0x489   : > { %1535 = vmax.xlane.f32.xlu0 %v1534_v50  ;;  %v6601_v61 = vpop.f32.mrf.mxu0 }
 0x48a   : > { %v1543_v62 = vsel %vm717_vm1, %v6601_v61, -inf }
 0x48b   : > { %1544 = vmax.xlane.f32.xlu1 %v1543_v62  ;;  %v6605_v2 = vpop.f32.mrf.mxu0 }
 0x48c   : > { %v1540_v0 = vsel %vm717_vm1, %v6605_v2, -inf }
 0x48d   : > { %1541 = vmax.xlane.f32.xlu0 %v1540_v0 }
 0x49c   : > { %1214 = vrot.lane.b32.xlu1 %v6288_v29, %s6028_s14 }
 0x4a0   : > { %1210 = vrot.lane.b32.xlu1 %v6290_v32, %s6028_s14 }
 0x4a3   : > { %1212 = vrot.lane.b32.xlu0 %v6292_v33, %s6028_s14 }
 0x4a4   : > { %1208 = vrot.lane.b32.xlu1 %v6306_v37, %s6028_s14 }
 0x4a7   : > { %1206 = vrot.lane.b32.xlu0 %v6317_v38, %s6028_s14 }
 0x4a8   : > { %1204 = vrot.lane.b32.xlu1 %v6322_v39, %s6028_s14 }
 0x4ab   : > { %1624 = vrot.lane.b32.xlu0 %v6288_v29, %s6029_s10 }
 0x4ac   : > { %1202 = vrot.lane.b32.xlu1 %v6330_v40, %s6028_s14 }
 0x4af   : > { %1620 = vrot.lane.b32.xlu0 %v6290_v32, %s6029_s10 }
 0x4b0   : > { %1200 = vrot.lane.b32.xlu1 %v6336_v41, %s6028_s14 }
 0x4b4   : > { %1622 = vrot.lane.b32.xlu1 %v6292_v33, %s6029_s10 }
 0x4b8   : > { %1618 = vrot.lane.b32.xlu1 %v6306_v37, %s6029_s10 }
 0x508   : > { %v1527_v17 = vpop.xlane.xlu1 %1526 }
 0x509   : > { %v1547_v4 = vsub.f32 %v5031_v58, %v1527_v17  ;;  %v6657_v58 = vpop.f32.mrf.mxu1 }
 0x50a   : > { %v1524_v19 = vpop.xlane.xlu0 %1523 }
 0x50b   : > { %v1556_v21 = vmul.f32 1.442695, %v1547_v4  ;;  %v1546_v1 = vsub.f32 %v1483_v51, %v1524_v19 }
 0x50c   : > { %v1533_v3 = vpop.xlane.xlu1 %1532 }
 0x50d   : > { %5646 = vpow2.f32 %v1556_v21  ;;  %v1554_v22 = vmul.f32 1.442695, %v1546_v1  ;;  %v1549_v25 = vsub.f32 %v5034_v56, %v1533_v3  ;;  %v6663_v56 = vpop.f32.mrf.mxu1 }
 0x50e   : > { %v1530_v10 = vpop.xlane.xlu0 %1529 }
 0x50f   : > { %5648 = vpow2.f32 %v1554_v22  ;;  %v1560_v23 = vmul.f32 1.442695, %v1549_v25  ;;  %v1548_v26 = vsub.f32 %v1493_v57, %v1530_v10  ;;  %v6673_v0 = vpop.f32.mrf.mxu1  ;;  %v1107_v25 = vsel %vm717_vm1, %v6651_v30, -inf }
 0x510   : > { %v6649_v20 = vpop.xlane.xlu1 %1538 }
 0x511   : > { %5650 = vpow2.f32 %v1560_v23  ;;  %v1558_v27 = vmul.f32 1.442695, %v1548_v26  ;;  %v6681_v1 = vpop.f32.mrf.mxu1  ;;  %v1104_v23 = vsel %vm717_vm1, %v6657_v58, -inf }
 0x512   : > { %v6653_v31 = vpop.xlane.xlu0 %1535 }
 0x513   : > { %5652 = vpow2.f32 %v1558_v27  ;;  %v6685_v10 = vpop.f32.mrf.mxu1  ;;  %v1119_v27 = vsel %vm717_vm1, %v6681_v1, -inf }
 0x514   : > { %v6655_v54 = vpop.xlane.xlu1 %1544 }
 0x515   : > { %v1553_v14 = vsub.f32 %v6601_v61, %v6655_v54 }
 0x516   : > { %v6659_v59 = vpop.xlane.xlu0 %1541 }
 0x518   : > { %v1215_v51 = vpop.permute.xlu1 %1214 }
 0x519   : > { %4985 = vmatprep.subr.mxu1 %v1215_v51 }
 0x51a   : > { %v6661_v53 = vpop.eup %5646  ;;  %4986 = vmatpush3.msra.mxu1 %v1215_v51  ;;  %v1213_v55 = vpop.permute.xlu0 %1212 }
 0x51b   : > { %4987 = vmatprep.subr.mxu1 %v1213_v55  ;;  %v1573_v57 = vsel %vm717_vm1, %v6661_v53, 0.0  ;;  %v6691_v51 = vpop.f32.mrf.mxu1 }
 0x51c   : > { %v6667_v28 = vpop.eup %5648  ;;  %v1211_v52 = vpop.permute.xlu1 %1210  ;;  %1574 = vadd.xlane.f32.xlu0 %v1573_v57  ;;  %4988 = vmatpush3.msra.mxu1 %v1213_v55  ;;  %v1113_v55 = vsel %vm717_vm1, %v6663_v56, -inf }
 0x51d   : > { %4989 = vmatprep.subr.mxu1 %v1211_v52  ;;  %v1570_v50 = vsel %vm717_vm1, %v6667_v28, 0.0 }
 0x51e   : > { %v6671_v62 = vpop.eup %5650  ;;  %1571 = vadd.xlane.f32.xlu1 %v1570_v50  ;;  %4990 = vmatpush3.msra.mxu1 %v1211_v52  ;;  %v1207_v3 = vpop.permute.xlu0 %1206  ;;  %v1125_v52 = vsel %vm717_vm1, %v6691_v51, -inf }
 0x51f   : > { %v1579_v19 = vsel %vm717_vm1, %v6671_v62, 0.0 }
 0x520   : > { %v6675_v17 = vpop.eup %5652  ;;  %v1209_v4 = vpop.permute.xlu1 %1208 }
 0x521   : > { %4991 = vmatprep.subr.mxu1 %v1209_v4  ;;  %v1576_v21 = vsel %vm717_vm1, %v6675_v17, 0.0 }
 0x522   : > { %1580 = vadd.xlane.f32.xlu1 %v1579_v19  ;;  %1577 = vadd.xlane.f32.xlu0 %v1576_v21  ;;  %v6697_v50 = vpop.permute.xlu0 %1624  ;;  %v1116_v19 = vsel %vm717_vm1, %v6685_v10, -inf  ;;  %v6704_v21 = vpop.f32.mrf.mxu1 }
 0x523   : > { %4992 = vmatpush3.msra.mxu1 %v1209_v4  ;;  %v1110_v4 = vsel %vm717_vm1, %v6673_v0, -inf }
 0x524   : > { %4993 = vmatprep.subr.mxu1 %v1207_v3  ;;  %v1205_v22 = vpop.permute.xlu1 %1204 }
 0x525   : > { %4994 = vmatpush3.msra.mxu1 %v1207_v3  ;;  %v1122_v3 = vsel %vm717_vm1, %v6704_v21, -inf }
 0x526   : > { %4995 = vmatprep.subr.mxu1 %v1205_v22  ;;  %1108 = vmax.xlane.f32.xlu1 %v1107_v25 }
 0x527   : > { %1105 = vmax.xlane.f32.xlu0 %v1104_v23  ;;  %4996 = vmatpush3.msra.mxu1 %v1205_v22  ;;  %v1551_v22 = vsub.f32 %v6593_v34, %v6649_v20  ;;  %v1550_v23 = vsub.f32 %v6597_v60, %v6653_v31  ;;  %v6730_v20 = vpop.permute.xlu0 %1620 }
 0x528   : > { %v1203_v26 = vpop.permute.xlu1 %1202 }
 0x529   : > { %4997 = vmatprep.subr.mxu1 %v1203_v26  ;;  %v1564_v25 = vmul.f32 1.442695, %v1551_v22 }
 0x52a   : > { %1120 = vmax.xlane.f32.xlu1 %v1119_v27  ;;  %4998 = vmatpush3.msra.mxu1 %v1203_v26  ;;  %v1562_v26 = vmul.f32 1.442695, %v1550_v23 }
 0x52b   : > { %1114 = vmax.xlane.f32.xlu0 %v1113_v55  ;;  %5654 = vpow2.f32 %v1564_v25 }
 0x52c   : > { %v1201_v57 = vpop.permute.xlu1 %1200  ;;  %5656 = vpow2.f32 %v1562_v26 }
 0x52d   : > { %4999 = vmatprep.subr.mxu1 %v1201_v57 }
 0x52e   : > { %1126 = vmax.xlane.f32.xlu1 %v1125_v52  ;;  %5000 = vmatpush3.msra.mxu1 %v1201_v57 }
 0x52f   : > { %1111 = vmax.xlane.f32.xlu0 %v1110_v4  ;;  %5041 = vmatprep.subr.mxu1 %v6697_v50 }
 0x530   : > { %v6728_v60 = vpop.permute.xlu1 %1622 }
 0x533   : > { %1117 = vmax.xlane.f32.xlu0 %v1116_v19 }
 0x534   : > { %v6732_v31 = vpop.permute.xlu1 %1618 }
 0x537   : > { %1123 = vmax.xlane.f32.xlu0 %v1122_v3 }
 0x538   : > { %v6716_v27 = vpop.eup %5654 }
 0x539   : > { %v1585_v55 = vsel %vm717_vm1, %v6716_v27, 0.0  ;;  %v6720_v57 = vpop.eup %5656 }
 0x53a   : > { %v1582_v34 = vsel %vm717_vm1, %v6720_v57, 0.0 }
 0x53f   : > { %1614 = vrot.lane.b32.xlu1 %v6322_v39, %s6029_s10 }
 0x54d   : > { %1616 = vrot.lane.b32.xlu0 %v6317_v38, %s6029_s10 }
 0x563   : > { %1586 = vadd.xlane.f32.xlu1 %v1585_v55 }
 0x56c   : > { %1583 = vadd.xlane.f32.xlu0 %v1582_v34 }
 0x574   : > { %1610 = vrot.lane.b32.xlu1 %v6336_v41, %s6029_s10 }
 0x582   : > { %1612 = vrot.lane.b32.xlu0 %v6330_v40, %s6029_s10 }
 0x5a5   : > { %v6734_v52 = vpop.xlane.xlu0 %1574 }
 0x5a7   : > { %v6736_v4 = vpop.xlane.xlu1 %1571 }
 0x5ab   : > { %v6738_v19 = vpop.xlane.xlu1 %1580  ;;  %v6740_v3 = vpop.xlane.xlu0 %1577 }
 0x5af   : > { %v1109_v22 = vpop.xlane.xlu1 %1108 }
 0x5b0   : > { %v1129_v25 = vsub.f32 %v6651_v30, %v1109_v22  ;;  %v1106_v23 = vpop.xlane.xlu0 %1105  ;;  %v1568_v22 = vmul.f32 1.442695, %v1553_v14 }
 0x5b1   : > { %v1128_v26 = vsub.f32 %v6657_v58, %v1106_v23 }
 0x5b2   : > { %v1138_v55 = vmul.f32 1.442695, %v1129_v25 }
 0x5b3   : > { %v1136_v34 = vmul.f32 1.442695, %v1128_v26  ;;  %v1121_v7 = vpop.xlane.xlu1 %1120 }
 0x5b4   : > { %5658 = vpow2.f32 %v1138_v55  ;;  %v1133_v13 = vsub.f32 %v6681_v1, %v1121_v7  ;;  %v1115_v15 = vpop.xlane.xlu0 %1114 }
 0x5b5   : > { %5660 = vpow2.f32 %v1136_v34  ;;  %v1131_v16 = vsub.f32 %v6663_v56, %v1115_v15 }
 0x5b6   : > { %v1146_v11 = vmul.f32 1.442695, %v1133_v13 }
 0x5b7   : > { %v1142_v9 = vmul.f32 1.442695, %v1131_v16  ;;  %v1127_v6 = vpop.xlane.xlu1 %1126 }
 0x5b8   : > { %v1112_v30 = vpop.xlane.xlu0 %1111  ;;  %v1135_v25 = vsub.f32 %v6691_v51, %v1127_v6  ;;  %v1552_v6 = vsub.f32 %v6605_v2, %v6659_v59 }
 0x5b9   : > { %5662 = vpow2.f32 %v1142_v9  ;;  %v1130_v58 = vsub.f32 %v6673_v0, %v1112_v30 }
 0x5ba   : > { %5664 = vpow2.f32 %v1146_v11  ;;  %v1150_v15 = vmul.f32 1.442695, %v1135_v25 }
 0x5bb   : > { %v1140_v23 = vmul.f32 1.442695, %v1130_v58 }
 0x5bc   : > { %v1118_v7 = vpop.xlane.xlu0 %1117 }
 0x5bd   : > { %5666 = vpow2.f32 %v1140_v23  ;;  %v1132_v1 = vsub.f32 %v6685_v10, %v1118_v7  ;;  %v1566_v10 = vmul.f32 1.442695, %v1552_v6 }
 0x5be   : > { %5668 = vpow2.f32 %v1568_v22 }
 0x5bf   : > { %v1144_v56 = vmul.f32 1.442695, %v1132_v1 }
 0x5c0   : > { %v1124_v61 = vpop.xlane.xlu0 %1123 }
 0x5c1   : > { %v6751_v13 = vpop.eup %5658  ;;  %5670 = vpow2.f32 %v1144_v56  ;;  %v1134_v9 = vsub.f32 %v6704_v21, %v1124_v61  ;;  %v1615_v56 = vpop.permute.xlu1 %1614 }
 0x5c2   : > { %v6754_v16 = vpop.eup %5660  ;;  %v1155_v11 = vsel %vm717_vm1, %v6751_v13, 0.0  ;;  %5672 = vpow2.f32 %v1150_v15 }
 0x5c3   : > { %v1148_v14 = vmul.f32 1.442695, %v1134_v9  ;;  %1156 = vadd.xlane.f32.xlu1 %v1155_v11  ;;  %v1152_v54 = vsel %vm717_vm1, %v6754_v16, 0.0 }
 0x5c4   : > { %1153 = vadd.xlane.f32.xlu0 %v1152_v54  ;;  %v1617_v61 = vpop.permute.xlu0 %1616 }
 0x5c5   : > { %5674 = vpow2.f32 %v1148_v14 }
 0x5c6   : > { %v6762_v0 = vpop.eup %5662  ;;  %5676 = vpow2.f32 %v1566_v10 }
 0x5c7   : > { %v1161_v51 = vsel %vm717_vm1, %v6762_v0, 0.0  ;;  %v6766_v21 = vpop.eup %5664 }
 0x5c8   : > { %1162 = vadd.xlane.f32.xlu1 %v1161_v51  ;;  %v1167_v2 = vsel %vm717_vm1, %v6766_v21, 0.0 }
 0x5ca   : > { %v6768_v26 = vpop.eup %5666 }
 0x5cb   : > { %v1158_v59 = vsel %vm717_vm1, %v6768_v26, 0.0  ;;  %v6774_v55 = vpop.eup %5668 }
 0x5cc   : > { %1168 = vadd.xlane.f32.xlu1 %v1167_v2  ;;  %1159 = vadd.xlane.f32.xlu0 %v1158_v59  ;;  %v1591_v30 = vsel %vm717_vm1, %v6774_v55, 0.0 }
 0x5ce   : > { %v6776_v34 = vpop.eup %5670 }
 0x5cf   : > { %v1164_v58 = vsel %vm717_vm1, %v6776_v34, 0.0  ;;  %v6782_v22 = vpop.eup %5672 }
 0x5d0   : > { %1592 = vadd.xlane.f32.xlu1 %v1591_v30  ;;  %1165 = vadd.xlane.f32.xlu0 %v1164_v58  ;;  %v1173_v25 = vsel %vm717_vm1, %v6782_v22, 0.0 }
 0x5d2   : > { %v6786_v23 = vpop.eup %5674 }
 0x5d3   : > { %v1170_v7 = vsel %vm717_vm1, %v6786_v23, 0.0  ;;  %v6790_v1 = vpop.eup %5676 }
 0x5d4   : > { %1174 = vadd.xlane.f32.xlu0 %v1173_v25  ;;  %v1588_v15 = vsel %vm717_vm1, %v6790_v1, 0.0 }
 0x5d8   : > { %1171 = vadd.xlane.f32.xlu0 %v1170_v7 }
 0x5dc   : > { %1589 = vadd.xlane.f32.xlu0 %v1588_v15 }
 0x5e1   : > { %1791 = vrot.lane.b32.xlu1 %v6300_v35, %s6030_s12 }
 0x5e5   : > { %1787 = vrot.lane.b32.xlu1 %v6275_v18, %s6030_s12 }
 0x5e9   : > { %1783 = vrot.lane.b32.xlu1 %v6261_v8, %s6030_s12 }
 0x5ec   : > { %v1587_v9 = vpop.xlane.xlu1 %1586 }
 0x5ed   : > { %1779 = vrot.lane.b32.xlu1 %v6364_v42, %s6030_s12 }
 0x5f0   : > { %v6846_v6 = vpop.permute.xlu1 %1610 }
 0x5f1   : > { %1765 = vrot.lane.b32.xlu1 %v6374_v43, %s6030_s12 }
 0x5f2   : > { %1793 = vrot.lane.b32.xlu0 %v6303_v36, %s6030_s12 }
 0x5f5   : > { %1769 = vrot.lane.b32.xlu1 %v6386_v45, %s6030_s12  ;;  %v1584_v11 = vpop.xlane.xlu0 %1583 }
 0x5f6   : > { %1789 = vrot.lane.b32.xlu0 %v6282_v24, %s6030_s12 }
 0x5f9   : > { %1773 = vrot.lane.b32.xlu1 %v6398_v47, %s6030_s12  ;;  %v1613_v14 = vpop.permute.xlu0 %1612 }
 0x5fa   : > { %1785 = vrot.lane.b32.xlu0 %v6268_v12, %s6030_s12 }
 0x5fd   : > { %1777 = vrot.lane.b32.xlu1 %v6409_v49, %s6030_s12 }
 0x5fe   : > { %1781 = vrot.lane.b32.xlu0 %v6254_v5, %s6030_s12 }
 0x601   : > { %2032 = vrot.lane.b32.xlu1 %v6292_v33, %s6030_s12 }
 0x602   : > { %1763 = vrot.lane.b32.xlu0 %v6243_v63, %s6030_s12 }
 0x605   : > { %2030 = vrot.lane.b32.xlu1 %v6290_v32, %s6030_s12 }
 0x606   : > { %1767 = vrot.lane.b32.xlu0 %v6378_v44, %s6030_s12 }
 0x609   : > { %2028 = vrot.lane.b32.xlu1 %v6306_v37, %s6030_s12 }
 0x60a   : > { %1771 = vrot.lane.b32.xlu0 %v6390_v46, %s6030_s12 }
 0x60d   : > { %2024 = vrot.lane.b32.xlu1 %v6322_v39, %s6030_s12 }
 0x60e   : > { %1775 = vrot.lane.b32.xlu0 %v6402_v48, %s6030_s12 }
 0x611   : > { %2020 = vrot.lane.b32.xlu1 %v6336_v41, %s6030_s12 }
 0x612   : > { %2034 = vrot.lane.b32.xlu0 %v6288_v29, %s6030_s12 }
 0x615   : > { %2201 = vrot.lane.b32.xlu1 %v6300_v35, %s6031_s16 }
 0x616   : > { %2026 = vrot.lane.b32.xlu0 %v6317_v38, %s6030_s12 }
 0x61a   : > { %2022 = vrot.lane.b32.xlu0 %v6330_v40, %s6030_s12 }
 0x61e   : > { %2203 = vrot.lane.b32.xlu0 %v6303_v36, %s6031_s16 }
 0x64c   : > { %v1157_v54 = vpop.xlane.xlu1 %1156 }
 0x64d   : > { %5678 = vrcp.f32 %v1157_v54  ;;  %v1154_v10 = vpop.xlane.xlu0 %1153 }
 0x64e   : > { %5680 = vrcp.f32 %v1154_v10 }
 0x651   : > { %v1163_v51 = vpop.xlane.xlu1 %1162 }
 0x652   : > { %5682 = vrcp.f32 %v1163_v51 }
 0x655   : > { %v1169_v2 = vpop.xlane.xlu1 %1168  ;;  %v1160_v59 = vpop.xlane.xlu0 %1159 }
 0x656   : > { %5684 = vrcp.f32 %v1160_v59 }
 0x657   : > { %5686 = vrcp.f32 %v1169_v2 }
 0x659   : > { %v1593_v30 = vpop.xlane.xlu1 %1592  ;;  %v1166_v58 = vpop.xlane.xlu0 %1165 }
 0x65a   : > { %v5679_v25 = vpop.eup %5678  ;;  %5688 = vrcp.f32 %v1166_v58 }
 0x65b   : > { %v5681_v7 = vpop.eup %5680  ;;  %v1185_v15 = vmul.f32 %v5679_v25, %v6751_v13  ;;  %5690 = vrcp.f32 %v6736_v4 }
 0x65c   : > { %v1184_v35 = vmul.f32 %v5681_v7, %v6754_v16 }
 0x65d   : > { %v6850_v36 = vpop.permute.xlu1 %1791  ;;  %v1175_v54 = vpop.xlane.xlu0 %1174 }
 0x65e   : > { %5001 = vmatprep.mubr.msk.f32.mxu1 %vm717_vm1, %v1184_v35  ;;  %5692 = vrcp.f32 %v1175_v54 }
 0x65f   : > { %5002 = vmatmul.mubr.msk.f32.vlgmr.msra.gmra.mxu1 %vm717_vm1, %v1185_v15  ;;  %v5683_v16 = vpop.eup %5682 }
 0x660   : > { %5042 = vmatpush3.msra.mxu1 %v6697_v50 }
 0x661   : > { %5043 = vmatprep.subr.mxu1 %v6728_v60  ;;  %v6857_v10 = vpop.permute.xlu1 %1787  ;;  %v1172_v13 = vpop.xlane.xlu0 %1171 }
 0x662   : > { %5044 = vmatpush3.msra.mxu1 %v6728_v60  ;;  %5694 = vrcp.f32 %v1172_v13  ;;  %v1187_v60 = vmul.f32 %v5683_v16, %v6762_v0 }
 0x663   : > { %5045 = vmatprep.subr.mxu1 %v6730_v20  ;;  %v5685_v51 = vpop.eup %5684  ;;  %5696 = vrcp.f32 %v6734_v52 }
 0x664   : > { %5046 = vmatpush3.msra.mxu1 %v6730_v20  ;;  %v1186_v4 = vmul.f32 %v5685_v51, %v6768_v26  ;;  %5698 = vrcp.f32 %v6740_v3  ;;  %v5687_v2 = vpop.eup %5686 }
 0x665   : > { %5047 = vmatprep.subr.mxu1 %v6732_v31  ;;  %v6864_v35 = vpop.permute.xlu1 %1783  ;;  %v1590_v50 = vpop.xlane.xlu0 %1589  ;;  %5700 = vrcp.f32 %v6738_v19 }
 0x666   : > { %5048 = vmatpush3.msra.mxu1 %v6732_v31  ;;  %5004 = vmatprep.mubr.msk.f32.mxu1 %vm717_vm1, %v1186_v4  ;;  %5702 = vrcp.f32 %v1584_v11  ;;  %v1189_v31 = vmul.f32 %v5687_v2, %v6766_v21 }
 0x667   : > { %5049 = vmatprep.subr.mxu1 %v1617_v61  ;;  %v5689_v20 = vpop.eup %5688  ;;  %5005 = vmatmul.mubr.msk.f32.gmra.mxu1 %vm717_vm1, %v1187_v60  ;;  %5704 = vrcp.f32 %v1587_v9 }
 0x668   : > { %5050 = vmatpush3.msra.mxu1 %v1617_v61  ;;  %v1188_v26 = vmul.f32 %v5689_v20, %v6776_v34  ;;  %v5691_v3 = vpop.eup %5690  ;;  %5706 = vrcp.f32 %v1590_v50 }
 0x669   : > { %v6873_v52 = vpop.permute.xlu1 %1779  ;;  %v1794_v59 = vpop.permute.xlu0 %1793  ;;  %5051 = vmatprep.subr.mxu1 %v1615_v56  ;;  %5708 = vrcp.f32 %v1593_v30  ;;  %v1602_v58 = vmul.f32 %v5691_v3, %v6667_v28 }
 0x66a   : > { %5052 = vmatpush3.msra.mxu1 %v1615_v56  ;;  %5007 = vmatprep.mubr.msk.f32.mxu1 %vm717_vm1, %v1188_v26 }
 0x66b   : > { %5053 = vmatprep.subr.mxu1 %v1613_v14  ;;  %5008 = vmatmul.mubr.msk.f32.gmra.mxu1 %vm717_vm1, %v1189_v31  ;;  %v5693_v61 = vpop.eup %5692 }
 0x66c   : > { %5054 = vmatpush3.msra.mxu1 %v1613_v14  ;;  %v1191_v9 = vmul.f32 %v5693_v61, %v6782_v22 }
 0x66d   : > { %v6879_v19 = vpop.permute.xlu1 %1765  ;;  %v1790_v0 = vpop.permute.xlu0 %1789  ;;  %5055 = vmatprep.subr.mxu1 %v6846_v6 }
 0x66e   : > { %5056 = vmatpush3.msra.mxu1 %v6846_v6 }
 0x66f   : > { %v5695_v34 = vpop.eup %5694  ;;  %5069 = vmatprep.subr.msk.mxu1 %vm563_vm0, %v1794_v59 }
 0x670   : > { %v1190_v21 = vmul.f32 %v5695_v34, %v6786_v23  ;;  %v5697_v14 = vpop.eup %5696 }
 0x671   : > { %v6885_v56 = vpop.permute.xlu1 %1769  ;;  %v1786_v11 = vpop.permute.xlu0 %1785  ;;  %v1603_v6 = vmul.f32 %v5697_v14, %v6661_v53 }
 0x672   : > { %5010 = vmatprep.mubr.msk.f32.mxu1 %vm717_vm1, %v1190_v21  ;;  %v5699_v25 = vpop.eup %5698 }
 0x673   : > { %5011 = vmatmul.mubr.msk.f32.gmra.mxu1 %vm717_vm1, %v1191_v9  ;;  %v5701_v30 = vpop.eup %5700  ;;  %v1604_v15 = vmul.f32 %v5699_v25, %v6675_v17 }
 0x674   : > { %5057 = vmatprep.mubr.msk.f32.mxu1 %vm717_vm1, %v1602_v58  ;;  %v5703_v54 = vpop.eup %5702  ;;  %v1605_v53 = vmul.f32 %v5701_v30, %v6671_v62 }
 0x675   : > { %v6893_v7 = vpop.permute.xlu1 %1773  ;;  %v1782_v23 = vpop.permute.xlu0 %1781  ;;  %v1606_v16 = vmul.f32 %v5703_v54, %v6720_v57 }
 0x676   : > { %v5705_v13 = vpop.eup %5704 }
 0x677   : > { %5058 = vmatmul.mubr.msk.f32.vlgmr.msra.gmra.mxu1 %vm717_vm1, %v1603_v6  ;;  %v5707_v51 = vpop.eup %5706  ;;  %v1607_v50 = vmul.f32 %v5705_v13, %v6716_v27 }
 0x678   : > { %5070 = vmatpush3.xpose.msk.msra.mxu1 %vm563_vm0, %v1794_v59  ;;  %5060 = vmatprep.mubr.msk.f32.mxu1 %vm717_vm1, %v1604_v15  ;;  %v5709_v4 = vpop.eup %5708  ;;  %v1608_v60 = vmul.f32 %v5707_v51, %v6790_v1 }
 0x679   : > { %5071 = vmatprep.subr.msk.mxu1 %vm563_vm0, %v6850_v36  ;;  %v6901_v28 = vpop.permute.xlu1 %1777  ;;  %v1764_v22 = vpop.permute.xlu0 %1763  ;;  %v1609_v57 = vmul.f32 %v5709_v4, %v6774_v55 }
 0x67b   : > { %5061 = vmatmul.mubr.msk.f32.gmra.mxu1 %vm717_vm1, %v1605_v53 }
 0x67c   : > { %5072 = vmatpush3.xpose.msk.msra.mxu1 %vm563_vm0, %v6850_v36  ;;  %5063 = vmatprep.mubr.msk.f32.mxu1 %vm717_vm1, %v1606_v16 }
 0x67d   : > { %5073 = vmatprep.subr.msk.mxu1 %vm563_vm0, %v1790_v0  ;;  %v1768_v17 = vpop.permute.xlu0 %1767  ;;  %v2033_v62 = vpop.permute.xlu1 %2032 }
 0x67f   : > { %5064 = vmatmul.mubr.msk.f32.gmra.mxu1 %vm717_vm1, %v1607_v50 }
 0x680   : > { %5074 = vmatpush3.xpose.msk.msra.mxu1 %vm563_vm0, %v1790_v0  ;;  %5066 = vmatprep.mubr.msk.f32.mxu1 %vm717_vm1, %v1608_v60 }
 0x681   : > { %5075 = vmatprep.subr.msk.mxu1 %vm563_vm0, %v6857_v10  ;;  %v1772_v36 = vpop.permute.xlu0 %1771  ;;  %v2031_v27 = vpop.permute.xlu1 %2030 }
 0x683   : > { %5067 = vmatmul.mubr.msk.f32.gmra.mxu1 %vm717_vm1, %v1609_v57 }
 0x684   : > { %5076 = vmatpush3.xpose.msk.msra.mxu1 %vm563_vm0, %v6857_v10  ;;  %5085 = vmatprep.mubr.msk.f32.mxu1 %vm563_vm0, %v1764_v22 }
 0x685   : > { %5077 = vmatprep.subr.msk.mxu1 %vm563_vm0, %v1786_v11  ;;  %v1776_v1 = vpop.permute.xlu0 %1775  ;;  %v2029_v20 = vpop.permute.xlu1 %2028 }
 0x688   : > { %5078 = vmatpush3.xpose.msk.msra.mxu1 %vm563_vm0, %v1786_v11 }
 0x689   : > { %5079 = vmatprep.subr.msk.mxu1 %vm563_vm0, %v6864_v35  ;;  %v2035_v2 = vpop.permute.xlu0 %2034  ;;  %v2025_v10 = vpop.permute.xlu1 %2024 }
 0x68a   : > { %5097 = vmatprep.subr.mxu0 %v2035_v2 }
 0x68b   : > { %5098 = vmatpush3.msra.mxu0 %v2035_v2 }
 0x68c   : > { %5080 = vmatpush3.xpose.msk.msra.mxu1 %vm563_vm0, %v6864_v35  ;;  %5099 = vmatprep.subr.mxu0 %v2033_v62 }
 0x68d   : > { %5081 = vmatprep.subr.msk.mxu1 %vm563_vm0, %v1782_v23  ;;  %5100 = vmatpush3.msra.mxu0 %v2033_v62  ;;  %v2027_v55 = vpop.permute.xlu0 %2026  ;;  %v2021_v35 = vpop.permute.xlu1 %2020 }
 0x68e   : > { %5101 = vmatprep.subr.mxu0 %v2031_v27 }
 0x68f   : > { %5102 = vmatpush3.msra.mxu0 %v2031_v27 }
 0x690   : > { %5082 = vmatpush3.xpose.msk.msra.mxu1 %vm563_vm0, %v1782_v23  ;;  %5103 = vmatprep.subr.mxu0 %v2029_v20 }
 0x691   : > { %5083 = vmatprep.subr.msk.mxu1 %vm563_vm0, %v6873_v52  ;;  %5104 = vmatpush3.msra.mxu0 %v2029_v20  ;;  %v2023_v59 = vpop.permute.xlu0 %2022 }
 0x692   : > { %5105 = vmatprep.subr.mxu0 %v2027_v55 }
 0x693   : > { %5106 = vmatpush3.msra.mxu0 %v2027_v55 }
 0x694   : > { %5084 = vmatpush3.xpose.msk.msra.mxu1 %vm563_vm0, %v6873_v52  ;;  %5107 = vmatprep.subr.mxu0 %v2025_v10 }
 0x695   : > { %5108 = vmatpush3.msra.mxu0 %v2025_v10  ;;  %v6937_v26 = vpop.permute.xlu0 %2203 }
 0x696   : > { %5109 = vmatprep.subr.mxu0 %v2023_v59 }
 0x697   : > { %5086 = vmatmul.mubr.msk.f32.vlgmr.msra.gmra.mxu1 %vm563_vm0, %v6879_v19  ;;  %5110 = vmatpush3.msra.mxu0 %v2023_v59 }
 0x698   : > { %5088 = vmatprep.mubr.msk.f32.mxu1 %vm563_vm0, %v1768_v17  ;;  %5111 = vmatprep.subr.mxu0 %v2021_v35 }
 0x699   : > { %5112 = vmatpush3.msra.mxu0 %v2021_v35  ;;  %v7009_v35 = vpop.permute.xlu1 %2201 }
 0x69a   : > { %5125 = vmatprep.subr.msk.mxu0 %vm563_vm0, %v6937_v26 }
 0x69b   : > { %5089 = vmatmul.mubr.msk.f32.gmra.mxu1 %vm563_vm0, %v6885_v56 }
 0x69c   : > { %5091 = vmatprep.mubr.msk.f32.mxu1 %vm563_vm0, %v1772_v36 }
 0x69f   : > { %5092 = vmatmul.mubr.msk.f32.gmra.mxu1 %vm563_vm0, %v6893_v7 }
 0x6a0   : > { %5094 = vmatprep.mubr.msk.f32.mxu1 %vm563_vm0, %v1776_v1 }
 0x6a3   : > { %5095 = vmatmul.mubr.msk.f32.gmra.mxu1 %vm563_vm0, %v6901_v28 }
 0x71f   : > { %v6949_v52 = vpop.f32.mrf.mxu1 }
 0x721   : > { %v6951_v31 = vpop.f32.mrf.mxu1 }
 0x727   : > { %v6955_v19 = vpop.f32.mrf.mxu1 }
 0x729   : > { %v6957_v0 = vpop.f32.mrf.mxu1 }
 0x72b   : > { %v6961_v34 = vpop.f32.mrf.mxu1 }
 0x72d   : > { %v6963_v21 = vpop.f32.mrf.mxu1 }
 0x733   : > { %v6967_v11 = vpop.f32.mrf.mxu1 }
 0x734   : > { %8010 = vst [vmem:[#allocation22_spill] sm:$0xff] %v6967_v11 }
 0x735   : > { %v6969_v9 = vpop.f32.mrf.mxu1 }
 0x736   : > { %8011 = vst [vmem:[#allocation23_spill] sm:$0xff] %v6969_v9 }
 0x737   : > { %v6973_v58 = vpop.f32.mrf.mxu1 }
 0x739   : > { %v6975_v25 = vpop.f32.mrf.mxu1 }
 0x73b   : > { %v6979_v7 = vpop.f32.mrf.mxu1 }
 0x73c   : > { %8012 = vst [vmem:[#allocation24_spill] sm:$0xff] %v6979_v7 }
 0x73d   : > { %v6981_v23 = vpop.f32.mrf.mxu1 }
 0x73e   : > { %8013 = vst [vmem:[#allocation25_spill] sm:$0xff] %v6981_v23 }
 0x73f   : > { %v6985_v15 = vpop.f32.mrf.mxu1 }
 0x740   : > { %8014 = vst [vmem:[#allocation26_spill] sm:$0xff] %v6985_v15 }
 0x741   : > { %v6987_v54 = vpop.f32.mrf.mxu1 }
 0x742   : > { %8015 = vst [vmem:[#allocation27_spill] sm:$0xff] %v6987_v54 }
 0x743   : > { %v6991_v22 = vpop.f32.mrf.mxu1 }
 0x744   : > { %8016 = vst [vmem:[#allocation28_spill] sm:$0xff] %v6991_v22 }
 0x745   : > { %v6993_v53 = vpop.f32.mrf.mxu1 }
 0x746   : > { %8017 = vst [vmem:[#allocation29_spill] sm:$0xff] %v6993_v53 }
 0x757   : > { %v5087_v16 = vpop.f32.mrf.mxu1 }
 0x758   : > { %v1935_v51 = vsel %vm717_vm1, %v5087_v16, -inf }
 0x759   : > { %1936 = vmax.xlane.f32.xlu1 %v1935_v51  ;;  %v1893_v17 = vpop.f32.mrf.mxu1 }
 0x75a   : > { %v1932_v50 = vsel %vm717_vm1, %v1893_v17, -inf }
 0x75b   : > { %1933 = vmax.xlane.f32.xlu0 %v1932_v50  ;;  %v5090_v4 = vpop.f32.mrf.mxu1 }
 0x75c   : > { %v1941_v62 = vsel %vm717_vm1, %v5090_v4, -inf }
 0x75d   : > { %v1903_v60 = vpop.f32.mrf.mxu1 }
 0x75e   : > { %v1938_v1 = vsel %vm717_vm1, %v1903_v60, -inf }
 0x75f   : > { %1942 = vmax.xlane.f32.xlu0 %v1941_v62  ;;  %v5093_v36 = vpop.f32.mrf.mxu1 }
 0x760   : > { %v1947_v57 = vsel %vm717_vm1, %v5093_v36, -inf }
 0x761   : > { %1948 = vmax.xlane.f32.xlu1 %v1947_v57  ;;  %v1913_v27 = vpop.f32.mrf.mxu1 }
 0x762   : > { %v1944_v55 = vsel %vm717_vm1, %v1913_v27, -inf }
 0x763   : > { %1939 = vmax.xlane.f32.xlu0 %v1938_v1  ;;  %v5096_v2 = vpop.f32.mrf.mxu1 }
 0x764   : > { %v1953_v20 = vsel %vm717_vm1, %v5096_v2, -inf }
 0x765   : > { %1954 = vmax.xlane.f32.xlu1 %v1953_v20  ;;  %v1923_v10 = vpop.f32.mrf.mxu1 }
 0x766   : > { %v1950_v59 = vsel %vm717_vm1, %v1923_v10, -inf }
 0x767   : > { %1945 = vmax.xlane.f32.xlu0 %v1944_v55 }
 0x76b   : > { %1951 = vmax.xlane.f32.xlu0 %v1950_v59 }
 0x776   : > { %2197 = vrot.lane.b32.xlu1 %v6275_v18, %s6031_s16 }
 0x781   : > { %2199 = vrot.lane.b32.xlu0 %v6282_v24, %s6031_s16 }
 0x7e2   : > { %v1937_v51 = vpop.xlane.xlu1 %1936 }
 0x7e3   : > { %v1957_v50 = vsub.f32 %v5087_v16, %v1937_v51 }
 0x7e4   : > { %v1934_v62 = vpop.xlane.xlu0 %1933 }
 0x7e5   : > { %v1966_v57 = vmul.f32 1.442695, %v1957_v50  ;;  %v1956_v1 = vsub.f32 %v1893_v17, %v1934_v62 }
 0x7e7   : > { %5710 = vpow2.f32 %v1966_v57  ;;  %v1964_v20 = vmul.f32 1.442695, %v1956_v1 }
 0x7e8   : > { %v1943_v30 = vpop.xlane.xlu0 %1942 }
 0x7e9   : > { %5712 = vpow2.f32 %v1964_v20  ;;  %v1959_v51 = vsub.f32 %v5090_v4, %v1943_v30 }
 0x7ea   : > { %v1949_v17 = vpop.xlane.xlu1 %1948 }
 0x7eb   : > { %v1970_v57 = vmul.f32 1.442695, %v1959_v51  ;;  %v1961_v1 = vsub.f32 %v5093_v36, %v1949_v17 }
 0x7ec   : > { %v1940_v16 = vpop.xlane.xlu0 %1939 }
 0x7ed   : > { %v1958_v62 = vsub.f32 %v1903_v60, %v1940_v16  ;;  %5714 = vpow2.f32 %v1970_v57 }
 0x7ee   : > { %v1955_v20 = vpop.xlane.xlu1 %1954 }
 0x7ef   : > { %v1963_v56 = vsub.f32 %v5096_v2, %v1955_v20  ;;  %v8018_v2 = vld [vmem:[#allocation13_spill] sm:$0xff] }
 0x7f0   : > { %v1946_v50 = vpop.xlane.xlu0 %1945 }
 0x7f1   : > { %v1960_v28 = vsub.f32 %v1913_v27, %v1946_v50  ;;  %v1978_v53 = vmul.f32 1.442695, %v1963_v56 }
 0x7f2   : > { %v2198_v16 = vpop.permute.xlu1 %2197 }
 0x7f3   : > { %v1972_v3 = vmul.f32 1.442695, %v1960_v28 }
 0x7f4   : > { %v7011_v55 = vpop.eup %5710  ;;  %v1952_v61 = vpop.xlane.xlu0 %1951 }
 0x7f5   : > { %v1983_v59 = vsel %vm717_vm1, %v7011_v55, 0.0  ;;  %v1962_v6 = vsub.f32 %v1923_v10, %v1952_v61  ;;  %v8019_v10 = vld [vmem:[#allocation12_spill] sm:$0xff] }
 0x7f6   : > { %v7015_v13 = vpop.eup %5712  ;;  %1984 = vadd.xlane.f32.xlu1 %v1983_v59  ;;  %v1968_v59 = vmul.f32 1.442695, %v1958_v62 }
 0x7f7   : > { %v1980_v14 = vsel %vm717_vm1, %v7015_v13, 0.0  ;;  %v1976_v22 = vmul.f32 1.442695, %v1962_v6 }
 0x7f8   : > { %1981 = vadd.xlane.f32.xlu0 %v1980_v14  ;;  %v1974_v14 = vmul.f32 1.442695, %v1961_v1  ;;  %5716 = vpow2.f32 %v1968_v59  ;;  %v2200_v17 = vpop.permute.xlu0 %2199 }
 0x7fa   : > { %5718 = vpow2.f32 %v1974_v14  ;;  %v7023_v30 = vpop.eup %5714 }
 0x7fb   : > { %5720 = vpow2.f32 %v1972_v3  ;;  %v1989_v60 = vsel %vm717_vm1, %v7023_v30, 0.0 }
 0x7fc   : > { %5722 = vpow2.f32 %v1978_v53 }
 0x7fd   : > { %5724 = vpow2.f32 %v1976_v22 }
 0x805   : > { %v7025_v4 = vpop.eup %5716 }
 0x806   : > { %v1986_v28 = vsel %vm717_vm1, %v7025_v4, 0.0 }
 0x807   : > { %2193 = vrot.lane.b32.xlu1 %v6261_v8, %s6031_s16  ;;  %v7029_v36 = vpop.eup %5718 }
 0x808   : > { %v7033_v61 = vpop.eup %5720  ;;  %v1995_v3 = vsel %vm717_vm1, %v7029_v36, 0.0 }
 0x809   : > { %v7037_v56 = vpop.eup %5722  ;;  %v1992_v6 = vsel %vm717_vm1, %v7033_v61, 0.0 }
 0x80a   : > { %v7041_v22 = vpop.eup %5724  ;;  %v2001_v53 = vsel %vm717_vm1, %v7037_v56, 0.0 }
 0x80b   : > { %v1998_v27 = vsel %vm717_vm1, %v7041_v22, 0.0 }
 0x80e   : > { %2195 = vrot.lane.b32.xlu0 %v6268_v12, %s6031_s16 }
 0x82b   : > { %1990 = vadd.xlane.f32.xlu1 %v1989_v60 }
 0x82d   : > { %1987 = vadd.xlane.f32.xlu0 %v1986_v28 }
 0x82f   : > { %1996 = vadd.xlane.f32.xlu1 %v1995_v3 }
 0x831   : > { %1993 = vadd.xlane.f32.xlu0 %v1992_v6 }
 0x833   : > { %2002 = vadd.xlane.f32.xlu1 %v2001_v53 }
 0x835   : > { %1999 = vadd.xlane.f32.xlu0 %v1998_v27 }
 0x844   : > { %2189 = vrot.lane.b32.xlu1 %v6364_v42, %s6031_s16 }
 0x848   : > { %2175 = vrot.lane.b32.xlu1 %v6374_v43, %s6031_s16 }
 0x84b   : > { %2191 = vrot.lane.b32.xlu0 %v6254_v5, %s6031_s16 }
 0x84c   : > { %2179 = vrot.lane.b32.xlu1 %v6386_v45, %s6031_s16 }
 0x84f   : > { %2173 = vrot.lane.b32.xlu0 %v6243_v63, %s6031_s16 }
 0x850   : > { %2183 = vrot.lane.b32.xlu1 %v6398_v47, %s6031_s16 }
 0x853   : > { %2177 = vrot.lane.b32.xlu0 %v6378_v44, %s6031_s16 }
 0x854   : > { %2187 = vrot.lane.b32.xlu1 %v6409_v49, %s6031_s16 }
 0x857   : > { %2181 = vrot.lane.b32.xlu0 %v6390_v46, %s6031_s16 }
 0x858   : > { %2442 = vrot.lane.b32.xlu1 %v6292_v33, %s6031_s16 }
 0x85b   : > { %2185 = vrot.lane.b32.xlu0 %v6402_v48, %s6031_s16 }
 0x85c   : > { %2440 = vrot.lane.b32.xlu1 %v6290_v32, %s6031_s16 }
 0x85f   : > { %2444 = vrot.lane.b32.xlu0 %v6288_v29, %s6031_s16 }
 0x860   : > { %2438 = vrot.lane.b32.xlu1 %v6306_v37, %s6031_s16 }
 0x863   : > { %2436 = vrot.lane.b32.xlu0 %v6317_v38, %s6031_s16 }
 0x864   : > { %2434 = vrot.lane.b32.xlu1 %v6322_v39, %s6031_s16 }
 0x867   : > { %2432 = vrot.lane.b32.xlu0 %v6330_v40, %s6031_s16 }
 0x868   : > { %2430 = vrot.lane.b32.xlu1 %v6336_v41, %s6031_s16 }
 0x86b   : > { %2613 = vrot.lane.b32.xlu0 %v8018_v2, %s6032_s8 }
 0x86c   : > { %2611 = vrot.lane.b32.xlu1 %v8019_v10, %s6032_s8 }
 0x87f   : > { %v1985_v51 = vpop.xlane.xlu1 %1984 }
 0x880   : > { %5726 = vrcp.f32 %v1985_v51 }
 0x881   : > { %v1982_v50 = vpop.xlane.xlu0 %1981 }
 0x882   : > { %5728 = vrcp.f32 %v1982_v50 }
 0x88d   : > { %v5727_v62 = vpop.eup %5726 }
 0x88e   : > { %v2013_v20 = vmul.f32 %v5727_v62, %v7011_v55  ;;  %v2194_v55 = vpop.permute.xlu1 %2193 }
 0x88f   : > { %v5729_v57 = vpop.eup %5728 }
 0x890   : > { %v2012_v1 = vmul.f32 %v5729_v57, %v7015_v13  ;;  %v2196_v13 = vpop.permute.xlu0 %2195 }
 0x892   : > { %5113 = vmatprep.mubr.msk.f32.mxu0 %vm717_vm1, %v2012_v1 }
 0x893   : > { %5114 = vmatmul.mubr.msk.f32.vlgmr.msra.gmra.mxu0 %vm717_vm1, %v2013_v20 }
 0x894   : > { %5126 = vmatpush3.xpose.msk.msra.mxu0 %vm563_vm0, %v6937_v26 }
 0x895   : > { %5127 = vmatprep.subr.msk.mxu0 %vm563_vm0, %v7009_v35 }
 0x898   : > { %5128 = vmatpush3.xpose.msk.msra.mxu0 %vm563_vm0, %v7009_v35 }
 0x899   : > { %5129 = vmatprep.subr.msk.mxu0 %vm563_vm0, %v2200_v17 }
 0x89c   : > { %5130 = vmatpush3.xpose.msk.msra.mxu0 %vm563_vm0, %v2200_v17 }
 0x89d   : > { %5131 = vmatprep.subr.msk.mxu0 %vm563_vm0, %v2198_v16 }
 0x8a0   : > { %5132 = vmatpush3.xpose.msk.msra.mxu0 %vm563_vm0, %v2198_v16 }
 0x8a1   : > { %5133 = vmatprep.subr.msk.mxu0 %vm563_vm0, %v2196_v13 }
 0x8a4   : > { %5134 = vmatpush3.xpose.msk.msra.mxu0 %vm563_vm0, %v2196_v13 }
 0x8a5   : > { %5135 = vmatprep.subr.msk.mxu0 %vm563_vm0, %v2194_v55 }
 0x8a8   : > { %5136 = vmatpush3.xpose.msk.msra.mxu0 %vm563_vm0, %v2194_v55 }
 0x8b4   : > { %v1991_v26 = vpop.xlane.xlu1 %1990 }
 0x8b5   : > { %5730 = vrcp.f32 %v1991_v26 }
 0x8b6   : > { %v1988_v35 = vpop.xlane.xlu0 %1987 }
 0x8b7   : > { %5732 = vrcp.f32 %v1988_v35 }
 0x8b8   : > { %v1997_v59 = vpop.xlane.xlu1 %1996 }
 0x8b9   : > { %5734 = vrcp.f32 %v1997_v59 }
 0x8ba   : > { %v1994_v14 = vpop.xlane.xlu0 %1993 }
 0x8bb   : > { %5736 = vrcp.f32 %v1994_v14 }
 0x8bc   : > { %v2003_v60 = vpop.xlane.xlu1 %2002 }
 0x8bd   : > { %5738 = vrcp.f32 %v2003_v60 }
 0x8be   : > { %v2000_v28 = vpop.xlane.xlu0 %1999 }
 0x8bf   : > { %5740 = vrcp.f32 %v2000_v28 }
 0x8c0   : > { %v2190_v3 = vpop.permute.xlu1 %2189 }
 0x8c2   : > { %v2192_v6 = vpop.permute.xlu0 %2191  ;;  %v5731_v53 = vpop.eup %5730 }
 0x8c3   : > { %5137 = vmatprep.subr.msk.mxu0 %vm563_vm0, %v2192_v6  ;;  %v2015_v50 = vmul.f32 %v5731_v53, %v7023_v30 }
 0x8c4   : > { %v5733_v27 = vpop.eup %5732  ;;  %v2176_v16 = vpop.permute.xlu1 %2175  ;;  %5138 = vmatpush3.xpose.msk.msra.mxu0 %vm563_vm0, %v2192_v6 }
 0x8c5   : > { %5139 = vmatprep.subr.msk.mxu0 %vm563_vm0, %v2190_v3  ;;  %v2014_v17 = vmul.f32 %v5733_v27, %v7025_v4 }
 0x8c6   : > { %v2174_v51 = vpop.permute.xlu0 %2173  ;;  %v5735_v62 = vpop.eup %5734 }
 0x8c7   : > { %5116 = vmatprep.mubr.msk.f32.mxu0 %vm717_vm1, %v2014_v17  ;;  %v2017_v55 = vmul.f32 %v5735_v62, %v7029_v36 }
 0x8c8   : > { %v5737_v57 = vpop.eup %5736  ;;  %v2180_v1 = vpop.permute.xlu1 %2179  ;;  %5117 = vmatmul.mubr.msk.f32.gmra.mxu0 %vm717_vm1, %v2015_v50 }
 0x8c9   : > { %5140 = vmatpush3.xpose.msk.msra.mxu0 %vm563_vm0, %v2190_v3  ;;  %v2016_v20 = vmul.f32 %v5737_v57, %v7033_v61 }
 0x8ca   : > { %v2178_v13 = vpop.permute.xlu0 %2177  ;;  %v5739_v26 = vpop.eup %5738 }
 0x8cb   : > { %5119 = vmatprep.mubr.msk.f32.mxu0 %vm717_vm1, %v2016_v20  ;;  %v2019_v14 = vmul.f32 %v5739_v26, %v7037_v56 }
 0x8cc   : > { %v5741_v4 = vpop.eup %5740  ;;  %v2184_v35 = vpop.permute.xlu1 %2183  ;;  %5120 = vmatmul.mubr.msk.f32.gmra.mxu0 %vm717_vm1, %v2017_v55 }
 0x8cd   : > { %v2018_v30 = vmul.f32 %v5741_v4, %v7041_v22 }
 0x8ce   : > { %v2182_v59 = vpop.permute.xlu0 %2181 }
 0x8cf   : > { %5122 = vmatprep.mubr.msk.f32.mxu0 %vm717_vm1, %v2018_v30 }
 0x8d0   : > { %v2188_v60 = vpop.permute.xlu1 %2187  ;;  %5123 = vmatmul.mubr.msk.f32.gmra.mxu0 %vm717_vm1, %v2019_v14 }
 0x8d1   : > { %5141 = vmatprep.mubr.msk.f32.mxu0 %vm563_vm0, %v2174_v51 }
 0x8d2   : > { %v2186_v36 = vpop.permute.xlu0 %2185 }
 0x8d4   : > { %v2443_v61 = vpop.permute.xlu1 %2442  ;;  %5142 = vmatmul.mubr.msk.f32.vlgmr.msra.gmra.mxu0 %vm563_vm0, %v2176_v16 }
 0x8d5   : > { %5144 = vmatprep.mubr.msk.f32.mxu0 %vm563_vm0, %v2178_v13 }
 0x8d6   : > { %v2445_v28 = vpop.permute.xlu0 %2444 }
 0x8d7   : > { %5153 = vmatprep.subr.mxu1 %v2445_v28 }
 0x8d8   : > { %v2441_v3 = vpop.permute.xlu1 %2440  ;;  %5145 = vmatmul.mubr.msk.f32.gmra.mxu0 %vm563_vm0, %v2180_v1  ;;  %5154 = vmatpush3.msra.mxu1 %v2445_v28 }
 0x8d9   : > { %5147 = vmatprep.mubr.msk.f32.mxu0 %vm563_vm0, %v2182_v59  ;;  %5155 = vmatprep.subr.mxu1 %v2443_v61 }
 0x8da   : > { %5156 = vmatpush3.msra.mxu1 %v2443_v61  ;;  %v2437_v56 = vpop.permute.xlu0 %2436 }
 0x8db   : > { %5157 = vmatprep.subr.mxu1 %v2441_v3 }
 0x8dc   : > { %v2439_v22 = vpop.permute.xlu1 %2438  ;;  %5148 = vmatmul.mubr.msk.f32.gmra.mxu0 %vm563_vm0, %v2184_v35  ;;  %5158 = vmatpush3.msra.mxu1 %v2441_v3 }
 0x8dd   : > { %5150 = vmatprep.mubr.msk.f32.mxu0 %vm563_vm0, %v2186_v36  ;;  %5159 = vmatprep.subr.mxu1 %v2439_v22 }
 0x8de   : > { %5160 = vmatpush3.msra.mxu1 %v2439_v22  ;;  %v2433_v6 = vpop.permute.xlu0 %2432 }
 0x8df   : > { %5161 = vmatprep.subr.mxu1 %v2437_v56 }
 0x8e0   : > { %v2435_v53 = vpop.permute.xlu1 %2434  ;;  %5151 = vmatmul.mubr.msk.f32.gmra.mxu0 %vm563_vm0, %v2188_v60  ;;  %5162 = vmatpush3.msra.mxu1 %v2437_v56 }
 0x8e1   : > { %5163 = vmatprep.subr.mxu1 %v2435_v53 }
 0x8e2   : > { %5164 = vmatpush3.msra.mxu1 %v2435_v53  ;;  %v7129_v16 = vpop.permute.xlu0 %2613 }
 0x8e3   : > { %5165 = vmatprep.subr.mxu1 %v2433_v6 }
 0x8e4   : > { %v2431_v27 = vpop.permute.xlu1 %2430  ;;  %5166 = vmatpush3.msra.mxu1 %v2433_v6 }
 0x8e5   : > { %5167 = vmatprep.subr.mxu1 %v2431_v27 }
 0x8e6   : > { %5168 = vmatpush3.msra.mxu1 %v2431_v27 }
 0x8e7   : > { %5181 = vmatprep.subr.msk.mxu1 %vm563_vm0, %v7129_v16 }
 0x953   : > { %v7133_v17 = vpop.f32.mrf.mxu0 }
 0x955   : > { %v7135_v51 = vpop.f32.mrf.mxu0 }
 0x988   : > { %v7139_v62 = vpop.f32.mrf.mxu0 }
 0x989   : > { %8020 = vst [vmem:[#allocation13_spill] sm:$0xff] %v7139_v62 }
 0x98a   : > { %v7141_v57 = vpop.f32.mrf.mxu0 }
 0x98b   : > { %8021 = vst [vmem:[#allocation12_spill] sm:$0xff] %v7141_v57 }
 0x98c   : > { %v7145_v20 = vpop.f32.mrf.mxu0 }
 0x98d   : > { %8022 = vst [vmem:[#allocation30_spill] sm:$0xff] %v7145_v20 }
 0x98e   : > { %v7147_v13 = vpop.f32.mrf.mxu0 }
 0x98f   : > { %8023 = vst [vmem:[#allocation31_spill] sm:$0xff] %v7147_v13 }
 0x990   : > { %v7151_v26 = vpop.f32.mrf.mxu0 }
 0x991   : > { %8024 = vst [vmem:[#allocation32_spill] sm:$0xff] %v7151_v26 }
 0x992   : > { %v7153_v4 = vpop.f32.mrf.mxu0 }
 0x993   : > { %8025 = vst [vmem:[#allocation33_spill] sm:$0xff] %v7153_v4 }
 0x994   : > { %v5143_v30 = vpop.f32.mrf.mxu0 }
 0x995   : > { %v2345_v59 = vsel %vm717_vm1, %v5143_v30, -inf }
 0x996   : > { %2346 = vmax.xlane.f32.xlu1 %v2345_v59  ;;  %v2303_v14 = vpop.f32.mrf.mxu0 }
 0x997   : > { %v2342_v60 = vsel %vm717_vm1, %v2303_v14, -inf }
 0x998   : > { %2343 = vmax.xlane.f32.xlu0 %v2342_v60  ;;  %v5146_v36 = vpop.f32.mrf.mxu0 }
 0x999   : > { %v2351_v28 = vsel %vm717_vm1, %v5146_v36, -inf }
 0x99a   : > { %v2313_v61 = vpop.f32.mrf.mxu0 }
 0x99b   : > { %v2348_v6 = vsel %vm717_vm1, %v2313_v61, -inf }
 0x99c   : > { %2352 = vmax.xlane.f32.xlu0 %v2351_v28  ;;  %v5149_v3 = vpop.f32.mrf.mxu0  ;;  %v7169_v28 = vpop.permute.xlu1 %2611 }
 0x99d   : > { %v2357_v56 = vsel %vm717_vm1, %v5149_v3, -inf }
 0x99e   : > { %2358 = vmax.xlane.f32.xlu1 %v2357_v56  ;;  %v2323_v22 = vpop.f32.mrf.mxu0 }
 0x99f   : > { %v2354_v59 = vsel %vm717_vm1, %v2323_v22, -inf }
 0x9a0   : > { %2349 = vmax.xlane.f32.xlu0 %v2348_v6  ;;  %v5152_v53 = vpop.f32.mrf.mxu0 }
 0x9a1   : > { %v2363_v27 = vsel %vm717_vm1, %v5152_v53, -inf }
 0x9a2   : > { %2364 = vmax.xlane.f32.xlu1 %v2363_v27  ;;  %v2333_v60 = vpop.f32.mrf.mxu0 }
 0x9a3   : > { %v2360_v35 = vsel %vm717_vm1, %v2333_v60, -inf }
 0x9a4   : > { %2355 = vmax.xlane.f32.xlu0 %v2354_v59 }
 0x9a8   : > { %2361 = vmax.xlane.f32.xlu0 %v2360_v35 }
 0x9b3   : > { %2607 = vrot.lane.b32.xlu1 %v6275_v18, %s6032_s8 }
 0x9be   : > { %2609 = vrot.lane.b32.xlu0 %v6282_v24, %s6032_s8 }
 0xa1f   : > { %v2347_v56 = vpop.xlane.xlu1 %2346 }
 0xa20   : > { %v2367_v6 = vsub.f32 %v5143_v30, %v2347_v56 }
 0xa21   : > { %v2344_v1 = vpop.xlane.xlu0 %2343 }
 0xa22   : > { %v2376_v55 = vmul.f32 1.442695, %v2367_v6  ;;  %v2366_v27 = vsub.f32 %v2303_v14, %v2344_v1 }
 0xa24   : > { %5742 = vpow2.f32 %v2376_v55  ;;  %v2374_v50 = vmul.f32 1.442695, %v2366_v27 }
 0xa25   : > { %v2353_v9 = vpop.xlane.xlu0 %2352 }
 0xa26   : > { %5744 = vpow2.f32 %v2374_v50  ;;  %v2369_v55 = vsub.f32 %v5146_v36, %v2353_v9 }
 0xa27   : > { %v2359_v50 = vpop.xlane.xlu1 %2358 }
 0xa28   : > { %v2380_v56 = vmul.f32 1.442695, %v2369_v55  ;;  %v2371_v6 = vsub.f32 %v5149_v3, %v2359_v50 }
 0xa29   : > { %v2350_v1 = vpop.xlane.xlu0 %2349 }
 0xa2a   : > { %v2368_v14 = vsub.f32 %v2313_v61, %v2350_v1  ;;  %5746 = vpow2.f32 %v2380_v56 }
 0xa2b   : > { %v2365_v27 = vpop.xlane.xlu1 %2364 }
 0xa2c   : > { %v2373_v62 = vsub.f32 %v5152_v53, %v2365_v27 }
 0xa2d   : > { %v2356_v30 = vpop.xlane.xlu0 %2355 }
 0xa2e   : > { %v2370_v11 = vsub.f32 %v2323_v22, %v2356_v30  ;;  %v2388_v23 = vmul.f32 1.442695, %v2373_v62 }
 0xa2f   : > { %v2608_v53 = vpop.permute.xlu1 %2607 }
 0xa30   : > { %v2382_v13 = vmul.f32 1.442695, %v2370_v11 }
 0xa31   : > { %v7171_v59 = vpop.eup %5742  ;;  %v2362_v57 = vpop.xlane.xlu0 %2361 }
 0xa32   : > { %v2393_v35 = vsel %vm717_vm1, %v7171_v59, 0.0  ;;  %v2372_v20 = vsub.f32 %v2333_v60, %v2362_v57 }
 0xa33   : > { %v7175_v4 = vpop.eup %5744  ;;  %2394 = vadd.xlane.f32.xlu1 %v2393_v35  ;;  %v2378_v35 = vmul.f32 1.442695, %v2368_v14 }
 0xa34   : > { %v2390_v26 = vsel %vm717_vm1, %v7175_v4, 0.0  ;;  %v2386_v7 = vmul.f32 1.442695, %v2372_v20 }
 0xa35   : > { %2391 = vadd.xlane.f32.xlu0 %v2390_v26  ;;  %v2384_v26 = vmul.f32 1.442695, %v2371_v6  ;;  %5748 = vpow2.f32 %v2378_v35  ;;  %v2610_v60 = vpop.permute.xlu0 %2609 }
 0xa37   : > { %5750 = vpow2.f32 %v2384_v26  ;;  %v7183_v9 = vpop.eup %5746 }
 0xa38   : > { %5752 = vpow2.f32 %v2382_v13  ;;  %v2399_v61 = vsel %vm717_vm1, %v7183_v9, 0.0 }
 0xa39   : > { %5754 = vpow2.f32 %v2388_v23 }
 0xa3a   : > { %5756 = vpow2.f32 %v2386_v7 }
 0xa42   : > { %v7185_v36 = vpop.eup %5748 }
 0xa43   : > { %v2396_v11 = vsel %vm717_vm1, %v7185_v36, 0.0 }
 0xa44   : > { %2603 = vrot.lane.b32.xlu1 %v6261_v8, %s6032_s8  ;;  %v7189_v3 = vpop.eup %5750 }
 0xa45   : > { %v7193_v57 = vpop.eup %5752  ;;  %v2405_v23 = vsel %vm717_vm1, %v7189_v3, 0.0 }
 0xa46   : > { %v7197_v7 = vpop.eup %5754  ;;  %v2402_v62 = vsel %vm717_vm1, %v7193_v57, 0.0 }
 0xa47   : > { %v7201_v20 = vpop.eup %5756  ;;  %v2411_v13 = vsel %vm717_vm1, %v7197_v7, 0.0 }
 0xa48   : > { %v2408_v22 = vsel %vm717_vm1, %v7201_v20, 0.0 }
 0xa4b   : > { %2605 = vrot.lane.b32.xlu0 %v6268_v12, %s6032_s8 }
 0xa68   : > { %2400 = vadd.xlane.f32.xlu1 %v2399_v61 }
 0xa6a   : > { %2397 = vadd.xlane.f32.xlu0 %v2396_v11 }
 0xa6c   : > { %2406 = vadd.xlane.f32.xlu1 %v2405_v23 }
 0xa6e   : > { %2403 = vadd.xlane.f32.xlu0 %v2402_v62 }
 0xa70   : > { %2412 = vadd.xlane.f32.xlu1 %v2411_v13 }
 0xa72   : > { %2409 = vadd.xlane.f32.xlu0 %v2408_v22 }
 0xa81   : > { %2599 = vrot.lane.b32.xlu1 %v6364_v42, %s6032_s8 }
 0xa85   : > { %2585 = vrot.lane.b32.xlu1 %v6374_v43, %s6032_s8 }
 0xa88   : > { %2601 = vrot.lane.b32.xlu0 %v6254_v5, %s6032_s8 }
 0xa89   : > { %2589 = vrot.lane.b32.xlu1 %v6386_v45, %s6032_s8 }
 0xa8c   : > { %2583 = vrot.lane.b32.xlu0 %v6243_v63, %s6032_s8 }
 0xa8d   : > { %2593 = vrot.lane.b32.xlu1 %v6398_v47, %s6032_s8 }
 0xa90   : > { %2587 = vrot.lane.b32.xlu0 %v6378_v44, %s6032_s8 }
 0xa91   : > { %2597 = vrot.lane.b32.xlu1 %v6409_v49, %s6032_s8 }
 0xa94   : > { %2591 = vrot.lane.b32.xlu0 %v6390_v46, %s6032_s8 }
 0xa95   : > { %2852 = vrot.lane.b32.xlu1 %v6292_v33, %s6032_s8 }
 0xa98   : > { %2595 = vrot.lane.b32.xlu0 %v6402_v48, %s6032_s8 }
 0xa99   : > { %2850 = vrot.lane.b32.xlu1 %v6290_v32, %s6032_s8 }
 0xa9c   : > { %2854 = vrot.lane.b32.xlu0 %v6288_v29, %s6032_s8 }
 0xa9d   : > { %2848 = vrot.lane.b32.xlu1 %v6306_v37, %s6032_s8 }
 0xaa0   : > { %2846 = vrot.lane.b32.xlu0 %v6317_v38, %s6032_s8 }
 0xaa1   : > { %2844 = vrot.lane.b32.xlu1 %v6322_v39, %s6032_s8 }
 0xaa4   : > { %2842 = vrot.lane.b32.xlu0 %v6330_v40, %s6032_s8 }
 0xaa5   : > { %2840 = vrot.lane.b32.xlu1 %v6336_v41, %s6032_s8 }
 0xaa8   : > { %3023 = vrot.lane.b32.xlu0 %v8018_v2, %s6033_s9 }
 0xaa9   : > { %3021 = vrot.lane.b32.xlu1 %v8019_v10, %s6033_s9 }
 0xabc   : > { %v2395_v1 = vpop.xlane.xlu1 %2394 }
 0xabd   : > { %5758 = vrcp.f32 %v2395_v1 }
 0xabe   : > { %v2392_v50 = vpop.xlane.xlu0 %2391 }
 0xabf   : > { %5760 = vrcp.f32 %v2392_v50 }
 0xaca   : > { %v5759_v55 = vpop.eup %5758 }
 0xacb   : > { %v2423_v56 = vmul.f32 %v5759_v55, %v7171_v59  ;;  %v2604_v59 = vpop.permute.xlu1 %2603 }
 0xacc   : > { %v5761_v30 = vpop.eup %5760 }
 0xacd   : > { %v2422_v14 = vmul.f32 %v5761_v30, %v7175_v4  ;;  %v2606_v4 = vpop.permute.xlu0 %2605 }
 0xacf   : > { %5169 = vmatprep.mubr.msk.f32.mxu1 %vm717_vm1, %v2422_v14 }
 0xad0   : > { %5170 = vmatmul.mubr.msk.f32.vlgmr.msra.gmra.mxu1 %vm717_vm1, %v2423_v56 }
 0xad1   : > { %5182 = vmatpush3.xpose.msk.msra.mxu1 %vm563_vm0, %v7129_v16 }
 0xad2   : > { %5183 = vmatprep.subr.msk.mxu1 %vm563_vm0, %v7169_v28 }
 0xad5   : > { %5184 = vmatpush3.xpose.msk.msra.mxu1 %vm563_vm0, %v7169_v28 }
 0xad6   : > { %5185 = vmatprep.subr.msk.mxu1 %vm563_vm0, %v2610_v60 }
 0xad9   : > { %5186 = vmatpush3.xpose.msk.msra.mxu1 %vm563_vm0, %v2610_v60 }
 0xada   : > { %5187 = vmatprep.subr.msk.mxu1 %vm563_vm0, %v2608_v53 }
 0xadd   : > { %5188 = vmatpush3.xpose.msk.msra.mxu1 %vm563_vm0, %v2608_v53 }
 0xade   : > { %5189 = vmatprep.subr.msk.mxu1 %vm563_vm0, %v2606_v4 }
 0xae1   : > { %5190 = vmatpush3.xpose.msk.msra.mxu1 %vm563_vm0, %v2606_v4 }
 0xae2   : > { %5191 = vmatprep.subr.msk.mxu1 %vm563_vm0, %v2604_v59 }
 0xae5   : > { %5192 = vmatpush3.xpose.msk.msra.mxu1 %vm563_vm0, %v2604_v59 }
 0xaf1   : > { %v2401_v16 = vpop.xlane.xlu1 %2400 }
 0xaf2   : > { %5762 = vrcp.f32 %v2401_v16 }
 0xaf3   : > { %v2398_v28 = vpop.xlane.xlu0 %2397 }
 0xaf4   : > { %5764 = vrcp.f32 %v2398_v28 }
 0xaf5   : > { %v2407_v6 = vpop.xlane.xlu1 %2406 }
 0xaf6   : > { %5766 = vrcp.f32 %v2407_v6 }
 0xaf7   : > { %v2404_v27 = vpop.xlane.xlu0 %2403 }
 0xaf8   : > { %5768 = vrcp.f32 %v2404_v27 }
 0xaf9   : > { %v2413_v35 = vpop.xlane.xlu1 %2412 }
 0xafa   : > { %5770 = vrcp.f32 %v2413_v35 }
 0xafb   : > { %v2410_v26 = vpop.xlane.xlu0 %2409 }
 0xafc   : > { %5772 = vrcp.f32 %v2410_v26 }
 0xafd   : > { %v2600_v61 = vpop.permute.xlu1 %2599 }
 0xaff   : > { %v2602_v11 = vpop.permute.xlu0 %2601  ;;  %v5763_v23 = vpop.eup %5762 }
 0xb00   : > { %5193 = vmatprep.subr.msk.mxu1 %vm563_vm0, %v2602_v11  ;;  %v2425_v60 = vmul.f32 %v5763_v23, %v7183_v9 }
 0xb01   : > { %v5765_v62 = vpop.eup %5764  ;;  %v2586_v13 = vpop.permute.xlu1 %2585  ;;  %5194 = vmatpush3.xpose.msk.msra.mxu1 %vm563_vm0, %v2602_v11 }
 0xb02   : > { %5195 = vmatprep.subr.msk.mxu1 %vm563_vm0, %v2600_v61  ;;  %v2424_v22 = vmul.f32 %v5765_v62, %v7185_v36 }
 0xb03   : > { %v2584_v53 = vpop.permute.xlu0 %2583  ;;  %v5767_v1 = vpop.eup %5766 }
 0xb04   : > { %5172 = vmatprep.mubr.msk.f32.mxu1 %vm717_vm1, %v2424_v22  ;;  %v2427_v56 = vmul.f32 %v5767_v1, %v7189_v3 }
 0xb05   : > { %v5769_v50 = vpop.eup %5768  ;;  %v2590_v55 = vpop.permute.xlu1 %2589  ;;  %5173 = vmatmul.mubr.msk.f32.gmra.mxu1 %vm717_vm1, %v2425_v60 }
 0xb06   : > { %5196 = vmatpush3.xpose.msk.msra.mxu1 %vm563_vm0, %v2600_v61  ;;  %v2426_v30 = vmul.f32 %v5769_v50, %v7193_v57 }
 0xb07   : > { %v2588_v14 = vpop.permute.xlu0 %2587  ;;  %v5771_v4 = vpop.eup %5770 }
 0xb08   : > { %5175 = vmatprep.mubr.msk.f32.mxu1 %vm717_vm1, %v2426_v30  ;;  %v2429_v28 = vmul.f32 %v5771_v4, %v7197_v7 }
 0xb09   : > { %v5773_v36 = vpop.eup %5772  ;;  %v2594_v59 = vpop.permute.xlu1 %2593  ;;  %5176 = vmatmul.mubr.msk.f32.gmra.mxu1 %vm717_vm1, %v2427_v56 }
 0xb0a   : > { %v2428_v9 = vmul.f32 %v5773_v36, %v7201_v20 }
 0xb0b   : > { %v2592_v16 = vpop.permute.xlu0 %2591 }
 0xb0c   : > { %5178 = vmatprep.mubr.msk.f32.mxu1 %vm717_vm1, %v2428_v9 }
 0xb0d   : > { %v2598_v6 = vpop.permute.xlu1 %2597  ;;  %5179 = vmatmul.mubr.msk.f32.gmra.mxu1 %vm717_vm1, %v2429_v28 }
 0xb0e   : > { %5197 = vmatprep.mubr.msk.f32.mxu1 %vm563_vm0, %v2584_v53 }
 0xb0f   : > { %v2596_v3 = vpop.permute.xlu0 %2595 }
 0xb11   : > { %v2853_v57 = vpop.permute.xlu1 %2852  ;;  %5198 = vmatmul.mubr.msk.f32.vlgmr.msra.gmra.mxu1 %vm563_vm0, %v2586_v13 }
 0xb12   : > { %5200 = vmatprep.mubr.msk.f32.mxu1 %vm563_vm0, %v2588_v14 }
 0xb13   : > { %v2855_v27 = vpop.permute.xlu0 %2854 }
 0xb14   : > { %5209 = vmatprep.subr.mxu0 %v2855_v27 }
 0xb15   : > { %v2851_v35 = vpop.permute.xlu1 %2850  ;;  %5201 = vmatmul.mubr.msk.f32.gmra.mxu1 %vm563_vm0, %v2590_v55  ;;  %5210 = vmatpush3.msra.mxu0 %v2855_v27 }
 0xb16   : > { %5203 = vmatprep.mubr.msk.f32.mxu1 %vm563_vm0, %v2592_v16  ;;  %5211 = vmatprep.subr.mxu0 %v2853_v57 }
 0xb17   : > { %5212 = vmatpush3.msra.mxu0 %v2853_v57  ;;  %v2847_v7 = vpop.permute.xlu0 %2846 }
 0xb18   : > { %5213 = vmatprep.subr.mxu0 %v2851_v35 }
 0xb19   : > { %v2849_v20 = vpop.permute.xlu1 %2848  ;;  %5204 = vmatmul.mubr.msk.f32.gmra.mxu1 %vm563_vm0, %v2594_v59  ;;  %5214 = vmatpush3.msra.mxu0 %v2851_v35 }
 0xb1a   : > { %5206 = vmatprep.mubr.msk.f32.mxu1 %vm563_vm0, %v2596_v3  ;;  %5215 = vmatprep.subr.mxu0 %v2849_v20 }
 0xb1b   : > { %5216 = vmatpush3.msra.mxu0 %v2849_v20  ;;  %v2843_v26 = vpop.permute.xlu0 %2842 }
 0xb1c   : > { %5217 = vmatprep.subr.mxu0 %v2847_v7 }
 0xb1d   : > { %v2845_v61 = vpop.permute.xlu1 %2844  ;;  %5207 = vmatmul.mubr.msk.f32.gmra.mxu1 %vm563_vm0, %v2598_v6  ;;  %5218 = vmatpush3.msra.mxu0 %v2847_v7 }
 0xb1e   : > { %5219 = vmatprep.subr.mxu0 %v2845_v61 }
 0xb1f   : > { %5220 = vmatpush3.msra.mxu0 %v2845_v61  ;;  %v7289_v23 = vpop.permute.xlu0 %3023 }
 0xb20   : > { %5221 = vmatprep.subr.mxu0 %v2843_v26 }
 0xb21   : > { %v2841_v11 = vpop.permute.xlu1 %2840  ;;  %5222 = vmatpush3.msra.mxu0 %v2843_v26 }
 0xb22   : > { %5223 = vmatprep.subr.mxu0 %v2841_v11 }
 0xb23   : > { %5224 = vmatpush3.msra.mxu0 %v2841_v11 }
 0xb24   : > { %5237 = vmatprep.subr.msk.mxu0 %vm563_vm0, %v7289_v23 }
 0xb90   : > { %v7293_v62 = vpop.f32.mrf.mxu1 }
 0xb92   : > { %v7295_v13 = vpop.f32.mrf.mxu1 }
 0xbc5   : > { %v7299_v53 = vpop.f32.mrf.mxu1 }
 0xbc6   : > { %8026 = vst [vmem:[#allocation34_spill] sm:$0xff] %v7299_v53 }
 0xbc7   : > { %v7301_v60 = vpop.f32.mrf.mxu1 }
 0xbc8   : > { %8027 = vst [vmem:[#allocation35_spill] sm:$0xff] %v7301_v60 }
 0xbc9   : > { %v7305_v50 = vpop.f32.mrf.mxu1 }
 0xbca   : > { %8028 = vst [vmem:[#allocation36_spill] sm:$0xff] %v7305_v50 }
 0xbcb   : > { %v7307_v55 = vpop.f32.mrf.mxu1 }
 0xbcc   : > { %8029 = vst [vmem:[#allocation37_spill] sm:$0xff] %v7307_v55 }
 0xbcd   : > { %v7311_v14 = vpop.f32.mrf.mxu1 }
 0xbce   : > { %8030 = vst [vmem:[#allocation38_spill] sm:$0xff] %v7311_v14 }
 0xbcf   : > { %v7313_v56 = vpop.f32.mrf.mxu1 }
 0xbd0   : > { %8031 = vst [vmem:[#allocation39_spill] sm:$0xff] %v7313_v56 }
 0xbd1   : > { %v5199_v36 = vpop.f32.mrf.mxu1 }
 0xbd2   : > { %v2755_v59 = vsel %vm717_vm1, %v5199_v36, -inf }
 0xbd3   : > { %2756 = vmax.xlane.f32.xlu1 %v2755_v59  ;;  %v2713_v9 = vpop.f32.mrf.mxu1 }
 0xbd4   : > { %v2752_v16 = vsel %vm717_vm1, %v2713_v9, -inf }
 0xbd5   : > { %2753 = vmax.xlane.f32.xlu0 %v2752_v16  ;;  %v5202_v28 = vpop.f32.mrf.mxu1  ;;  %v7329_v16 = vpop.permute.xlu1 %3021 }
 0xbd6   : > { %v2761_v3 = vsel %vm717_vm1, %v5202_v28, -inf }
 0xbd7   : > { %v2723_v6 = vpop.f32.mrf.mxu1 }
 0xbd8   : > { %v2758_v7 = vsel %vm717_vm1, %v2723_v6, -inf }
 0xbd9   : > { %2762 = vmax.xlane.f32.xlu0 %v2761_v3  ;;  %v5205_v57 = vpop.f32.mrf.mxu1 }
 0xbda   : > { %v2767_v27 = vsel %vm717_vm1, %v5205_v57, -inf }
 0xbdb   : > { %2768 = vmax.xlane.f32.xlu1 %v2767_v27  ;;  %v2733_v35 = vpop.f32.mrf.mxu1 }
 0xbdc   : > { %v2764_v61 = vsel %vm717_vm1, %v2733_v35, -inf }
 0xbdd   : > { %2759 = vmax.xlane.f32.xlu0 %v2758_v7  ;;  %v5208_v20 = vpop.f32.mrf.mxu1 }
 0xbde   : > { %v2773_v26 = vsel %vm717_vm1, %v5208_v20, -inf }
 0xbdf   : > { %2774 = vmax.xlane.f32.xlu1 %v2773_v26  ;;  %v2743_v11 = vpop.f32.mrf.mxu1 }
 0xbe0   : > { %v2770_v59 = vsel %vm717_vm1, %v2743_v11, -inf }
 0xbe1   : > { %2765 = vmax.xlane.f32.xlu0 %v2764_v61 }
 0xbe5   : > { %2771 = vmax.xlane.f32.xlu0 %v2770_v59 }
 0xbf0   : > { %3017 = vrot.lane.b32.xlu1 %v6275_v18, %s6033_s9 }
 0xbfb   : > { %3019 = vrot.lane.b32.xlu0 %v6282_v24, %s6033_s9 }
 0xc5c   : > { %v2757_v3 = vpop.xlane.xlu1 %2756 }
 0xc5d   : > { %v2777_v27 = vsub.f32 %v5199_v36, %v2757_v3 }
 0xc5e   : > { %v2754_v7 = vpop.xlane.xlu0 %2753 }
 0xc5f   : > { %v2786_v4 = vmul.f32 1.442695, %v2777_v27  ;;  %v2776_v26 = vsub.f32 %v2713_v9, %v2754_v7 }
 0xc61   : > { %5774 = vpow2.f32 %v2786_v4  ;;  %v2784_v1 = vmul.f32 1.442695, %v2776_v26 }
 0xc62   : > { %v2763_v56 = vpop.xlane.xlu0 %2762 }
 0xc63   : > { %5776 = vpow2.f32 %v2784_v1  ;;  %v2779_v4 = vsub.f32 %v5202_v28, %v2763_v56 }
 0xc64   : > { %v2769_v1 = vpop.xlane.xlu1 %2768 }
 0xc65   : > { %v2790_v27 = vmul.f32 1.442695, %v2779_v4  ;;  %v2781_v7 = vsub.f32 %v5205_v57, %v2769_v1 }
 0xc66   : > { %v2760_v36 = vpop.xlane.xlu0 %2759 }
 0xc67   : > { %v2778_v3 = vsub.f32 %v2723_v6, %v2760_v36  ;;  %5778 = vpow2.f32 %v2790_v27 }
 0xc68   : > { %v2775_v26 = vpop.xlane.xlu1 %2774 }
 0xc69   : > { %v2783_v53 = vsub.f32 %v5208_v20, %v2775_v26 }
 0xc6a   : > { %v2766_v9 = vpop.xlane.xlu0 %2765 }
 0xc6b   : > { %v2780_v14 = vsub.f32 %v2733_v35, %v2766_v9  ;;  %v2798_v54 = vmul.f32 1.442695, %v2783_v53 }
 0xc6c   : > { %v3018_v20 = vpop.permute.xlu1 %3017 }
 0xc6d   : > { %v2792_v55 = vmul.f32 1.442695, %v2780_v14 }
 0xc6e   : > { %v7331_v61 = vpop.eup %5774  ;;  %v2772_v60 = vpop.xlane.xlu0 %2771 }
 0xc6f   : > { %v2803_v59 = vsel %vm717_vm1, %v7331_v61, 0.0  ;;  %v2782_v50 = vsub.f32 %v2743_v11, %v2772_v60 }
 0xc70   : > { %v7335_v30 = vpop.eup %5776  ;;  %2804 = vadd.xlane.f32.xlu1 %v2803_v59  ;;  %v2788_v59 = vmul.f32 1.442695, %v2778_v3 }
 0xc71   : > { %v2800_v22 = vsel %vm717_vm1, %v7335_v30, 0.0  ;;  %v2796_v15 = vmul.f32 1.442695, %v2782_v50 }
 0xc72   : > { %2801 = vadd.xlane.f32.xlu0 %v2800_v22  ;;  %v2794_v22 = vmul.f32 1.442695, %v2781_v7  ;;  %5780 = vpow2.f32 %v2788_v59  ;;  %v3020_v11 = vpop.permute.xlu0 %3019 }
 0xc74   : > { %5782 = vpow2.f32 %v2794_v22  ;;  %v7343_v56 = vpop.eup %5778 }
 0xc75   : > { %5784 = vpow2.f32 %v2792_v55  ;;  %v2809_v6 = vsel %vm717_vm1, %v7343_v56, 0.0 }
 0xc76   : > { %5786 = vpow2.f32 %v2798_v54 }
 0xc77   : > { %5788 = vpow2.f32 %v2796_v15 }
 0xc7f   : > { %v7345_v28 = vpop.eup %5780 }
 0xc80   : > { %v2806_v14 = vsel %vm717_vm1, %v7345_v28, 0.0 }
 0xc81   : > { %3013 = vrot.lane.b32.xlu1 %v6261_v8, %s6033_s9  ;;  %v7349_v57 = vpop.eup %5782 }
 0xc82   : > { %v7353_v60 = vpop.eup %5784  ;;  %v2815_v54 = vsel %vm717_vm1, %v7349_v57, 0.0 }
 0xc83   : > { %v7357_v15 = vpop.eup %5786  ;;  %v2812_v53 = vsel %vm717_vm1, %v7353_v60, 0.0 }
 0xc84   : > { %v7361_v50 = vpop.eup %5788  ;;  %v2821_v55 = vsel %vm717_vm1, %v7357_v15, 0.0 }
 0xc85   : > { %v2818_v35 = vsel %vm717_vm1, %v7361_v50, 0.0 }
 0xc88   : > { %3015 = vrot.lane.b32.xlu0 %v6268_v12, %s6033_s9 }
 0xca5   : > { %2810 = vadd.xlane.f32.xlu1 %v2809_v6 }
 0xca7   : > { %2807 = vadd.xlane.f32.xlu0 %v2806_v14 }
 0xca9   : > { %2816 = vadd.xlane.f32.xlu1 %v2815_v54 }
 0xcab   : > { %2813 = vadd.xlane.f32.xlu0 %v2812_v53 }
 0xcad   : > { %2822 = vadd.xlane.f32.xlu1 %v2821_v55 }
 0xcaf   : > { %2819 = vadd.xlane.f32.xlu0 %v2818_v35 }
 0xcbe   : > { %3009 = vrot.lane.b32.xlu1 %v6364_v42, %s6033_s9 }
 0xcc2   : > { %2995 = vrot.lane.b32.xlu1 %v6374_v43, %s6033_s9 }
 0xcc5   : > { %3011 = vrot.lane.b32.xlu0 %v6254_v5, %s6033_s9 }
 0xcc6   : > { %2999 = vrot.lane.b32.xlu1 %v6386_v45, %s6033_s9 }
 0xcc9   : > { %2993 = vrot.lane.b32.xlu0 %v6243_v63, %s6033_s9 }
 0xcca   : > { %3003 = vrot.lane.b32.xlu1 %v6398_v47, %s6033_s9 }
 0xccd   : > { %2997 = vrot.lane.b32.xlu0 %v6378_v44, %s6033_s9 }
 0xcce   : > { %3007 = vrot.lane.b32.xlu1 %v6409_v49, %s6033_s9 }
 0xcd1   : > { %3001 = vrot.lane.b32.xlu0 %v6390_v46, %s6033_s9 }
 0xcd2   : > { %3262 = vrot.lane.b32.xlu1 %v6292_v33, %s6033_s9 }
 0xcd5   : > { %3005 = vrot.lane.b32.xlu0 %v6402_v48, %s6033_s9 }
 0xcd6   : > { %3260 = vrot.lane.b32.xlu1 %v6290_v32, %s6033_s9 }
 0xcd9   : > { %3264 = vrot.lane.b32.xlu0 %v6288_v29, %s6033_s9 }
 0xcda   : > { %3258 = vrot.lane.b32.xlu1 %v6306_v37, %s6033_s9 }
 0xcdd   : > { %3256 = vrot.lane.b32.xlu0 %v6317_v38, %s6033_s9 }
 0xcde   : > { %3254 = vrot.lane.b32.xlu1 %v6322_v39, %s6033_s9 }
 0xce1   : > { %3252 = vrot.lane.b32.xlu0 %v6330_v40, %s6033_s9 }
 0xce2   : > { %3250 = vrot.lane.b32.xlu1 %v6336_v41, %s6033_s9 }
 0xce5   : > { %3433 = vrot.lane.b32.xlu0 %v8018_v2, %s6034_s30 }
 0xce6   : > { %3431 = vrot.lane.b32.xlu1 %v8019_v10, %s6034_s30 }
 0xcf9   : > { %v2805_v36 = vpop.xlane.xlu1 %2804 }
 0xcfa   : > { %5790 = vrcp.f32 %v2805_v36 }
 0xcfb   : > { %v2802_v1 = vpop.xlane.xlu0 %2801 }
 0xcfc   : > { %5792 = vrcp.f32 %v2802_v1 }
 0xcfd   : > { %v3014_v10 = vpop.permute.xlu1 %3013 }
 0xcff   : > { %v3016_v2 = vpop.permute.xlu0 %3015 }
 0xd07   : > { %v5791_v4 = vpop.eup %5790 }
 0xd08   : > { %v2833_v27 = vmul.f32 %v5791_v4, %v7331_v61 }
 0xd09   : > { %v5793_v9 = vpop.eup %5792 }
 0xd0a   : > { %v2832_v3 = vmul.f32 %v5793_v9, %v7335_v30 }
 0xd0c   : > { %5225 = vmatprep.mubr.msk.f32.mxu0 %vm717_vm1, %v2832_v3 }
 0xd0d   : > { %5226 = vmatmul.mubr.msk.f32.vlgmr.msra.gmra.mxu0 %vm717_vm1, %v2833_v27 }
 0xd0e   : > { %5238 = vmatpush3.xpose.msk.msra.mxu0 %vm563_vm0, %v7289_v23 }
 0xd0f   : > { %5239 = vmatprep.subr.msk.mxu0 %vm563_vm0, %v7329_v16 }
 0xd12   : > { %5240 = vmatpush3.xpose.msk.msra.mxu0 %vm563_vm0, %v7329_v16 }
 0xd13   : > { %5241 = vmatprep.subr.msk.mxu0 %vm563_vm0, %v3020_v11 }
 0xd16   : > { %5242 = vmatpush3.xpose.msk.msra.mxu0 %vm563_vm0, %v3020_v11 }
 0xd17   : > { %5243 = vmatprep.subr.msk.mxu0 %vm563_vm0, %v3018_v20 }
 0xd1a   : > { %5244 = vmatpush3.xpose.msk.msra.mxu0 %vm563_vm0, %v3018_v20 }
 0xd1b   : > { %5245 = vmatprep.subr.msk.mxu0 %vm563_vm0, %v3016_v2 }
 0xd1e   : > { %5246 = vmatpush3.xpose.msk.msra.mxu0 %vm563_vm0, %v3016_v2 }
 0xd1f   : > { %5247 = vmatprep.subr.msk.mxu0 %vm563_vm0, %v3014_v10 }
 0xd22   : > { %5248 = vmatpush3.xpose.msk.msra.mxu0 %vm563_vm0, %v3014_v10 }
 0xd2e   : > { %v2811_v23 = vpop.xlane.xlu1 %2810 }
 0xd2f   : > { %5794 = vrcp.f32 %v2811_v23 }
 0xd30   : > { %v2808_v30 = vpop.xlane.xlu0 %2807 }
 0xd31   : > { %5796 = vrcp.f32 %v2808_v30 }
 0xd32   : > { %v2817_v16 = vpop.xlane.xlu1 %2816 }
 0xd33   : > { %5798 = vrcp.f32 %v2817_v16 }
 0xd34   : > { %v2814_v61 = vpop.xlane.xlu0 %2813 }
 0xd35   : > { %5800 = vrcp.f32 %v2814_v61 }
 0xd36   : > { %v2823_v7 = vpop.xlane.xlu1 %2822 }
 0xd37   : > { %5802 = vrcp.f32 %v2823_v7 }
 0xd38   : > { %v2820_v26 = vpop.xlane.xlu0 %2819 }
 0xd39   : > { %5804 = vrcp.f32 %v2820_v26 }
 0xd3a   : > { %v3010_v59 = vpop.permute.xlu1 %3009 }
 0xd3c   : > { %v3012_v22 = vpop.permute.xlu0 %3011  ;;  %v5795_v6 = vpop.eup %5794 }
 0xd3d   : > { %5249 = vmatprep.subr.msk.mxu0 %vm563_vm0, %v3012_v22  ;;  %v2835_v35 = vmul.f32 %v5795_v6, %v7343_v56 }
 0xd3e   : > { %v5797_v14 = vpop.eup %5796  ;;  %v2996_v54 = vpop.permute.xlu1 %2995  ;;  %5250 = vmatpush3.xpose.msk.msra.mxu0 %vm563_vm0, %v3012_v22 }
 0xd3f   : > { %5251 = vmatprep.subr.msk.mxu0 %vm563_vm0, %v3010_v59  ;;  %v2834_v53 = vmul.f32 %v5797_v14, %v7345_v28 }
 0xd40   : > { %v2994_v55 = vpop.permute.xlu0 %2993  ;;  %v5799_v20 = vpop.eup %5798 }
 0xd41   : > { %5228 = vmatprep.mubr.msk.f32.mxu0 %vm717_vm1, %v2834_v53  ;;  %v2837_v9 = vmul.f32 %v5799_v20, %v7349_v57 }
 0xd42   : > { %v5801_v11 = vpop.eup %5800  ;;  %v3000_v36 = vpop.permute.xlu1 %2999  ;;  %5229 = vmatmul.mubr.msk.f32.gmra.mxu0 %vm717_vm1, %v2835_v35 }
 0xd43   : > { %5252 = vmatpush3.xpose.msk.msra.mxu0 %vm563_vm0, %v3010_v59  ;;  %v2836_v1 = vmul.f32 %v5801_v11, %v7353_v60 }
 0xd44   : > { %v2998_v4 = vpop.permute.xlu0 %2997  ;;  %v5803_v3 = vpop.eup %5802 }
 0xd45   : > { %5231 = vmatprep.mubr.msk.f32.mxu0 %vm717_vm1, %v2836_v1  ;;  %v2839_v10 = vmul.f32 %v5803_v3, %v7357_v15 }
 0xd46   : > { %v5805_v28 = vpop.eup %5804  ;;  %v3004_v27 = vpop.permute.xlu1 %3003  ;;  %5232 = vmatmul.mubr.msk.f32.gmra.mxu0 %vm717_vm1, %v2837_v9 }
 0xd47   : > { %v2838_v56 = vmul.f32 %v5805_v28, %v7361_v50 }
 0xd48   : > { %v3002_v2 = vpop.permute.xlu0 %3001 }
 0xd49   : > { %5234 = vmatprep.mubr.msk.f32.mxu0 %vm717_vm1, %v2838_v56 }
 0xd4a   : > { %v3008_v23 = vpop.permute.xlu1 %3007  ;;  %5235 = vmatmul.mubr.msk.f32.gmra.mxu0 %vm717_vm1, %v2839_v10 }
 0xd4b   : > { %5253 = vmatprep.mubr.msk.f32.mxu0 %vm563_vm0, %v2994_v55 }
 0xd4c   : > { %v3006_v57 = vpop.permute.xlu0 %3005 }
 0xd4e   : > { %v3263_v60 = vpop.permute.xlu1 %3262  ;;  %5254 = vmatmul.mubr.msk.f32.vlgmr.msra.gmra.mxu0 %vm563_vm0, %v2996_v54 }
 0xd4f   : > { %5256 = vmatprep.mubr.msk.f32.mxu0 %vm563_vm0, %v2998_v4 }
 0xd50   : > { %v3265_v30 = vpop.permute.xlu0 %3264 }
 0xd51   : > { %5265 = vmatprep.subr.mxu1 %v3265_v30 }
 0xd52   : > { %v3261_v16 = vpop.permute.xlu1 %3260  ;;  %5257 = vmatmul.mubr.msk.f32.gmra.mxu0 %vm563_vm0, %v3000_v36  ;;  %5266 = vmatpush3.msra.mxu1 %v3265_v30 }
 0xd53   : > { %5259 = vmatprep.mubr.msk.f32.mxu0 %vm563_vm0, %v3002_v2  ;;  %5267 = vmatprep.subr.mxu1 %v3263_v60 }
 0xd54   : > { %5268 = vmatpush3.msra.mxu1 %v3263_v60  ;;  %v3257_v15 = vpop.permute.xlu0 %3256 }
 0xd55   : > { %5269 = vmatprep.subr.mxu1 %v3261_v16 }
 0xd56   : > { %v3259_v50 = vpop.permute.xlu1 %3258  ;;  %5260 = vmatmul.mubr.msk.f32.gmra.mxu0 %vm563_vm0, %v3004_v27  ;;  %5270 = vmatpush3.msra.mxu1 %v3261_v16 }
 0xd57   : > { %5262 = vmatprep.mubr.msk.f32.mxu0 %vm563_vm0, %v3006_v57  ;;  %5271 = vmatprep.subr.mxu1 %v3259_v50 }
 0xd58   : > { %5272 = vmatpush3.msra.mxu1 %v3259_v50  ;;  %v3253_v61 = vpop.permute.xlu0 %3252 }
 0xd59   : > { %5273 = vmatprep.subr.mxu1 %v3257_v15 }
 0xd5a   : > { %v3255_v7 = vpop.permute.xlu1 %3254  ;;  %5263 = vmatmul.mubr.msk.f32.gmra.mxu0 %vm563_vm0, %v3008_v23  ;;  %5274 = vmatpush3.msra.mxu1 %v3257_v15 }
 0xd5b   : > { %5275 = vmatprep.subr.mxu1 %v3255_v7 }
 0xd5c   : > { %5276 = vmatpush3.msra.mxu1 %v3255_v7  ;;  %v7449_v59 = vpop.permute.xlu0 %3433 }
 0xd5d   : > { %5277 = vmatprep.subr.mxu1 %v3253_v61 }
 0xd5e   : > { %v3251_v26 = vpop.permute.xlu1 %3250  ;;  %5278 = vmatpush3.msra.mxu1 %v3253_v61 }
 0xd5f   : > { %5279 = vmatprep.subr.mxu1 %v3251_v26 }
 0xd60   : > { %5280 = vmatpush3.msra.mxu1 %v3251_v26 }
 0xd61   : > { %5293 = vmatprep.subr.msk.mxu1 %vm563_vm0, %v7449_v59 }
 0xd62   : > { %v7489_v26 = vpop.permute.xlu1 %3431 }
 0xdcd   : > { %v7453_v22 = vpop.f32.mrf.mxu0 }
 0xdcf   : > { %v7455_v6 = vpop.f32.mrf.mxu0 }
 0xe02   : > { %v7459_v54 = vpop.f32.mrf.mxu0 }
 0xe04   : > { %v7461_v53 = vpop.f32.mrf.mxu0 }
 0xe06   : > { %v7465_v35 = vpop.f32.mrf.mxu0 }
 0xe08   : > { %v7467_v20 = vpop.f32.mrf.mxu0 }
 0xe0a   : > { %v7471_v36 = vpop.f32.mrf.mxu0 }
 0xe0b   : > { %8032 = vst [vmem:[#allocation40_spill] sm:$0xff] %v7471_v36 }
 0xe0c   : > { %v7473_v1 = vpop.f32.mrf.mxu0 }
 0xe0d   : > { %8033 = vst [vmem:[#allocation41_spill] sm:$0xff] %v7473_v1 }
 0xe0e   : > { %v5255_v9 = vpop.f32.mrf.mxu0 }
 0xe0f   : > { %v3165_v3 = vsel %vm717_vm1, %v5255_v9, -inf }
 0xe10   : > { %3166 = vmax.xlane.f32.xlu1 %v3165_v3  ;;  %v3123_v28 = vpop.f32.mrf.mxu0 }
 0xe11   : > { %v3162_v27 = vsel %vm717_vm1, %v3123_v28, -inf }
 0xe12   : > { %3163 = vmax.xlane.f32.xlu0 %v3162_v27  ;;  %v5258_v56 = vpop.f32.mrf.mxu0 }
 0xe13   : > { %v3171_v10 = vsel %vm717_vm1, %v5258_v56, -inf }
 0xe14   : > { %v3133_v2 = vpop.f32.mrf.mxu0 }
 0xe15   : > { %v3168_v30 = vsel %vm717_vm1, %v3133_v2, -inf }
 0xe16   : > { %3172 = vmax.xlane.f32.xlu0 %v3171_v10  ;;  %v5261_v23 = vpop.f32.mrf.mxu0 }
 0xe17   : > { %v3177_v57 = vsel %vm717_vm1, %v5261_v23, -inf }
 0xe18   : > { %3178 = vmax.xlane.f32.xlu1 %v3177_v57  ;;  %v3143_v60 = vpop.f32.mrf.mxu0 }
 0xe19   : > { %v3174_v50 = vsel %vm717_vm1, %v3143_v60, -inf }
 0xe1a   : > { %3169 = vmax.xlane.f32.xlu0 %v3168_v30  ;;  %v5264_v16 = vpop.f32.mrf.mxu0 }
 0xe1b   : > { %v3183_v15 = vsel %vm717_vm1, %v5264_v16, -inf }
 0xe1c   : > { %3184 = vmax.xlane.f32.xlu1 %v3183_v15  ;;  %v3153_v61 = vpop.f32.mrf.mxu0 }
 0xe1d   : > { %v3180_v7 = vsel %vm717_vm1, %v3153_v61, -inf }
 0xe1e   : > { %3175 = vmax.xlane.f32.xlu0 %v3174_v50 }
 0xe22   : > { %3181 = vmax.xlane.f32.xlu0 %v3180_v7 }
 0xe2d   : > { %3427 = vrot.lane.b32.xlu1 %v6275_v18, %s6034_s30 }
 0xe38   : > { %3429 = vrot.lane.b32.xlu0 %v6282_v24, %s6034_s30 }
 0xe99   : > { %v3167_v3 = vpop.xlane.xlu1 %3166 }
 0xe9a   : > { %v3187_v27 = vsub.f32 %v5255_v9, %v3167_v3 }
 0xe9b   : > { %v3164_v10 = vpop.xlane.xlu0 %3163 }
 0xe9c   : > { %v3196_v57 = vmul.f32 1.442695, %v3187_v27  ;;  %v3186_v30 = vsub.f32 %v3123_v28, %v3164_v10 }
 0xe9e   : > { %5806 = vpow2.f32 %v3196_v57  ;;  %v3194_v15 = vmul.f32 1.442695, %v3186_v30 }
 0xe9f   : > { %v3173_v24 = vpop.xlane.xlu0 %3172 }
 0xea0   : > { %5808 = vpow2.f32 %v3194_v15  ;;  %v3189_v3 = vsub.f32 %v5258_v56, %v3173_v24 }
 0xea1   : > { %v3179_v28 = vpop.xlane.xlu1 %3178 }
 0xea2   : > { %v3200_v57 = vmul.f32 1.442695, %v3189_v3  ;;  %v3191_v30 = vsub.f32 %v5261_v23, %v3179_v28 }
 0xea3   : > { %v3170_v9 = vpop.xlane.xlu0 %3169 }
 0xea4   : > { %v3188_v10 = vsub.f32 %v3133_v2, %v3170_v9  ;;  %5810 = vpow2.f32 %v3200_v57 }
 0xea5   : > { %v3185_v15 = vpop.xlane.xlu1 %3184 }
 0xea6   : > { %v3193_v14 = vsub.f32 %v5264_v16, %v3185_v15 }
 0xea7   : > { %v3176_v27 = vpop.xlane.xlu0 %3175 }
 0xea8   : > { %v3190_v55 = vsub.f32 %v3143_v60, %v3176_v27  ;;  %v3208_v36 = vmul.f32 1.442695, %v3193_v14 }
 0xeaa   : > { %v3202_v1 = vmul.f32 1.442695, %v3190_v55 }
 0xeab   : > { %v7491_v50 = vpop.eup %5806  ;;  %v3182_v11 = vpop.xlane.xlu0 %3181 }
 0xeac   : > { %v3213_v7 = vsel %vm717_vm1, %v7491_v50, 0.0 }
 0xead   : > { %v7495_v4 = vpop.eup %5808  ;;  %3214 = vadd.xlane.f32.xlu1 %v3213_v7  ;;  %v3198_v7 = vmul.f32 1.442695, %v3188_v10 }
 0xeae   : > { %v3210_v18 = vsel %vm717_vm1, %v7495_v4, 0.0 }
 0xeaf   : > { %3211 = vadd.xlane.f32.xlu0 %v3210_v18  ;;  %v3204_v18 = vmul.f32 1.442695, %v3191_v30  ;;  %5812 = vpow2.f32 %v3198_v7 }
 0xeb1   : > { %5814 = vpow2.f32 %v3204_v18  ;;  %v7503_v56 = vpop.eup %5810 }
 0xeb2   : > { %5816 = vpow2.f32 %v3202_v1  ;;  %v3219_v23 = vsel %vm717_vm1, %v7503_v56, 0.0 }
 0xeb3   : > { %5818 = vpow2.f32 %v3208_v36 }
 0xebc   : > { %v7505_v2 = vpop.eup %5812 }
 0xebd   : > { %v3216_v55 = vsel %vm717_vm1, %v7505_v2, 0.0 }
 0xebe   : > { %3423 = vrot.lane.b32.xlu1 %v6261_v8, %s6034_s30  ;;  %v3192_v8 = vsub.f32 %v3153_v61, %v3182_v11  ;;  %v7509_v60 = vpop.eup %5814 }
 0xebf   : > { %v7513_v11 = vpop.eup %5816  ;;  %v3225_v14 = vsel %vm717_vm1, %v7509_v60, 0.0 }
 0xec0   : > { %v7517_v36 = vpop.eup %5818  ;;  %v3222_v1 = vsel %vm717_vm1, %v7513_v11, 0.0 }
 0xec1   : > { %v3231_v61 = vsel %vm717_vm1, %v7517_v36, 0.0 }
 0xec5   : > { %3425 = vrot.lane.b32.xlu0 %v6268_v12, %s6034_s30  ;;  %v3206_v12 = vmul.f32 1.442695, %v3192_v8 }
 0xec7   : > { %5820 = vpow2.f32 %v3206_v12 }
 0xed4   : > { %v7521_v16 = vpop.eup %5820 }
 0xed5   : > { %v3228_v24 = vsel %vm717_vm1, %v7521_v16, 0.0 }
 0xee2   : > { %3220 = vadd.xlane.f32.xlu1 %v3219_v23 }
 0xee4   : > { %3217 = vadd.xlane.f32.xlu0 %v3216_v55 }
 0xee6   : > { %3226 = vadd.xlane.f32.xlu1 %v3225_v14 }
 0xee8   : > { %3223 = vadd.xlane.f32.xlu0 %v3222_v1 }
 0xeea   : > { %3232 = vadd.xlane.f32.xlu1 %v3231_v61 }
 0xeec   : > { %3229 = vadd.xlane.f32.xlu0 %v3228_v24 }
 0xefb   : > { %3419 = vrot.lane.b32.xlu1 %v6364_v42, %s6034_s30  ;;  %v3430_v42 = vpop.permute.xlu0 %3429 }
 0xeff   : > { %3405 = vrot.lane.b32.xlu1 %v6374_v43, %s6034_s30 }
 0xf02   : > { %3421 = vrot.lane.b32.xlu0 %v6254_v5, %s6034_s30  ;;  %v3428_v5 = vpop.permute.xlu1 %3427 }
 0xf03   : > { %3409 = vrot.lane.b32.xlu1 %v6386_v45, %s6034_s30 }
 0xf06   : > { %3403 = vrot.lane.b32.xlu0 %v6243_v63, %s6034_s30 }
 0xf07   : > { %3413 = vrot.lane.b32.xlu1 %v6398_v47, %s6034_s30 }
 0xf0a   : > { %3407 = vrot.lane.b32.xlu0 %v6378_v44, %s6034_s30 }
 0xf0b   : > { %3417 = vrot.lane.b32.xlu1 %v6409_v49, %s6034_s30 }
 0xf0e   : > { %3411 = vrot.lane.b32.xlu0 %v6390_v46, %s6034_s30 }
 0xf12   : > { %3415 = vrot.lane.b32.xlu0 %v6402_v48, %s6034_s30 }
 0xf36   : > { %v3215_v43 = vpop.xlane.xlu1 %3214 }
 0xf37   : > { %5822 = vrcp.f32 %v3215_v43 }
 0xf38   : > { %v3212_v63 = vpop.xlane.xlu0 %3211 }
 0xf39   : > { %5824 = vrcp.f32 %v3212_v63 }
 0xf3a   : > { %v3424_v48 = vpop.permute.xlu1 %3423 }
 0xf3c   : > { %v3426_v46 = vpop.permute.xlu0 %3425 }
 0xf44   : > { %v5823_v45 = vpop.eup %5822 }
 0xf45   : > { %v3243_v44 = vmul.f32 %v5823_v45, %v7491_v50 }
 0xf46   : > { %v5825_v47 = vpop.eup %5824 }
 0xf47   : > { %v3242_v9 = vmul.f32 %v5825_v47, %v7495_v4 }
 0xf49   : > { %5281 = vmatprep.mubr.msk.f32.mxu1 %vm717_vm1, %v3242_v9 }
 0xf4a   : > { %5282 = vmatmul.mubr.msk.f32.vlgmr.msra.gmra.mxu1 %vm717_vm1, %v3243_v44 }
 0xf4b   : > { %5294 = vmatpush3.xpose.msk.msra.mxu1 %vm563_vm0, %v7449_v59 }
 0xf4c   : > { %5295 = vmatprep.subr.msk.mxu1 %vm563_vm0, %v7489_v26 }
 0xf4f   : > { %5296 = vmatpush3.xpose.msk.msra.mxu1 %vm563_vm0, %v7489_v26 }
 0xf50   : > { %5297 = vmatprep.subr.msk.mxu1 %vm563_vm0, %v3430_v42 }
 0xf53   : > { %5298 = vmatpush3.xpose.msk.msra.mxu1 %vm563_vm0, %v3430_v42 }
 0xf54   : > { %5299 = vmatprep.subr.msk.mxu1 %vm563_vm0, %v3428_v5 }
 0xf57   : > { %5300 = vmatpush3.xpose.msk.msra.mxu1 %vm563_vm0, %v3428_v5 }
 0xf58   : > { %5301 = vmatprep.subr.msk.mxu1 %vm563_vm0, %v3426_v46 }
 0xf5b   : > { %5302 = vmatpush3.xpose.msk.msra.mxu1 %vm563_vm0, %v3426_v46 }
 0xf5c   : > { %5303 = vmatprep.subr.msk.mxu1 %vm563_vm0, %v3424_v48 }
 0xf5f   : > { %5304 = vmatpush3.xpose.msk.msra.mxu1 %vm563_vm0, %v3424_v48 }
 0xf6b   : > { %v3221_v49 = vpop.xlane.xlu1 %3220 }
 0xf6c   : > { %5826 = vrcp.f32 %v3221_v49 }
 0xf6d   : > { %v3218_v59 = vpop.xlane.xlu0 %3217 }
 0xf6e   : > { %5828 = vrcp.f32 %v3218_v59 }
 0xf6f   : > { %v3227_v4 = vpop.xlane.xlu1 %3226 }
 0xf70   : > { %5830 = vrcp.f32 %v3227_v4 }
 0xf71   : > { %v3224_v26 = vpop.xlane.xlu0 %3223 }
 0xf72   : > { %5832 = vrcp.f32 %v3224_v26 }
 0xf73   : > { %v3233_v50 = vpop.xlane.xlu1 %3232 }
 0xf74   : > { %5834 = vrcp.f32 %v3233_v50 }
 0xf75   : > { %v3230_v28 = vpop.xlane.xlu0 %3229 }
 0xf76   : > { %5836 = vrcp.f32 %v3230_v28 }
 0xf77   : > { %v3420_v57 = vpop.permute.xlu1 %3419 }
 0xf79   : > { %v3422_v3 = vpop.permute.xlu0 %3421  ;;  %v5827_v27 = vpop.eup %5826 }
 0xf7a   : > { %5305 = vmatprep.subr.msk.mxu1 %vm563_vm0, %v3422_v3  ;;  %v3245_v15 = vmul.f32 %v5827_v27, %v7503_v56 }
 0xf7b   : > { %v5829_v10 = vpop.eup %5828  ;;  %5306 = vmatpush3.xpose.msk.msra.mxu1 %vm563_vm0, %v3422_v3  ;;  %v3406_v56 = vpop.permute.xlu1 %3405 }
 0xf7c   : > { %5307 = vmatprep.subr.msk.mxu1 %vm563_vm0, %v3420_v57  ;;  %v3244_v30 = vmul.f32 %v5829_v10, %v7505_v2 }
 0xf7d   : > { %v5831_v7 = vpop.eup %5830  ;;  %v3404_v12 = vpop.permute.xlu0 %3403 }
 0xf7e   : > { %5284 = vmatprep.mubr.msk.f32.mxu1 %vm717_vm1, %v3244_v30  ;;  %v3247_v23 = vmul.f32 %v5831_v7, %v7509_v60 }
 0xf7f   : > { %v5833_v18 = vpop.eup %5832  ;;  %5285 = vmatmul.mubr.msk.f32.gmra.mxu1 %vm717_vm1, %v3245_v15 }
 0xf80   : > { %5308 = vmatpush3.xpose.msk.msra.mxu1 %vm563_vm0, %v3420_v57  ;;  %v3246_v8 = vmul.f32 %v5833_v18, %v7513_v11  ;;  %v3410_v11 = vpop.permute.xlu1 %3409 }
 0xf81   : > { %v5835_v55 = vpop.eup %5834  ;;  %v3408_v61 = vpop.permute.xlu0 %3407 }
 0xf82   : > { %5287 = vmatprep.mubr.msk.f32.mxu1 %vm717_vm1, %v3246_v8  ;;  %v3249_v1 = vmul.f32 %v5835_v55, %v7517_v36 }
 0xf83   : > { %v5837_v14 = vpop.eup %5836  ;;  %5288 = vmatmul.mubr.msk.f32.gmra.mxu1 %vm717_vm1, %v3247_v23 }
 0xf84   : > { %v3248_v2 = vmul.f32 %v5837_v14, %v7521_v16  ;;  %v3414_v24 = vpop.permute.xlu1 %3413 }
 0xf85   : > { %v3412_v60 = vpop.permute.xlu0 %3411 }
 0xf86   : > { %5290 = vmatprep.mubr.msk.f32.mxu1 %vm717_vm1, %v3248_v2 }
 0xf87   : > { %5291 = vmatmul.mubr.msk.f32.gmra.mxu1 %vm717_vm1, %v3249_v1 }
 0xf88   : > { %5309 = vmatprep.mubr.msk.f32.mxu1 %vm563_vm0, %v3404_v12  ;;  %v3418_v36 = vpop.permute.xlu1 %3417 }
 0xf89   : > { %v3416_v16 = vpop.permute.xlu0 %3415 }
 0xf8b   : > { %5310 = vmatmul.mubr.msk.f32.vlgmr.msra.gmra.mxu1 %vm563_vm0, %v3406_v56 }
 0xf8c   : > { %5312 = vmatprep.mubr.msk.f32.mxu1 %vm563_vm0, %v3408_v61 }
 0xf8f   : > { %5313 = vmatmul.mubr.msk.f32.gmra.mxu1 %vm563_vm0, %v3410_v11 }
 0xf90   : > { %5315 = vmatprep.mubr.msk.f32.mxu1 %vm563_vm0, %v3412_v60 }
 0xf93   : > { %5316 = vmatmul.mubr.msk.f32.gmra.mxu1 %vm563_vm0, %v3414_v24 }
 0xf94   : > { %5318 = vmatprep.mubr.msk.f32.mxu1 %vm563_vm0, %v3416_v16 }
 0xf97   : > { %5319 = vmatmul.mubr.msk.f32.gmra.mxu1 %vm563_vm0, %v3418_v36 }
0x100a   : > { %v7589_v5 = vpop.f32.mrf.mxu1 }
0x100c   : > { %v7591_v42 = vpop.f32.mrf.mxu1 }
0x100d   : > { %v5509_v43 = vpack.i.bf16 %v7589_v5, %v7591_v42  ;;  %v8051_v5 = vld [vmem:[#allocation12_spill] sm:$0xff]  ;;  %v8054_v42 = vld [vmem:[#allocation37_spill] sm:$0xff] }
0x103f   : > { %v7595_v63 = vpop.f32.mrf.mxu1 }
0x1041   : > { %v7597_v45 = vpop.f32.mrf.mxu1 }
0x1042   : > { %v5539_v47 = vpack.i.bf16 %v7595_v63, %v7597_v45 }
0x1043   : > { %v7601_v9 = vpop.f32.mrf.mxu1 }
0x1045   : > { %v7603_v44 = vpop.f32.mrf.mxu1 }
0x1046   : > { %v5569_v46 = vpack.i.bf16 %v7601_v9, %v7603_v44 }
0x1047   : > { %v7607_v48 = vpop.f32.mrf.mxu1 }
0x1049   : > { %v7609_v49 = vpop.f32.mrf.mxu1 }
0x104a   : > { %v5604_v59 = vpack.i.bf16 %v7607_v48, %v7609_v49 }
0x104b   : > { %v5311_v4 = vpop.f32.mrf.mxu1 }
0x104c   : > { %v3575_v26 = vsel %vm717_vm1, %v5311_v4, -inf }
0x104d   : > { %3576 = vmax.xlane.f32.xlu1 %v3575_v26  ;;  %v3533_v50 = vpop.f32.mrf.mxu1 }
0x104e   : > { %v3572_v28 = vsel %vm717_vm1, %v3533_v50, -inf }
0x104f   : > { %3573 = vmax.xlane.f32.xlu0 %v3572_v28  ;;  %v5314_v3 = vpop.f32.mrf.mxu1 }
0x1050   : > { %v3581_v10 = vsel %vm717_vm1, %v5314_v3, -inf }
0x1051   : > { %v3543_v27 = vpop.f32.mrf.mxu1 }
0x1052   : > { %v3578_v7 = vsel %vm717_vm1, %v3543_v27, -inf }
0x1053   : > { %3582 = vmax.xlane.f32.xlu0 %v3581_v10  ;;  %v5317_v57 = vpop.f32.mrf.mxu1 }
0x1054   : > { %v3587_v30 = vsel %vm717_vm1, %v5317_v57, -inf }
0x1055   : > { %3588 = vmax.xlane.f32.xlu1 %v3587_v30  ;;  %v3553_v15 = vpop.f32.mrf.mxu1 }
0x1056   : > { %v3584_v12 = vsel %vm717_vm1, %v3553_v15, -inf }
0x1057   : > { %3579 = vmax.xlane.f32.xlu0 %v3578_v7  ;;  %v5320_v18 = vpop.f32.mrf.mxu1 }
0x1058   : > { %v3593_v8 = vsel %vm717_vm1, %v5320_v18, -inf }
0x1059   : > { %3594 = vmax.xlane.f32.xlu1 %v3593_v8  ;;  %v3563_v23 = vpop.f32.mrf.mxu1 }
0x105a   : > { %v3590_v55 = vsel %vm717_vm1, %v3563_v23, -inf }
0x105b   : > { %3585 = vmax.xlane.f32.xlu0 %v3584_v12 }
0x105f   : > { %3591 = vmax.xlane.f32.xlu0 %v3590_v55 }
0x106a   : > { %3672 = vrot.lane.b32.xlu1 %v6292_v33, %s6034_s30 }
0x106e   : > { %3670 = vrot.lane.b32.xlu1 %v6290_v32, %s6034_s30 }
0x1072   : > { %3668 = vrot.lane.b32.xlu1 %v6306_v37, %s6034_s30 }
0x1075   : > { %3674 = vrot.lane.b32.xlu0 %v6288_v29, %s6034_s30 }
0x1076   : > { %3664 = vrot.lane.b32.xlu1 %v6322_v39, %s6034_s30 }
0x1079   : > { %3666 = vrot.lane.b32.xlu0 %v6317_v38, %s6034_s30 }
0x10d6   : > { %v3577_v14 = vpop.xlane.xlu1 %3576 }
0x10d7   : > { %v3597_v56 = vsub.f32 %v5311_v4, %v3577_v14 }
0x10d8   : > { %v3574_v2 = vpop.xlane.xlu0 %3573 }
0x10d9   : > { %v3606_v1 = vmul.f32 1.442695, %v3597_v56  ;;  %v3596_v33 = vsub.f32 %v3533_v50, %v3574_v2 }
0x10db   : > { %5838 = vpow2.f32 %v3606_v1  ;;  %v3604_v61 = vmul.f32 1.442695, %v3596_v33 }
0x10dc   : > { %v3583_v32 = vpop.xlane.xlu0 %3582 }
0x10dd   : > { %5840 = vpow2.f32 %v3604_v61  ;;  %v3599_v11 = vsub.f32 %v5314_v3, %v3583_v32 }
0x10de   : > { %v3589_v37 = vpop.xlane.xlu1 %3588 }
0x10df   : > { %v3610_v60 = vmul.f32 1.442695, %v3599_v11  ;;  %v3601_v24 = vsub.f32 %v5317_v57, %v3589_v37 }
0x10e0   : > { %v3580_v29 = vpop.xlane.xlu0 %3579 }
0x10e1   : > { %5842 = vpow2.f32 %v3610_v60  ;;  %v3614_v16 = vmul.f32 1.442695, %v3601_v24  ;;  %v3598_v39 = vsub.f32 %v3543_v27, %v3580_v29 }
0x10e2   : > { %v3595_v36 = vpop.xlane.xlu1 %3594 }
0x10e3   : > { %5844 = vpow2.f32 %v3614_v16  ;;  %v3608_v38 = vmul.f32 1.442695, %v3598_v39  ;;  %v3603_v26 = vsub.f32 %v5320_v18, %v3595_v36  ;;  %v8034_v36 = vpack.i.bf16 %v6973_v58, %v6975_v25  ;;  %v8042_v25 = vld [vmem:[#allocation27_spill] sm:$0xff] }
0x10e4   : > { %v3586_v4 = vpop.xlane.xlu0 %3585  ;;  %v8038_v58 = vpack.i.bf16 %v7133_v17, %v7135_v51  ;;  %v8047_v51 = vld [vmem:[#allocation30_spill] sm:$0xff] }
0x10e5   : > { %5846 = vpow2.f32 %v3608_v38  ;;  %v3618_v28 = vmul.f32 1.442695, %v3603_v26  ;;  %v3600_v50 = vsub.f32 %v3553_v15, %v3586_v4  ;;  %v8035_v38 = vpack.i.bf16 %v7293_v62, %v7295_v13  ;;  %v8044_v13 = vld [vmem:[#allocation24_spill] sm:$0xff]  ;;  %v8056_v4 = vld [vmem:[#allocation34_spill] sm:$0xff] }
0x10e6   : > { %v3673_v10 = vpop.permute.xlu1 %3672  ;;  %v8036_v26 = vpack.i.bf16 %v7453_v22, %v7455_v6  ;;  %v8045_v22 = vld [vmem:[#allocation25_spill] sm:$0xff]  ;;  %v8048_v6 = vld [vmem:[#allocation31_spill] sm:$0xff] }
0x10e7   : > { %5848 = vpow2.f32 %v3618_v28  ;;  %v3612_v30 = vmul.f32 1.442695, %v3600_v50  ;;  %v8046_v17 = vpack.i.bf16 %v8044_v13, %v8045_v22  ;;  %v8057_v28 = vld [vmem:[#allocation35_spill] sm:$0xff]  ;;  %v4104_v13 = vld [vmem:[#allocation7 + $0x30] sm:$0xff]  ;;  %v4103_v22 = vld [vmem:[#allocation7 + $0x28] sm:$0xff] }
0x10e8   : > { %v7633_v7 = vpop.eup %5838  ;;  %v3592_v3 = vpop.xlane.xlu0 %3591  ;;  %v8058_v50 = vpack.i.bf16 %v8056_v4, %v8057_v28 }
0x10e9   : > { %5850 = vpow2.f32 %v3612_v30  ;;  %v3602_v57 = vsub.f32 %v3563_v23, %v3592_v3  ;;  %v3623_v8 = vsel %vm717_vm1, %v7633_v7, 0.0  ;;  %v8060_v30 = vpack.i.bf16 %v7459_v54, %v7461_v53  ;;  %v8061_v3 = vld [vmem:[#allocation22_spill] sm:$0xff]  ;;  %v8067_v53 = vld [vmem:[#allocation32_spill] sm:$0xff] }
0x10ea   : > { %v7637_v27 = vpop.eup %5840  ;;  %3624 = vadd.xlane.f32.xlu1 %v3623_v8  ;;  %v3671_v18 = vpop.permute.xlu1 %3670  ;;  %v8065_v8 = vld [vmem:[#allocation29_spill] sm:$0xff] }
0x10eb   : > { %v3616_v12 = vmul.f32 1.442695, %v3602_v57  ;;  %v3620_v55 = vsel %vm717_vm1, %v7637_v27, 0.0  ;;  %v8062_v57 = vld [vmem:[#allocation23_spill] sm:$0xff] }
0x10ec   : > { %3621 = vadd.xlane.f32.xlu0 %v3620_v55  ;;  %v3675_v15 = vpop.permute.xlu0 %3674 }
0x10ed   : > { %5852 = vpow2.f32 %v3616_v12  ;;  %5321 = vmatprep.subr.mxu0 %v3675_v15  ;;  %v8068_v12 = vld [vmem:[#allocation33_spill] sm:$0xff] }
0x10ee   : > { %v7641_v14 = vpop.eup %5842  ;;  %5322 = vmatpush3.msra.mxu0 %v3675_v15  ;;  %v3669_v2 = vpop.permute.xlu1 %3668  ;;  %v8069_v9 = vpack.i.bf16 %v8067_v53, %v8068_v12 }
0x10ef   : > { %5323 = vmatprep.subr.mxu0 %v3673_v10  ;;  %v3629_v23 = vsel %vm717_vm1, %v7641_v14, 0.0 }
0x10f0   : > { %v7645_v56 = vpop.eup %5844  ;;  %3630 = vadd.xlane.f32.xlu1 %v3629_v23  ;;  %5324 = vmatpush3.msra.mxu0 %v3673_v10  ;;  %v3667_v11 = vpop.permute.xlu0 %3666  ;;  %v8059_v10 = vpack.i.bf16 %v7465_v35, %v7467_v20  ;;  %v8063_v35 = vpack.i.bf16 %v8061_v3, %v8062_v57  ;;  %v8064_v20 = vld [vmem:[#allocation28_spill] sm:$0xff] }
0x10f1   : > { %5325 = vmatprep.subr.mxu0 %v3671_v18  ;;  %v3635_v33 = vsel %vm717_vm1, %v7645_v56, 0.0  ;;  %v8066_v54 = vpack.i.bf16 %v8064_v20, %v8065_v8  ;;  %v8073_v20 = vld [vmem:[#allocation38_spill] sm:$0xff]  ;;  %v8074_v8 = vld [vmem:[#allocation39_spill] sm:$0xff] }
0x10f2   : > { %v7647_v1 = vpop.eup %5846  ;;  %5326 = vmatpush3.msra.mxu0 %v3671_v18  ;;  %v3665_v60 = vpop.permute.xlu1 %3664 }
0x10f3   : > { %5327 = vmatprep.subr.mxu0 %v3669_v2  ;;  %v3626_v61 = vsel %vm717_vm1, %v7647_v1, 0.0 }
0x10f4   : > { %v7653_v32 = vpop.eup %5848  ;;  %3636 = vadd.xlane.f32.xlu1 %v3635_v33  ;;  %3627 = vadd.xlane.f32.xlu0 %v3626_v61 }
0x10f5   : > { %5328 = vmatpush3.msra.mxu0 %v3669_v2  ;;  %v3641_v24 = vsel %vm717_vm1, %v7653_v32, 0.0 }
0x10f6   : > { %v7655_v37 = vpop.eup %5850  ;;  %5329 = vmatprep.subr.mxu0 %v3667_v11 }
0x10f7   : > { %5330 = vmatpush3.msra.mxu0 %v3667_v11  ;;  %v3632_v29 = vsel %vm717_vm1, %v7655_v37, 0.0 }
0x10f8   : > { %5331 = vmatprep.subr.mxu0 %v3665_v60  ;;  %3642 = vadd.xlane.f32.xlu1 %v3641_v24 }
0x10f9   : > { %3633 = vadd.xlane.f32.xlu0 %v3632_v29  ;;  %5332 = vmatpush3.msra.mxu0 %v3665_v60 }
0x10fa   : > { %v7661_v16 = vpop.eup %5852 }
0x10fb   : > { %v3638_v39 = vsel %vm717_vm1, %v7661_v16, 0.0 }
0x10fd   : > { %3639 = vadd.xlane.f32.xlu0 %v3638_v39 }
0x1109   : > { %3660 = vrot.lane.b32.xlu1 %v6336_v41, %s6034_s30  ;;  %v8037_v41 = vpack.i.bf16 %v6949_v52, %v6951_v31  ;;  %v8040_v52 = vpack.i.bf16 %v6955_v19, %v6957_v0  ;;  %v8041_v31 = vld [vmem:[#allocation26_spill] sm:$0xff]  ;;  %v8053_v0 = vld [vmem:[#allocation36_spill] sm:$0xff] }
0x110a   : > { %v8043_v62 = vpack.i.bf16 %v8041_v31, %v8042_v25  ;;  %v4110_v31 = vld [vmem:[#allocation7 + $0x60] sm:$0xff]  ;;  %v4107_v25 = vld [vmem:[#allocation7 + $0x48] sm:$0xff] }
0x110d   : > { %5480 = vrot.lane.b32.xlu1 %v8034_v36, %s6033_s9 }
0x1111   : > { %5490 = vrot.lane.b32.xlu1 %v8035_v38, %s6031_s16 }
0x1113   : > { %3662 = vrot.lane.b32.xlu0 %v6330_v40, %s6034_s30  ;;  %v8039_v40 = vpack.i.bf16 %v6961_v34, %v6963_v21  ;;  %v8049_v34 = vpack.i.bf16 %v8047_v51, %v8048_v6  ;;  %v8050_v21 = vld [vmem:[#allocation13_spill] sm:$0xff]  ;;  %v4101_v51 = vld [vmem:[#allocation7 + $0x18] sm:$0xff]  ;;  %v4100_v6 = vld [vmem:[#allocation7 + $0x10] sm:$0xff] }
0x1114   : > { %v8052_v19 = vpack.i.bf16 %v8050_v21, %v8051_v5  ;;  %v4098_v21 = vld [vmem:[#allocation7] sm:$0xff] }
0x1115   : > { %5500 = vrot.lane.b32.xlu1 %v8036_v26, %s6030_s12 }
0x1117   : > { %5475 = vrot.lane.b32.xlu0 %v8037_v41, %s6034_s30 }
0x1119   : > { %5510 = vrot.lane.b32.xlu1 %v5509_v43, %s6029_s10  ;;  %v8055_v43 = vpack.i.bf16 %v8053_v0, %v8054_v42 }
0x111b   : > { %5485 = vrot.lane.b32.xlu0 %v8038_v58, %s6032_s8 }
0x111d   : > { %5525 = vrot.lane.b32.xlu1 %v8039_v40, %s6034_s30 }
0x111f   : > { %5495 = vrot.lane.b32.xlu0 %v8040_v52, %s6034_s30  ;;  %v4111_v52 = vld [vmem:[#allocation7 + $0x68] sm:$0xff] }
0x1121   : > { %5535 = vrot.lane.b32.xlu1 %v8043_v62, %s6033_s9  ;;  %v4105_v62 = vld [vmem:[#allocation7 + $0x38] sm:$0xff] }
0x1123   : > { %5505 = vrot.lane.b32.xlu0 %v8046_v17, %s6033_s9  ;;  %v4102_v17 = vld [vmem:[#allocation7 + $0x20] sm:$0xff] }
0x1125   : > { %5545 = vrot.lane.b32.xlu1 %v8049_v34, %s6032_s8  ;;  %v4099_v34 = vld [vmem:[#allocation7 + $0x8] sm:$0xff] }
0x1127   : > { %5515 = vrot.lane.b32.xlu0 %v8052_v19, %s6032_s8 }
0x1129   : > { %5550 = vrot.lane.b32.xlu1 %v8055_v43, %s6031_s16 }
0x112b   : > { %5520 = vrot.lane.b32.xlu0 %v8058_v50, %s6031_s16  ;;  %v8070_v50 = vld [vmem:[#allocation40_spill] sm:$0xff] }
0x112d   : > { %5560 = vrot.lane.b32.xlu1 %v8059_v10, %s6030_s12  ;;  %v8071_v10 = vld [vmem:[#allocation41_spill] sm:$0xff] }
0x112f   : > { %5530 = vrot.lane.b32.xlu0 %v8060_v30, %s6030_s12  ;;  %v8072_v30 = vpack.i.bf16 %v8070_v50, %v8071_v10 }
0x1131   : > { %5570 = vrot.lane.b32.xlu1 %v5569_v46, %s6029_s10 }
0x1133   : > { %5540 = vrot.lane.b32.xlu0 %v5539_v47, %s6029_s10 }
0x1137   : > { %5555 = vrot.lane.b32.xlu0 %v8063_v35, %s6034_s30 }
0x113b   : > { %5565 = vrot.lane.b32.xlu0 %v8066_v54, %s6033_s9  ;;  %v8075_v54 = vpack.i.bf16 %v8073_v20, %v8074_v8  ;;  %v8080_v8 = vld [vmem:[#allocation19_spill] sm:$0xff] }
0x113f   : > { %5575 = vrot.lane.b32.xlu0 %v8069_v9, %s6032_s8 }
0x1173   : > { %v3625_v46 = vpop.xlane.xlu1 %3624 }
0x1175   : > { %v3622_v44 = vpop.xlane.xlu0 %3621 }
0x1176   : > { %5854 = vrcp.f32 %v3622_v44 }
0x1177   : > { %5856 = vrcp.f32 %v3625_v46 }
0x1179   : > { %v3631_v63 = vpop.xlane.xlu1 %3630 }
0x117d   : > { %v3628_v45 = vpop.xlane.xlu0 %3627  ;;  %v3637_v47 = vpop.xlane.xlu1 %3636 }
0x117e   : > { %5858 = vrcp.f32 %v3628_v45 }
0x117f   : > { %5860 = vrcp.f32 %v3631_v63 }
0x1181   : > { %v3643_v23 = vpop.xlane.xlu1 %3642 }
0x1182   : > { %v3634_v18 = vpop.xlane.xlu0 %3633 }
0x1183   : > { %v5855_v55 = vpop.eup %5854  ;;  %5862 = vrcp.f32 %v3634_v18 }
0x1184   : > { %v3652_v15 = vmul.f32 %v5855_v55, %v7637_v27  ;;  %5864 = vrcp.f32 %v3637_v47  ;;  %v5857_v33 = vpop.eup %5856 }
0x1185   : > { %v3661_v60 = vpop.permute.xlu1 %3660  ;;  %v3653_v24 = vmul.f32 %v5857_v33, %v7633_v7 }
0x1186   : > { %v3640_v2 = vpop.xlane.xlu0 %3639  ;;  %5337 = vmatprep.mubr.msk.f32.mxu0 %vm717_vm1, %v3652_v15 }
0x1187   : > { %5866 = vrcp.f32 %v3640_v2 }
0x1188   : > { %5868 = vrcp.f32 %v3643_v23 }
0x1189   : > { %v5481_v44 = vpop.permute.xlu1 %5480 }
0x118a   : > { %v3663_v61 = vpop.permute.xlu0 %3662 }
0x118b   : > { %5333 = vmatprep.subr.mxu0 %v3663_v61  ;;  %v5859_v11 = vpop.eup %5858 }
0x118c   : > { %5334 = vmatpush3.msra.mxu0 %v3663_v61  ;;  %v3654_v29 = vmul.f32 %v5859_v11, %v7647_v1  ;;  %v5861_v39 = vpop.eup %5860  ;;  %v8076_v11 = vld [vmem:[#allocation14_spill] sm:$0xff] }
0x118d   : > { %5335 = vmatprep.subr.mxu0 %v3661_v60  ;;  %v3655_v36 = vmul.f32 %v5861_v39, %v7641_v14  ;;  %v4113_v14 = vld [vmem:[#allocation7 + $0x78] sm:$0xff]  ;;  %v5491_v63 = vpop.permute.xlu1 %5490 }
0x118e   : > { %5336 = vmatpush3.msra.mxu0 %v3661_v60  ;;  %v5476_v9 = vpop.permute.xlu0 %5475 }
0x118f   : > { %5338 = vmatmul.mubr.msk.f32.vlgmr.msra.gmra.mxu0 %vm717_vm1, %v3653_v24  ;;  %5349 = vmatprep.subr.mxu0 %v4113_v14  ;;  %v5478_v49 = vunpack.i.h.bf16 %v5476_v9  ;;  %v8077_v24 = vld [vmem:[#allocation15_spill] sm:$0xff] }
0x1190   : > { %v5863_v27 = vpop.eup %5862  ;;  %5340 = vmatprep.mubr.msk.f32.mxu0 %vm717_vm1, %v3654_v29  ;;  %5350 = vmatpush3.msra.mxu0 %v4113_v14  ;;  %v5493_v14 = vunpack.i.h.bf16 %v5491_v63 }
0x1191   : > { %v3656_v38 = vmul.f32 %v5863_v27, %v7655_v37  ;;  %v5865_v26 = vpop.eup %5864  ;;  %v4112_v37 = vld [vmem:[#allocation7 + $0x70] sm:$0xff]  ;;  %v5501_v47 = vpop.permute.xlu1 %5500  ;;  %v4038_v60 = vsel %vm563_vm0, %v8076_v11, %v5478_v49 }
0x1192   : > { %v3657_v7 = vmul.f32 %v5865_v26, %v7645_v56  ;;  %5351 = vmatprep.subr.mxu0 %v4112_v37  ;;  %v4109_v56 = vld [vmem:[#allocation7 + $0x58] sm:$0xff]  ;;  %v5486_v46 = vpop.permute.xlu0 %5485 }
0x1193   : > { %5341 = vmatmul.mubr.msk.f32.gmra.mxu0 %vm717_vm1, %v3655_v36  ;;  %v5488_v39 = vunpack.i.h.bf16 %v5486_v46  ;;  %v5487_v27 = vunpack.i.l.bf16 %v5486_v46  ;;  %v5483_v36 = vunpack.i.h.bf16 %v5481_v44  ;;  %v8081_v46 = vld [vmem:[#allocation18_spill] sm:$0xff] }
0x1194   : > { %v5867_v41 = vpop.eup %5866  ;;  %5343 = vmatprep.mubr.msk.f32.mxu0 %vm717_vm1, %v3656_v38  ;;  %5352 = vmatpush3.msra.mxu0 %v4112_v37  ;;  %v5482_v38 = vunpack.i.l.bf16 %v5481_v44  ;;  %v5492_v37 = vunpack.i.l.bf16 %v5491_v63 }
0x1195   : > { %v3658_v1 = vmul.f32 %v5867_v41, %v7661_v16  ;;  %v5869_v58 = vpop.eup %5868  ;;  %5353 = vmatprep.subr.mxu0 %v4111_v52  ;;  %v4108_v16 = vld [vmem:[#allocation7 + $0x50] sm:$0xff]  ;;  %v5511_v55 = vpop.permute.xlu1 %5510 }
0x1196   : > { %v3659_v40 = vmul.f32 %v5869_v58, %v7653_v32  ;;  %5354 = vmatpush3.msra.mxu0 %v4111_v52  ;;  %v4106_v32 = vld [vmem:[#allocation7 + $0x40] sm:$0xff]  ;;  %v5496_v45 = vpop.permute.xlu0 %5495 }
0x1197   : > { %5344 = vmatmul.mubr.msk.f32.gmra.mxu0 %vm717_vm1, %v3657_v7  ;;  %5355 = vmatprep.subr.mxu0 %v4110_v31  ;;  %v4047_v7 = vsel %vm4045_vm2, %v4038_v60, %v5483_v36 }
0x1198   : > { %5346 = vmatprep.mubr.msk.f32.mxu0 %vm717_vm1, %v3658_v1  ;;  %5356 = vmatpush3.msra.mxu0 %v4110_v31 }
0x1199   : > { %5357 = vmatprep.subr.mxu0 %v4109_v56  ;;  %v5526_v23 = vpop.permute.xlu1 %5525 }
0x119a   : > { %5358 = vmatpush3.msra.mxu0 %v4109_v56  ;;  %v7785_v18 = vpop.permute.xlu0 %5505 }
0x119b   : > { %5347 = vmatmul.mubr.msk.f32.gmra.mxu0 %vm717_vm1, %v3659_v40  ;;  %5359 = vmatprep.subr.mxu0 %v4108_v16  ;;  %v4056_v40 = vsel %vm4054_vm3, %v4047_v7, %v5488_v39 }
0x119c   : > { %5360 = vmatpush3.msra.mxu0 %v4108_v16  ;;  %v4064_v52 = vsel %vm717_vm1, %v4056_v40, %v5493_v14  ;;  %v5503_v16 = vunpack.i.h.bf16 %v5501_v47 }
0x119d   : > { %5361 = vmatprep.subr.mxu0 %v4107_v25  ;;  %v7791_v33 = vpop.permute.xlu1 %5535 }
0x119e   : > { %5362 = vmatpush3.msra.mxu0 %v4107_v25  ;;  %v7787_v15 = vpop.permute.xlu0 %5515  ;;  %v5502_v25 = vunpack.i.l.bf16 %v5501_v47 }
0x119f   : > { %5363 = vmatprep.subr.mxu0 %v4106_v32 }
0x11a0   : > { %5364 = vmatpush3.msra.mxu0 %v4106_v32  ;;  %v5513_v32 = vunpack.i.h.bf16 %v5511_v55 }
0x11a1   : > { %5365 = vmatprep.subr.mxu0 %v4105_v62  ;;  %v7795_v61 = vpop.permute.xlu1 %5545 }
0x11a2   : > { %5366 = vmatpush3.msra.mxu0 %v4105_v62  ;;  %v7789_v2 = vpop.permute.xlu0 %5520  ;;  %v5512_v62 = vunpack.i.l.bf16 %v5511_v55  ;;  %v5547_v20 = vunpack.i.l.bf16 %v7795_v61 }
0x11a3   : > { %5367 = vmatprep.subr.mxu0 %v4104_v13 }
0x11a4   : > { %5368 = vmatpush3.msra.mxu0 %v4104_v13  ;;  %v5498_v13 = vunpack.i.h.bf16 %v5496_v45 }
0x11a5   : > { %5369 = vmatprep.subr.mxu0 %v4103_v22  ;;  %v7805_v1 = vpop.permute.xlu1 %5550 }
0x11a6   : > { %5370 = vmatpush3.msra.mxu0 %v4103_v22  ;;  %v7793_v48 = vpop.permute.xlu0 %5530  ;;  %v5497_v22 = vunpack.i.l.bf16 %v5496_v45  ;;  %v5553_v55 = vunpack.i.h.bf16 %v7805_v1 }
0x11a7   : > { %5371 = vmatprep.subr.mxu0 %v4102_v17 }
0x11a8   : > { %5372 = vmatpush3.msra.mxu0 %v4102_v17 }
0x11a9   : > { %5373 = vmatprep.subr.mxu0 %v4101_v51  ;;  %v7813_v17 = vpop.permute.xlu1 %5560 }
0x11aa   : > { %5374 = vmatpush3.msra.mxu0 %v4101_v51  ;;  %v7801_v26 = vpop.permute.xlu0 %5540  ;;  %v4073_v51 = vsel %vm4071_vm4, %v4064_v52, %v5503_v16 }
0x11ab   : > { %5375 = vmatprep.subr.mxu0 %v4100_v6 }
0x11ac   : > { %5376 = vmatpush3.msra.mxu0 %v4100_v6 }
0x11ad   : > { %5377 = vmatprep.subr.mxu0 %v4099_v34  ;;  %v7837_v44 = vpop.permute.xlu1 %5570 }
0x11ae   : > { %5378 = vmatpush3.msra.mxu0 %v4099_v34  ;;  %v7810_v31 = vpop.permute.xlu0 %5555  ;;  %v5527_v34 = vunpack.i.l.bf16 %v5526_v23 }
0x11af   : > { %5379 = vmatprep.subr.mxu0 %v4098_v21  ;;  %v5558_v40 = vunpack.i.h.bf16 %v7810_v31  ;;  %v5557_v14 = vunpack.i.l.bf16 %v7810_v31 }
0x11b0   : > { %5380 = vmatpush3.msra.mxu0 %v4098_v21  ;;  %v5528_v21 = vunpack.i.h.bf16 %v5526_v23  ;;  %v5533_v23 = vunpack.i.h.bf16 %v7793_v48 }
0x11b2   : > { %v7825_v10 = vpop.permute.xlu0 %5565  ;;  %v4042_v63 = vsel %vm563_vm0, %v8081_v46, %v5528_v21 }
0x11b3   : > { %v5568_v16 = vunpack.i.h.bf16 %v7825_v10 }
0x124f   : > { %v5339_v5 = vpop.f32.mrf.mxu0 }
0x1251   : > { %v3774_v19 = vpop.f32.mrf.mxu0 }
0x1252   : > { %v5579_v0 = vpack.i.bf16 %v5339_v5, %v3774_v19  ;;  %v5508_v5 = vunpack.i.h.bf16 %v7785_v18  ;;  %v5507_v19 = vunpack.i.l.bf16 %v7785_v18 }
0x1253   : > { %v5342_v42 = vpop.f32.mrf.mxu0 }
0x1254   : > { %5580 = vrot.lane.b32.xlu1 %v5579_v0, %s6028_s14  ;;  %v5537_v0 = vunpack.i.l.bf16 %v7791_v33 }
0x1255   : > { %v3784_v43 = vpop.f32.mrf.mxu0 }
0x1256   : > { %v5584_v4 = vpack.i.bf16 %v5342_v42, %v3784_v43  ;;  %v4082_v42 = vsel %vm4080_vm5, %v4073_v51, %v5513_v32  ;;  %v8078_v43 = vld [vmem:[#allocation16_spill] sm:$0xff] }
0x1257   : > { %v5345_v28 = vpop.f32.mrf.mxu0 }
0x1258   : > { %5595 = vrot.lane.b32.xlu1 %v8072_v30, %s6030_s12  ;;  %5585 = vrot.lane.b32.xlu0 %v5584_v4, %s6028_s14  ;;  %v4040_v4 = vsel %vm563_vm0, %v8078_v43, %v5498_v13  ;;  %s5954_s12 = sshll.u32 %s6035_s22, 4  ;;  %s5955_s12 = int_to_ptr.vmem [resolvable:$false] %s5954_s12 }
0x1259   : > { %v3794_v3 = vpop.f32.mrf.mxu0  ;;  %v4049_v47 = vsel %vm4045_vm2, %v4040_v4, %v5508_v5  ;;  %v8082_v5 = vld [vmem:[#allocation20_spill] sm:$0xff]  ;;  %p5957_p6 = scmp.lt.s32.totalorder %s7903_s7, %s5955_s12 }
0x125a   : > { %v5599_v57 = vpack.i.bf16 %v5345_v28, %v3794_v3  ;;  %v8079_v28 = vld [vmem:[#allocation17_spill] sm:$0xff]  ;;  %v5538_v3 = vunpack.i.h.bf16 %v7791_v33  ;;  %v5532_v33 = vunpack.i.l.bf16 %v7793_v48  ;;  %v5542_v48 = vunpack.i.l.bf16 %v7801_v26 }
0x125b   : > { %v5348_v35 = vpop.f32.mrf.mxu0  ;;  %v4039_v50 = vsel %vm563_vm0, %v8079_v28, %v5497_v22 }
0x125c   : > { %5590 = vrot.lane.b32.xlu0 %v8075_v54, %s6031_s16  ;;  %5600 = vrot.lane.b32.xlu1 %v5599_v57, %s6028_s14  ;;  %v5518_v57 = vunpack.i.h.bf16 %v7787_v15  ;;  %v4041_v54 = vsel %vm563_vm0, %v8080_v8, %v5527_v34  ;;  %v4048_v45 = vsel %vm4045_vm2, %v4039_v50, %v5507_v19  ;;  %v5572_v34 = vunpack.i.l.bf16 %v7837_v44  ;;  %s5956_s16 = scalar_lea.vmem %s5955_s12, 2048 }
0x125d   : > { %v3804_v53 = vpop.f32.mrf.mxu0  ;;  %v4050_v18 = vsel %vm4045_vm2, %v4041_v54, %v5537_v0  ;;  %v4044_v19 = vsel %vm563_vm0, %v8082_v5, %v5558_v40  ;;  %v8083_v0 = vld [vmem:[#allocation21_spill] sm:$0xff] }
0x125e   : > { %v5609_v12 = vpack.i.bf16 %v5348_v35, %v3804_v53  ;;  %v5517_v35 = vunpack.i.l.bf16 %v7787_v15  ;;  %v5548_v53 = vunpack.i.h.bf16 %v7795_v61  ;;  %v5552_v15 = vunpack.i.l.bf16 %v7805_v1 }
0x125f   : > { %v4059_v61 = vsel %vm4054_vm3, %v4050_v18, %v5547_v20  ;;  %v4053_v50 = vsel %vm4045_vm2, %v4044_v19, %v5568_v16 }
0x1260   : > { %5605 = vrot.lane.b32.xlu0 %v5604_v59, %s6029_s10  ;;  %5610 = vrot.lane.b32.xlu1 %v5609_v12, %s6028_s14  ;;  %v5477_v59 = vunpack.i.l.bf16 %v5476_v9  ;;  %v5523_v12 = vunpack.i.h.bf16 %v7789_v2  ;;  %v5522_v9 = vunpack.i.l.bf16 %v7789_v2  ;;  %v4051_v2 = vsel %vm4045_vm2, %v4042_v63, %v5538_v3  ;;  %s4235_s14 = scalar_lea.sflag [#allocation4], %s6201_s6  ;;  %s5950_s10 = scalar_lea.vmem %s7903_s7, 1024 }
0x1261   : > { %v4057_v49 = vsel %vm4054_vm3, %v4048_v45, %v5517_v35  ;;  %v4060_v11 = vsel %vm4054_vm3, %v4051_v2, %v5548_v53  ;;  %p5951_p11 = scmp.ne.s32.totalorder %s7903_s7, %s5950_s10  ;;  %p5958_p12 = scmp.lt.s32.totalorder %s5956_s16, %s5950_s10 }
0x1262   : > { %v4037_v29 = vsel %vm563_vm0, %v8077_v24, %v5477_v59  ;;  %v4058_v59 = vsel %vm4054_vm3, %v4049_v47, %v5518_v57  ;;  %v4065_v60 = vsel %vm717_vm1, %v4057_v49, %v5522_v9  ;;  %v4068_v7 = vsel %vm717_vm1, %v4060_v11, %v5553_v55 }
0x1263   : > { %v4046_v41 = vsel %vm4045_vm2, %v4037_v29, %v5482_v38  ;;  %v4066_v24 = vsel %vm717_vm1, %v4058_v59, %v5523_v12  ;;  %v5576_v29 = vpop.permute.xlu0 %5575  ;;  %v4074_v1 = vsel %vm4071_vm4, %v4065_v60, %v5532_v33  ;;  %p5952_p1 = pnand %p5951_p11, %p8084_p10  ;;  %p5959_p3 = por %p5958_p12, %p5957_p6 }
0x1264   : > { %v4055_v58 = vsel %vm4054_vm3, %v4046_v41, %v5487_v27  ;;  %v5543_v27 = vunpack.i.h.bf16 %v7801_v26  ;;  %v4067_v41 = vsel %vm717_vm1, %v4059_v61, %v5552_v15  ;;  %v5563_v26 = vunpack.i.h.bf16 %v7813_v17 }
0x1265   : > { %v4063_v56 = vsel %vm717_vm1, %v4055_v58, %v5492_v37  ;;  %v4075_v58 = vsel %vm4071_vm4, %v4066_v24, %v5533_v23  ;;  %v4083_v31 = vsel %vm4080_vm5, %v4074_v1, %v5542_v48  ;;  %v5578_v21 = vunpack.i.h.bf16 %v5576_v29  ;;  %p5953_p2 = pneg %p5952_p1 }
0x1266   : > { %v4072_v6 = vsel %vm4071_vm4, %v4063_v56, %v5502_v25  ;;  %v5562_v56 = vunpack.i.l.bf16 %v7813_v17  ;;  %v5567_v25 = vunpack.i.l.bf16 %v7825_v10  ;;  %v4084_v51 = vsel %vm4080_vm5, %v4075_v58, %v5543_v27  ;;  %v4545_v27 = vld [vmem:[%s7955_s4] ss:$0 sm:$0xff] }
0x1267   : > { %v4081_v30 = vsel %vm4080_vm5, %v4072_v6, %v5512_v62  ;;  %v5573_v6 = vunpack.i.h.bf16 %v7837_v44  ;;  %v5577_v17 = vunpack.i.l.bf16 %v5576_v29  ;;  %v4077_v57 = vsel %vm4071_vm4, %v4068_v7, %v5563_v26  ;;  %p5960_p9 = pnand %p5959_p3, %p5953_p2 }
0x1268   : > { %v4076_v3 = vsel %vm4071_vm4, %v4067_v41, %v5562_v56  ;;  %v4062_v12 = vsel %vm4054_vm3, %v4053_v50, %v5578_v21 }
0x1269   : > { %v4085_v9 = vsel %vm4080_vm5, %v4076_v3, %v5572_v34  ;;  %v4086_v44 = vsel %vm4080_vm5, %v4077_v57, %v5573_v6 }
0x12c6   : > { %v5581_v39 = vpop.permute.xlu1 %5580 }
0x12c7   : > { %v5583_v36 = vunpack.i.h.bf16 %v5581_v39  ;;  %v5582_v38 = vunpack.i.l.bf16 %v5581_v39 }
0x12c9   : > { %v4090_v37 = vsel %vm4089_vm6, %v4081_v30, %v5582_v38  ;;  %v4091_v52 = vsel %vm4089_vm6, %v4082_v42, %v5583_v36  ;;  %v4043_v42 = vsel %vm563_vm0, %v8083_v0, %v5557_v14 }
0x12ca   : > { %v5596_v32 = vpop.permute.xlu1 %5595  ;;  %v5586_v62 = vpop.permute.xlu0 %5585  ;;  %5381 = vmatprep.mubr.f32.mxu0 %v4090_v37  ;;  %v4052_v28 = vsel %vm4045_vm2, %v4043_v42, %v5567_v25 }
0x12cb   : > { %v5588_v13 = vunpack.i.h.bf16 %v5586_v62  ;;  %v5587_v22 = vunpack.i.l.bf16 %v5586_v62  ;;  %5382 = vmatmul.mubr.f32.vlgmr.msra.gmra.mxu0 %v4091_v52  ;;  %v4061_v53 = vsel %vm4054_vm3, %v4052_v28, %v5577_v17  ;;  %v5598_v18 = vunpack.i.h.bf16 %v5596_v32 }
0x12cc   : > { %v5597_v55 = vunpack.i.l.bf16 %v5596_v32 }
0x12cd   : > { %v4092_v43 = vsel %vm4089_vm6, %v4083_v31, %v5587_v22  ;;  %v4093_v4 = vsel %vm4089_vm6, %v4084_v51, %v5588_v13 }
0x12ce   : > { %v5601_v10 = vpop.permute.xlu1 %5600  ;;  %v5591_v30 = vpop.permute.xlu0 %5590  ;;  %5384 = vmatprep.mubr.f32.mxu0 %v4092_v43 }
0x12cf   : > { %v5603_v35 = vunpack.i.h.bf16 %v5601_v10  ;;  %v5602_v20 = vunpack.i.l.bf16 %v5601_v10  ;;  %v5593_v8 = vunpack.i.h.bf16 %v5591_v30  ;;  %v5592_v54 = vunpack.i.l.bf16 %v5591_v30  ;;  %5385 = vmatmul.mubr.f32.gmra.mxu0 %v4093_v4 }
0x12d1   : > { %v4069_v46 = vsel %vm717_vm1, %v4061_v53, %v5592_v54  ;;  %v4070_v63 = vsel %vm717_vm1, %v4062_v12, %v5593_v8  ;;  %v4094_v45 = vsel %vm4089_vm6, %v4085_v9, %v5602_v20  ;;  %v4095_v47 = vsel %vm4089_vm6, %v4086_v44, %v5603_v35 }
0x12d2   : > { %v5611_v15 = vpop.permute.xlu1 %5610  ;;  %v5606_v23 = vpop.permute.xlu0 %5605  ;;  %5387 = vmatprep.mubr.f32.mxu0 %v4094_v45  ;;  %v4078_v61 = vsel %vm4071_vm4, %v4069_v46, %v5597_v55  ;;  %v4079_v11 = vsel %vm4071_vm4, %v4070_v63, %v5598_v18 }
0x12d3   : > { %v5613_v33 = vunpack.i.h.bf16 %v5611_v15  ;;  %v5612_v2 = vunpack.i.l.bf16 %v5611_v15  ;;  %v5608_v49 = vunpack.i.h.bf16 %v5606_v23  ;;  %v5607_v59 = vunpack.i.l.bf16 %v5606_v23  ;;  %5388 = vmatmul.mubr.f32.gmra.mxu0 %v4095_v47 }
0x12d5   : > { %v4087_v60 = vsel %vm4080_vm5, %v4078_v61, %v5607_v59  ;;  %v4088_v24 = vsel %vm4080_vm5, %v4079_v11, %v5608_v49 }
0x12d6   : > { %v4096_v29 = vsel %vm4089_vm6, %v4087_v60, %v5612_v2  ;;  %v4097_v39 = vsel %vm4089_vm6, %v4088_v24, %v5613_v33 }
0x12d7   : > { %5390 = vmatprep.mubr.f32.mxu0 %v4096_v29 }
0x12d8   : > { %5391 = vmatmul.mubr.f32.gmra.mxu0 %v4097_v39 }
0x138b   : > { %v5383_v48 = vpop.f32.mrf.mxu0 }
0x138c   : > { %v4193_v36 = vadd.f32 %v5383_v48, %v4545_v27 }
0x138d   : > { %v4187_v38 = vpop.f32.mrf.mxu0 }
0x138e   : > { %4227 = vst [vmem:[%s271_s23 + $0x8] sm:$0xff] %v4193_v36  ;;  %v4188_v41 = vadd.f32 %v4545_v27, %v4187_v38 }
0x138f   : > { %v5386_v7 = vpop.f32.mrf.mxu0 }
0x1390   : > { %4226 = vst [vmem:[%s271_s23] sm:$0xff] %v4188_v41  ;;  %v4203_v1 = vadd.f32 %v5386_v7, %v4545_v27 }
0x1391   : > { %v4197_v58 = vpop.f32.mrf.mxu0 }
0x1392   : > { %4229 = vst [vmem:[%s271_s23 + $0x18] sm:$0xff] %v4203_v1  ;;  %v4198_v40 = vadd.f32 %v4545_v27, %v4197_v58 }
0x1393   : > { %v5389_v14 = vpop.f32.mrf.mxu0 }
0x1394   : > { %4228 = vst [vmem:[%s271_s23 + $0x10] sm:$0xff] %v4198_v40  ;;  %v4213_v37 = vadd.f32 %v5389_v14, %v4545_v27 }
0x1395   : > { %v4207_v52 = vpop.f32.mrf.mxu0 }
0x1396   : > { %4231 = vst [vmem:[%s271_s23 + $0x28] sm:$0xff] %v4213_v37  ;;  %v4208_v26 = vadd.f32 %v4545_v27, %v4207_v52 }
0x1398   : > { %4230 = vst [vmem:[%s271_s23 + $0x20] sm:$0xff] %v4208_v26  ;;  %v5392_v56 = vpop.f32.mrf.mxu0 }
0x1399   : > { %v4223_v16 = vadd.f32 %v5392_v56, %v4545_v27 }
0x139a   : > { %v4217_v25 = vpop.f32.mrf.mxu0 }
0x139b   : > { %4233 = vst [vmem:[%s271_s23 + $0x38] sm:$0xff] %v4223_v16  ;;  %v4218_v32 = vadd.f32 %v4545_v27, %v4217_v25 }
0x139d   : > { %4232 = vst [vmem:[%s271_s23 + $0x30] sm:$0xff] %v4218_v32 }
0x139e   : > { %5963 = shalt.err (!%p5960_p9)
}
0x139f   : > { %s5964_s8 = scalar_lea.hbm %s7908_s26, 1024  ;;  %s5968_s11 = scalar_lea.hbm %s7956_s5, 2048 }
0x13a0   : > { %p5965_p13 = scmp.ne.s32.totalorder %s7908_s26, %s5964_s8  ;;  %p5969_p4 = scmp.lt.s32.totalorder %s7908_s26, %s7956_s5 }
0x13a1   : > { %p5970_p8 = scmp.lt.s32.totalorder %s5968_s11, %s5964_s8 }
0x13a2   : > { %p5966_p5 = pnand %p5965_p13, %p8084_p10 }
0x13a3   : > { %p5971_p7 = por %p5970_p8, %p5969_p4 }
0x13a4   : > { %p5967_p0 = pneg %p5966_p5 }
0x13a6   : > { %p5972_p11 = pnand %p5971_p7, %p5967_p0 }
0x13a8   : > { %5975 = shalt.err (!%p5972_p11)
}
0x13a9   : > { %s6036_s15 = smov 128   ;;  %s6037_s13 = smov 8  }
0x13aa   : > { %5403 = dma.vmem_to_hbm [thread:$0]  (%p8084_p10), %s7903_s7, 1024, %s7908_s26, %s4235_s14, %s6036_s15, %s6036_s15, %s6037_s13  }
0x13ab PF: > { %s4263_s24 = sand.u32 1, %s6006_s18   ;;  %p8085_p1 = scmp.ne.s32.totalorder %s7989_s25, 0 }
0x13ac   : > { %p8086_p2 = scmp.ge.s32.totalorder %s6018_s21, 2  ;;  %s4264_s10 = scalar_lea.sflag [#allocation4], %s4263_s24 }
0x13ae   : > { %p5417_p6 = pnand %p8086_p2, %p8085_p1 }
0x13b0   : > { %p5418_p12 = pneg %p5417_p6 }
0x13b2   : > { %6001 = dma.done.wait (%p5418_p12), %s4264_s10, 1024  }
0x13b3   : > { %6003 = vsyncadd (%p5418_p12), %s4264_s10, 4294966272  ;;  %p19_p3 = scmp.ge.s32.totalorder %s6143_s17, 4   ;;  %s8087_s18 = smov %s6010_s19 }
0x13b4   : > { %s8088_s19 = smov %s6014_s20  ;;  %s8089_s20 = smov %s6152_s28 }
0x13b5   : > { %s8090_s21 = smov %s6143_s17  ;;  %21 = sbr.rel (!%p19_p3) target bundleno = 6 (0x6), region = 93 }
0x13ba   :  { %4269 = vsyncpa [#allocation3], 1 }
0x13bb   :  { %4271 = vsyncpa [#allocation3 + $0x1], 1 }
0x13bc   :  { %4272 = vsyncpa [#allocation6], 1 }
0x13bd   :  { %4273 = vsyncpa [#allocation4], 1 }
0x13be   :  { %4275 = vsyncpa [#allocation4 + $0x1], 1 }

</bundles_post_ra>
